<compile_context>
chip_gen: v7x
topology: tpu7x:2x2x1
jax: 0.10.0
libtpu: 0.0.40
codegen_flags: <defaults>
</compile_context>

<pallas_src>
import math

import jax
import jax.numpy as jnp
from jax import lax
from jax.experimental import pallas as pl
from jax.experimental.pallas import tpu as pltpu

# ---------------- small synthetic Mamba config ----------------
VOCAB    = 100
D_MODEL  = 32                               # config.hidden_size
N_STATE  = 16                               # config.state_size
EXPAND   = 2
D_INNER  = EXPAND * D_MODEL                 # 64
DT_RANK  = max(1, math.ceil(D_MODEL / 16))  # 2
K_CONV   = 4
N_LAYERS = 2
BATCH    = 2
SEQ      = 8
EPS      = 1e-5

LB         = SEQ * BATCH                    # 16 rows of the packed stream
XPROJ_COLS = D_INNER + 2 * N_STATE          # 96  ([dt | B | C])
XPROJ_PAD  = 128                            # pad merged x_proj to full lanes


def _silu(x):
    return x * (1.0 / (1.0 + jnp.exp(-x)))


def _softplus(x):
    # numerically-stable softplus using only exp/log (Mosaic-friendly)
    return jnp.maximum(x, 0.0) + jnp.log(1.0 + jnp.exp(-jnp.abs(x)))


# ---------------- fully fused backbone + head kernel ----------------
def fused_mamba_kernel(h_ref, norm_w_ref, w_in_ref, conv_w_ref, conv_b_ref,
                       w_xproj_ref, dt_b_ref, a_ref, d_ref, w_out_ref,
                       norm_f_ref, reg_w_ref, reg_b_ref, o_ref):
    h = h_ref[...]                                            # (LB, D) f32

    for i in range(N_LAYERS):                                 # static unroll
        norm_w  = norm_w_ref[i]                               # (1, D)
        w_in    = w_in_ref[i]                                 # (D, 2E)
        conv_w  = conv_w_ref[i]                               # (K, E)
        conv_b  = conv_b_ref[i]                               # (1, E)
        w_xproj = w_xproj_ref[i]                              # (E, 128)
        dt_b    = dt_b_ref[i]                                 # (1, E)
        A       = a_ref[i]                                    # (N, E)  = -exp(a_log)
        Dp      = d_ref[i]                                    # (1, E)
        w_out   = w_out_ref[i]                                # (E, D)

        # --- RMSNorm ---
        var = jnp.mean(h * h, axis=-1, keepdims=True)
        hn = h * lax.rsqrt(var + EPS) * norm_w                # (LB, D)

        # --- merged in_proj: one (LB, D) @ (D, 2E) matmul ---
        xz = jnp.dot(hn, w_in, preferred_element_type=jnp.float32)  # (LB, 2E)
        x = xz[:, :D_INNER]                                   # (LB, E)
        z = xz[:, D_INNER:]                                   # (LB, E)

        # --- causal depthwise conv1d + SiLU as K shifted full-array MACs ---
        # term k multiplies conv_w[k] with x shifted forward in time by
        # s = K-1-k steps (zeros for t < s); a time shift is a shift of
        # s*BATCH rows of the packed stream, so batches never mix.
        x_conv = conv_b + conv_w[K_CONV - 1:K_CONV, :] * x
        for k in range(K_CONV - 1):
            rows = (K_CONV - 1 - k) * BATCH
            shifted = jnp.concatenate(
                [jnp.zeros((rows, D_INNER), jnp.float32), x[:LB - rows, :]],
                axis=0)                                       # (LB, E)
            x_conv = x_conv + conv_w[k:k + 1, :] * shifted
        x_act = _silu(x_conv)                                 # (LB, E)

        # --- merged x_proj: one (LB, E) @ (E, 128) matmul -> [dt | B | C | pad] ---
        dbc = jnp.dot(x_act, w_xproj, preferred_element_type=jnp.float32)
        dt_all = _softplus(dbc[:, :D_INNER] + dt_b)           # (LB, E)
        B_all  = dbc[:, D_INNER:D_INNER + N_STATE]            # (LB, N)
        C_all  = dbc[:, D_INNER + N_STATE:XPROJ_COLS]         # (LB, N)

        # --- selective scan: batched discretization, unrolled recurrence ---
        dA_all  = jnp.exp(dt_all[:, None, :] * A[None, :, :])           # (LB,N,E)
        dBx_all = (dt_all * x_act)[:, None, :] * B_all[:, :, None]      # (LB,N,E)

        state = jnp.zeros((BATCH, N_STATE, D_INNER), jnp.float32)
        y_parts = []
        for t in range(SEQ):
            lo = t * BATCH
            state = dA_all[lo:lo + BATCH] * state + dBx_all[lo:lo + BATCH]
            y_parts.append(
                jnp.sum(state * C_all[lo:lo + BATCH][:, :, None], axis=1))
        y = jnp.concatenate(y_parts, axis=0) + Dp * x_act     # (LB, E)

        # --- gate, out_proj, residual ---
        y = y * _silu(z)
        h = h + jnp.dot(y, w_out, preferred_element_type=jnp.float32)

    # --- final RMSNorm + regression head on the last token only ---
    h_last = h[LB - BATCH:, :]                                # (B, D)
    var = jnp.mean(h_last * h_last, axis=-1, keepdims=True)
    hn = h_last * lax.rsqrt(var + EPS) * norm_f_ref[...]
    o_ref[...] = jnp.dot(hn, reg_w_ref[...],
                         preferred_element_type=jnp.float32) + reg_b_ref[...]


_N_INPUTS = 13
_fused_call = pl.pallas_call(
    fused_mamba_kernel,
    out_shape=jax.ShapeDtypeStruct((BATCH, 1), jnp.float32),
    in_specs=[pl.BlockSpec(memory_space=pltpu.MemorySpace.VMEM)] * _N_INPUTS,
    out_specs=pl.BlockSpec(memory_space=pltpu.MemorySpace.VMEM),
)


# ---------------- parameter init (same distributions as before) ----------------
def init_params(key):
    def nrm(k, shape, scale=0.05):
        return scale * jax.random.normal(k, shape, jnp.float32)

    keys = jax.random.split(key, N_LAYERS + 2)
    emb = nrm(keys[0], (VOCAB, D_MODEL), 0.02)

    layers = []
    for i in range(N_LAYERS):
        ks = jax.random.split(keys[2 + i], 9)
        a_log = jnp.log(jnp.broadcast_to(
            jnp.arange(1, N_STATE + 1, dtype=jnp.float32)[:, None],
            (N_STATE, D_INNER)))
        layers.append(dict(
            norm_w=jnp.ones((1, D_MODEL), jnp.float32),
            w_in_x=nrm(ks[0], (D_MODEL, D_INNER)),
            w_in_z=nrm(ks[1], (D_MODEL, D_INNER)),
            conv_w=nrm(ks[2], (K_CONV, D_INNER)),          # depthwise, (K, E)
            conv_b=nrm(ks[3], (1, D_INNER)),
            w_dt_in=nrm(ks[4], (D_INNER, DT_RANK)),
            w_b=nrm(ks[5], (D_INNER, N_STATE)),
            w_c=nrm(ks[6], (D_INNER, N_STATE)),
            dt_w=nrm(ks[7], (DT_RANK, D_INNER)),
            dt_b=jnp.full((1, D_INNER), -2.0, jnp.float32),
            a_log=a_log,
            d=jnp.ones((1, D_INNER), jnp.float32),
            w_out=nrm(ks[8], (D_INNER, D_MODEL)),
        ))

    kh = jax.random.split(keys[1], 2)
    return dict(
        embedding=emb,
        layers=layers,
        norm_f=jnp.ones((1, D_MODEL), jnp.float32),
        # PyTorch creates the regression head lazily on first forward;
        # we initialize it deterministically up front (same forward semantics).
        reg_w=nrm(kh[0], (D_MODEL, 1)),
        reg_b=jnp.zeros((1, 1), jnp.float32),
    )


def pack_params(params):
    """Constant-fold / merge / stack per-layer parameters for the fused kernel."""
    layers = params["layers"]

    def stack(fn):
        return jnp.stack([fn(l) for l in layers], axis=0)

    xproj = []
    for l in layers:
        w_dt_eff = jnp.dot(l["w_dt_in"], l["dt_w"])                    # (E, E)
        w = jnp.concatenate([w_dt_eff, l["w_b"], l["w_c"]], axis=1)    # (E, 96)
        pad = jnp.zeros((D_INNER, XPROJ_PAD - XPROJ_COLS), jnp.float32)
        xproj.append(jnp.concatenate([w, pad], axis=1))                # (E, 128)

    return dict(
        embedding=params["embedding"],
        norm_w=stack(lambda l: l["norm_w"]),                           # (NL,1,D)
        w_in=stack(lambda l: jnp.concatenate([l["w_in_x"], l["w_in_z"]],
                                             axis=1)),                 # (NL,D,2E)
        conv_w=stack(lambda l: l["conv_w"]),                           # (NL,K,E)
        conv_b=stack(lambda l: l["conv_b"]),                           # (NL,1,E)
        w_xproj=jnp.stack(xproj, axis=0),                              # (NL,E,128)
        dt_b=stack(lambda l: l["dt_b"]),                               # (NL,1,E)
        A=stack(lambda l: -jnp.exp(l["a_log"])),                       # (NL,N,E)
        d=stack(lambda l: l["d"]),                                     # (NL,1,E)
        w_out=stack(lambda l: l["w_out"]),                             # (NL,E,D)
        norm_f=params["norm_f"],
        reg_w=params["reg_w"],
        reg_b=params["reg_b"],
    )


@jax.jit
def mamba_for_regression(packed, input_ids, attention_mask=None):
    # attention_mask accepted for API parity; unused (matches the None path).
    del attention_mask
    # Embedding gather stays in plain JAX; everything else runs in one kernel.
    emb = jnp.take(packed["embedding"], input_ids, axis=0)        # (B, L, D)
    h = jnp.transpose(emb, (1, 0, 2)).astype(jnp.float32)         # (L, B, D)
    h = h.reshape(LB, D_MODEL)                                    # row = t*B + b
    return _fused_call(
        h,
        packed["norm_w"], packed["w_in"], packed["conv_w"], packed["conv_b"],
        packed["w_xproj"], packed["dt_b"], packed["A"], packed["d"],
        packed["w_out"], packed["norm_f"], packed["reg_w"], packed["reg_b"])


if __name__ == "__main__":
    key = jax.random.PRNGKey(0)
    k_param, k_ids = jax.random.split(key)
    packed = pack_params(init_params(k_param))
    input_ids = jax.random.randint(k_ids, (BATCH, SEQ), 0, VOCAB,
                                   dtype=jnp.int32)
    out = mamba_for_regression(packed, input_ids)                 # (B, 1)
    jax.block_until_ready(out)
    assert out.shape == (BATCH, 1) and out.dtype == jnp.float32
    print("KERNEL_OK")
</pallas_src>

<mosaic_0001>
module attributes {stable_mosaic.version = 11 : i64} {
  func.func @fused_mamba_kernel(%arg0: memref<16x32xf32, #tpu.memory_space<vmem>>, %arg1: memref<2x1x32xf32, #tpu.memory_space<vmem>>, %arg2: memref<2x32x128xf32, #tpu.memory_space<vmem>>, %arg3: memref<2x4x64xf32, #tpu.memory_space<vmem>>, %arg4: memref<2x1x64xf32, #tpu.memory_space<vmem>>, %arg5: memref<2x64x128xf32, #tpu.memory_space<vmem>>, %arg6: memref<2x1x64xf32, #tpu.memory_space<vmem>>, %arg7: memref<2x16x64xf32, #tpu.memory_space<vmem>>, %arg8: memref<2x1x64xf32, #tpu.memory_space<vmem>>, %arg9: memref<2x64x32xf32, #tpu.memory_space<vmem>>, %arg10: memref<1x32xf32, #tpu.memory_space<vmem>>, %arg11: memref<32x1xf32, #tpu.memory_space<vmem>>, %arg12: memref<1x1xf32, #tpu.memory_space<vmem>>, %arg13: memref<2x1xf32, #tpu.memory_space<vmem>>) attributes {dimension_semantics = [], scalar_prefetch = 0 : i64, scratch_operands = 0 : i64, tpu.core_type = #tpu.core_type<tc>} {
    %c0 = arith.constant 0 : index
    %c0_0 = arith.constant 0 : index
    %0 = vector.load %arg0[%c0, %c0_0] : memref<16x32xf32, #tpu.memory_space<vmem>>, vector<16x32xf32>
    %c0_1 = arith.constant 0 : index
    %c0_2 = arith.constant 0 : index
    %c0_3 = arith.constant 0 : index
    %1 = vector.load %arg1[%c0_1, %c0_2, %c0_3] : memref<2x1x32xf32, #tpu.memory_space<vmem>>, vector<1x1x32xf32>
    %2 = vector.shape_cast %1 : vector<1x1x32xf32> to vector<1x32xf32>
    %c0_4 = arith.constant 0 : index
    %c0_5 = arith.constant 0 : index
    %c0_6 = arith.constant 0 : index
    %3 = vector.load %arg2[%c0_4, %c0_5, %c0_6] : memref<2x32x128xf32, #tpu.memory_space<vmem>>, vector<1x32x128xf32>
    %4 = vector.shape_cast %3 : vector<1x32x128xf32> to vector<32x128xf32>
    %c0_7 = arith.constant 0 : index
    %c0_8 = arith.constant 0 : index
    %c0_9 = arith.constant 0 : index
    %5 = vector.load %arg3[%c0_7, %c0_8, %c0_9] : memref<2x4x64xf32, #tpu.memory_space<vmem>>, vector<1x4x64xf32>
    %6 = vector.shape_cast %5 : vector<1x4x64xf32> to vector<4x64xf32>
    %c0_10 = arith.constant 0 : index
    %c0_11 = arith.constant 0 : index
    %c0_12 = arith.constant 0 : index
    %7 = vector.load %arg4[%c0_10, %c0_11, %c0_12] : memref<2x1x64xf32, #tpu.memory_space<vmem>>, vector<1x1x64xf32>
    %8 = vector.shape_cast %7 : vector<1x1x64xf32> to vector<1x64xf32>
    %c0_13 = arith.constant 0 : index
    %c0_14 = arith.constant 0 : index
    %c0_15 = arith.constant 0 : index
    %9 = vector.load %arg5[%c0_13, %c0_14, %c0_15] : memref<2x64x128xf32, #tpu.memory_space<vmem>>, vector<1x64x128xf32>
    %10 = vector.shape_cast %9 : vector<1x64x128xf32> to vector<64x128xf32>
    %c0_16 = arith.constant 0 : index
    %c0_17 = arith.constant 0 : index
    %c0_18 = arith.constant 0 : index
    %11 = vector.load %arg6[%c0_16, %c0_17, %c0_18] : memref<2x1x64xf32, #tpu.memory_space<vmem>>, vector<1x1x64xf32>
    %12 = vector.shape_cast %11 : vector<1x1x64xf32> to vector<1x64xf32>
    %c0_19 = arith.constant 0 : index
    %c0_20 = arith.constant 0 : index
    %c0_21 = arith.constant 0 : index
    %13 = vector.load %arg7[%c0_19, %c0_20, %c0_21] : memref<2x16x64xf32, #tpu.memory_space<vmem>>, vector<1x16x64xf32>
    %14 = vector.shape_cast %13 : vector<1x16x64xf32> to vector<16x64xf32>
    %c0_22 = arith.constant 0 : index
    %c0_23 = arith.constant 0 : index
    %c0_24 = arith.constant 0 : index
    %15 = vector.load %arg8[%c0_22, %c0_23, %c0_24] : memref<2x1x64xf32, #tpu.memory_space<vmem>>, vector<1x1x64xf32>
    %16 = vector.shape_cast %15 : vector<1x1x64xf32> to vector<1x64xf32>
    %c0_25 = arith.constant 0 : index
    %c0_26 = arith.constant 0 : index
    %c0_27 = arith.constant 0 : index
    %17 = vector.load %arg9[%c0_25, %c0_26, %c0_27] : memref<2x64x32xf32, #tpu.memory_space<vmem>>, vector<1x64x32xf32>
    %18 = vector.shape_cast %17 : vector<1x64x32xf32> to vector<64x32xf32>
    %19 = arith.mulf %0, %0 : vector<16x32xf32>
    %cst = arith.constant dense<0.000000e+00> : vector<16xf32>
    %20 = vector.multi_reduction <add>, %19, %cst [1] : vector<16x32xf32> to vector<16xf32>
    %21 = vector.shape_cast %20 : vector<16xf32> to vector<16x1xf32>
    %cst_28 = arith.constant 3.200000e+01 : f32
    %22 = vector.broadcast %cst_28 : f32 to vector<16x1xf32>
    %23 = arith.divf %21, %22 : vector<16x1xf32>
    %cst_29 = arith.constant 9.99999974E-6 : f32
    %24 = vector.broadcast %cst_29 : f32 to vector<16x1xf32>
    %25 = arith.addf %23, %24 : vector<16x1xf32>
    %26 = math.rsqrt %25 : vector<16x1xf32>
    %27 = vector.broadcast %26 : vector<16x1xf32> to vector<16x32xf32>
    %28 = arith.mulf %0, %27 : vector<16x32xf32>
    %29 = vector.broadcast %2 : vector<1x32xf32> to vector<16x32xf32>
    %30 = arith.mulf %28, %29 : vector<16x32xf32>
    %cst_30 = arith.constant dense<0.000000e+00> : vector<16x128xf32>
    %31 = tpu.matmul %30, %4, %cst_30 {dimension_numbers = #tpu.dot_dimension_numbers<[1], [0], [0], [1], [0, 0, 1, 1], [], []>} : vector<16x32xf32>, vector<32x128xf32>, vector<16x128xf32> -> vector<16x128xf32>
    %32 = vector.extract_strided_slice %31 {offsets = [0, 0], sizes = [16, 64], strides = [1, 1]} : vector<16x128xf32> to vector<16x64xf32>
    %33 = vector.extract_strided_slice %31 {offsets = [0, 64], sizes = [16, 64], strides = [1, 1]} : vector<16x128xf32> to vector<16x64xf32>
    %34 = vector.extract_strided_slice %6 {offsets = [3, 0], sizes = [1, 64], strides = [1, 1]} : vector<4x64xf32> to vector<1x64xf32>
    %35 = vector.broadcast %34 : vector<1x64xf32> to vector<16x64xf32>
    %36 = arith.mulf %35, %32 : vector<16x64xf32>
    %37 = vector.broadcast %8 : vector<1x64xf32> to vector<16x64xf32>
    %38 = arith.addf %37, %36 : vector<16x64xf32>
    %cst_31 = arith.constant 0.000000e+00 : f32
    %39 = vector.broadcast %cst_31 : f32 to vector<6x64xf32>
    %40 = vector.extract_strided_slice %32 {offsets = [0, 0], sizes = [10, 64], strides = [1, 1]} : vector<16x64xf32> to vector<10x64xf32>
    %41 = tpu.concatenate %39, %40 in 0 : vector<6x64xf32>, vector<10x64xf32> -> vector<16x64xf32>
    %42 = vector.extract_strided_slice %6 {offsets = [0, 0], sizes = [1, 64], strides = [1, 1]} : vector<4x64xf32> to vector<1x64xf32>
    %43 = vector.broadcast %42 : vector<1x64xf32> to vector<16x64xf32>
    %44 = arith.mulf %43, %41 : vector<16x64xf32>
    %45 = arith.addf %38, %44 : vector<16x64xf32>
    %cst_32 = arith.constant 0.000000e+00 : f32
    %46 = vector.broadcast %cst_32 : f32 to vector<4x64xf32>
    %47 = vector.extract_strided_slice %32 {offsets = [0, 0], sizes = [12, 64], strides = [1, 1]} : vector<16x64xf32> to vector<12x64xf32>
    %48 = tpu.concatenate %46, %47 in 0 : vector<4x64xf32>, vector<12x64xf32> -> vector<16x64xf32>
    %49 = vector.extract_strided_slice %6 {offsets = [1, 0], sizes = [1, 64], strides = [1, 1]} : vector<4x64xf32> to vector<1x64xf32>
    %50 = vector.broadcast %49 : vector<1x64xf32> to vector<16x64xf32>
    %51 = arith.mulf %50, %48 : vector<16x64xf32>
    %52 = arith.addf %45, %51 : vector<16x64xf32>
    %cst_33 = arith.constant 0.000000e+00 : f32
    %53 = vector.broadcast %cst_33 : f32 to vector<2x64xf32>
    %54 = vector.extract_strided_slice %32 {offsets = [0, 0], sizes = [14, 64], strides = [1, 1]} : vector<16x64xf32> to vector<14x64xf32>
    %55 = tpu.concatenate %53, %54 in 0 : vector<2x64xf32>, vector<14x64xf32> -> vector<16x64xf32>
    %56 = vector.extract_strided_slice %6 {offsets = [2, 0], sizes = [1, 64], strides = [1, 1]} : vector<4x64xf32> to vector<1x64xf32>
    %57 = vector.broadcast %56 : vector<1x64xf32> to vector<16x64xf32>
    %58 = arith.mulf %57, %55 : vector<16x64xf32>
    %59 = arith.addf %52, %58 : vector<16x64xf32>
    %cst_34 = arith.constant 0.000000e+00 : f32
    %60 = vector.broadcast %cst_34 : f32 to vector<16x64xf32>
    %61 = arith.subf %60, %59 : vector<16x64xf32>
    %62 = math.exp %61 : vector<16x64xf32>
    %cst_35 = arith.constant 1.000000e+00 : f32
    %63 = vector.broadcast %cst_35 : f32 to vector<16x64xf32>
    %64 = arith.addf %63, %62 : vector<16x64xf32>
    %cst_36 = arith.constant 1.000000e+00 : f32
    %65 = vector.broadcast %cst_36 : f32 to vector<16x64xf32>
    %66 = arith.divf %65, %64 : vector<16x64xf32>
    %67 = arith.mulf %59, %66 : vector<16x64xf32>
    %cst_37 = arith.constant dense<0.000000e+00> : vector<16x128xf32>
    %68 = tpu.matmul %67, %10, %cst_37 {dimension_numbers = #tpu.dot_dimension_numbers<[1], [0], [0], [1], [0, 0, 1, 1], [], []>} : vector<16x64xf32>, vector<64x128xf32>, vector<16x128xf32> -> vector<16x128xf32>
    %69 = vector.extract_strided_slice %68 {offsets = [0, 0], sizes = [16, 64], strides = [1, 1]} : vector<16x128xf32> to vector<16x64xf32>
    %70 = vector.broadcast %12 : vector<1x64xf32> to vector<16x64xf32>
    %71 = arith.addf %69, %70 : vector<16x64xf32>
    %cst_38 = arith.constant 0.000000e+00 : f32
    %72 = vector.broadcast %cst_38 : f32 to vector<16x64xf32>
    %73 = arith.maximumf %71, %72 : vector<16x64xf32>
    %74 = math.absf %71 : vector<16x64xf32>
    %cst_39 = arith.constant 0.000000e+00 : f32
    %75 = vector.broadcast %cst_39 : f32 to vector<16x64xf32>
    %76 = arith.subf %75, %74 : vector<16x64xf32>
    %77 = math.exp %76 : vector<16x64xf32>
    %cst_40 = arith.constant 1.000000e+00 : f32
    %78 = vector.broadcast %cst_40 : f32 to vector<16x64xf32>
    %79 = arith.addf %78, %77 : vector<16x64xf32>
    %80 = math.log %79 : vector<16x64xf32>
    %81 = arith.addf %73, %80 : vector<16x64xf32>
    %82 = vector.extract_strided_slice %68 {offsets = [0, 64], sizes = [16, 16], strides = [1, 1]} : vector<16x128xf32> to vector<16x16xf32>
    %83 = vector.extract_strided_slice %68 {offsets = [0, 80], sizes = [16, 16], strides = [1, 1]} : vector<16x128xf32> to vector<16x16xf32>
    %84 = vector.shape_cast %81 : vector<16x64xf32> to vector<16x1x64xf32>
    %85 = vector.shape_cast %14 : vector<16x64xf32> to vector<1x16x64xf32>
    %86 = vector.broadcast %84 : vector<16x1x64xf32> to vector<16x16x64xf32>
    %87 = vector.broadcast %85 : vector<1x16x64xf32> to vector<16x16x64xf32>
    %88 = arith.mulf %86, %87 : vector<16x16x64xf32>
    %89 = math.exp %88 : vector<16x16x64xf32>
    %90 = arith.mulf %81, %67 : vector<16x64xf32>
    %91 = vector.shape_cast %90 : vector<16x64xf32> to vector<16x1x64xf32>
    %92 = vector.shape_cast %82 : vector<16x16xf32> to vector<16x16x1xf32>
    %93 = vector.broadcast %91 : vector<16x1x64xf32> to vector<16x16x64xf32>
    %94 = vector.broadcast %92 : vector<16x16x1xf32> to vector<16x16x64xf32>
    %95 = arith.mulf %93, %94 : vector<16x16x64xf32>
    %cst_41 = arith.constant 0.000000e+00 : f32
    %96 = vector.broadcast %cst_41 : f32 to vector<2x16x64xf32>
    %97 = vector.extract_strided_slice %89 {offsets = [0, 0, 0], sizes = [2, 16, 64], strides = [1, 1, 1]} : vector<16x16x64xf32> to vector<2x16x64xf32>
    %98 = arith.mulf %97, %96 : vector<2x16x64xf32>
    %99 = vector.extract_strided_slice %95 {offsets = [0, 0, 0], sizes = [2, 16, 64], strides = [1, 1, 1]} : vector<16x16x64xf32> to vector<2x16x64xf32>
    %100 = arith.addf %98, %99 : vector<2x16x64xf32>
    %101 = vector.extract_strided_slice %83 {offsets = [0, 0], sizes = [2, 16], strides = [1, 1]} : vector<16x16xf32> to vector<2x16xf32>
    %102 = vector.shape_cast %101 : vector<2x16xf32> to vector<2x16x1xf32>
    %103 = vector.broadcast %102 : vector<2x16x1xf32> to vector<2x16x64xf32>
    %104 = arith.mulf %100, %103 : vector<2x16x64xf32>
    %cst_42 = arith.constant dense<0.000000e+00> : vector<2x64xf32>
    %105 = vector.multi_reduction <add>, %104, %cst_42 [1] : vector<2x16x64xf32> to vector<2x64xf32>
    %106 = vector.extract_strided_slice %89 {offsets = [2, 0, 0], sizes = [2, 16, 64], strides = [1, 1, 1]} : vector<16x16x64xf32> to vector<2x16x64xf32>
    %107 = arith.mulf %106, %100 : vector<2x16x64xf32>
    %108 = vector.extract_strided_slice %95 {offsets = [2, 0, 0], sizes = [2, 16, 64], strides = [1, 1, 1]} : vector<16x16x64xf32> to vector<2x16x64xf32>
    %109 = arith.addf %107, %108 : vector<2x16x64xf32>
    %110 = vector.extract_strided_slice %83 {offsets = [2, 0], sizes = [2, 16], strides = [1, 1]} : vector<16x16xf32> to vector<2x16xf32>
    %111 = vector.shape_cast %110 : vector<2x16xf32> to vector<2x16x1xf32>
    %112 = vector.broadcast %111 : vector<2x16x1xf32> to vector<2x16x64xf32>
    %113 = arith.mulf %109, %112 : vector<2x16x64xf32>
    %cst_43 = arith.constant dense<0.000000e+00> : vector<2x64xf32>
    %114 = vector.multi_reduction <add>, %113, %cst_43 [1] : vector<2x16x64xf32> to vector<2x64xf32>
    %115 = vector.extract_strided_slice %89 {offsets = [4, 0, 0], sizes = [2, 16, 64], strides = [1, 1, 1]} : vector<16x16x64xf32> to vector<2x16x64xf32>
    %116 = arith.mulf %115, %109 : vector<2x16x64xf32>
    %117 = vector.extract_strided_slice %95 {offsets = [4, 0, 0], sizes = [2, 16, 64], strides = [1, 1, 1]} : vector<16x16x64xf32> to vector<2x16x64xf32>
    %118 = arith.addf %116, %117 : vector<2x16x64xf32>
    %119 = vector.extract_strided_slice %83 {offsets = [4, 0], sizes = [2, 16], strides = [1, 1]} : vector<16x16xf32> to vector<2x16xf32>
    %120 = vector.shape_cast %119 : vector<2x16xf32> to vector<2x16x1xf32>
    %121 = vector.broadcast %120 : vector<2x16x1xf32> to vector<2x16x64xf32>
    %122 = arith.mulf %118, %121 : vector<2x16x64xf32>
    %cst_44 = arith.constant dense<0.000000e+00> : vector<2x64xf32>
    %123 = vector.multi_reduction <add>, %122, %cst_44 [1] : vector<2x16x64xf32> to vector<2x64xf32>
    %124 = vector.extract_strided_slice %89 {offsets = [6, 0, 0], sizes = [2, 16, 64], strides = [1, 1, 1]} : vector<16x16x64xf32> to vector<2x16x64xf32>
    %125 = arith.mulf %124, %118 : vector<2x16x64xf32>
    %126 = vector.extract_strided_slice %95 {offsets = [6, 0, 0], sizes = [2, 16, 64], strides = [1, 1, 1]} : vector<16x16x64xf32> to vector<2x16x64xf32>
    %127 = arith.addf %125, %126 : vector<2x16x64xf32>
    %128 = vector.extract_strided_slice %83 {offsets = [6, 0], sizes = [2, 16], strides = [1, 1]} : vector<16x16xf32> to vector<2x16xf32>
    %129 = vector.shape_cast %128 : vector<2x16xf32> to vector<2x16x1xf32>
    %130 = vector.broadcast %129 : vector<2x16x1xf32> to vector<2x16x64xf32>
    %131 = arith.mulf %127, %130 : vector<2x16x64xf32>
    %cst_45 = arith.constant dense<0.000000e+00> : vector<2x64xf32>
    %132 = vector.multi_reduction <add>, %131, %cst_45 [1] : vector<2x16x64xf32> to vector<2x64xf32>
    %133 = vector.extract_strided_slice %89 {offsets = [8, 0, 0], sizes = [2, 16, 64], strides = [1, 1, 1]} : vector<16x16x64xf32> to vector<2x16x64xf32>
    %134 = arith.mulf %133, %127 : vector<2x16x64xf32>
    %135 = vector.extract_strided_slice %95 {offsets = [8, 0, 0], sizes = [2, 16, 64], strides = [1, 1, 1]} : vector<16x16x64xf32> to vector<2x16x64xf32>
    %136 = arith.addf %134, %135 : vector<2x16x64xf32>
    %137 = vector.extract_strided_slice %83 {offsets = [8, 0], sizes = [2, 16], strides = [1, 1]} : vector<16x16xf32> to vector<2x16xf32>
    %138 = vector.shape_cast %137 : vector<2x16xf32> to vector<2x16x1xf32>
    %139 = vector.broadcast %138 : vector<2x16x1xf32> to vector<2x16x64xf32>
    %140 = arith.mulf %136, %139 : vector<2x16x64xf32>
    %cst_46 = arith.constant dense<0.000000e+00> : vector<2x64xf32>
    %141 = vector.multi_reduction <add>, %140, %cst_46 [1] : vector<2x16x64xf32> to vector<2x64xf32>
    %142 = vector.extract_strided_slice %89 {offsets = [10, 0, 0], sizes = [2, 16, 64], strides = [1, 1, 1]} : vector<16x16x64xf32> to vector<2x16x64xf32>
    %143 = arith.mulf %142, %136 : vector<2x16x64xf32>
    %144 = vector.extract_strided_slice %95 {offsets = [10, 0, 0], sizes = [2, 16, 64], strides = [1, 1, 1]} : vector<16x16x64xf32> to vector<2x16x64xf32>
    %145 = arith.addf %143, %144 : vector<2x16x64xf32>
    %146 = vector.extract_strided_slice %83 {offsets = [10, 0], sizes = [2, 16], strides = [1, 1]} : vector<16x16xf32> to vector<2x16xf32>
    %147 = vector.shape_cast %146 : vector<2x16xf32> to vector<2x16x1xf32>
    %148 = vector.broadcast %147 : vector<2x16x1xf32> to vector<2x16x64xf32>
    %149 = arith.mulf %145, %148 : vector<2x16x64xf32>
    %cst_47 = arith.constant dense<0.000000e+00> : vector<2x64xf32>
    %150 = vector.multi_reduction <add>, %149, %cst_47 [1] : vector<2x16x64xf32> to vector<2x64xf32>
    %151 = vector.extract_strided_slice %89 {offsets = [12, 0, 0], sizes = [2, 16, 64], strides = [1, 1, 1]} : vector<16x16x64xf32> to vector<2x16x64xf32>
    %152 = arith.mulf %151, %145 : vector<2x16x64xf32>
    %153 = vector.extract_strided_slice %95 {offsets = [12, 0, 0], sizes = [2, 16, 64], strides = [1, 1, 1]} : vector<16x16x64xf32> to vector<2x16x64xf32>
    %154 = arith.addf %152, %153 : vector<2x16x64xf32>
    %155 = vector.extract_strided_slice %83 {offsets = [12, 0], sizes = [2, 16], strides = [1, 1]} : vector<16x16xf32> to vector<2x16xf32>
    %156 = vector.shape_cast %155 : vector<2x16xf32> to vector<2x16x1xf32>
    %157 = vector.broadcast %156 : vector<2x16x1xf32> to vector<2x16x64xf32>
    %158 = arith.mulf %154, %157 : vector<2x16x64xf32>
    %cst_48 = arith.constant dense<0.000000e+00> : vector<2x64xf32>
    %159 = vector.multi_reduction <add>, %158, %cst_48 [1] : vector<2x16x64xf32> to vector<2x64xf32>
    %160 = vector.extract_strided_slice %89 {offsets = [14, 0, 0], sizes = [2, 16, 64], strides = [1, 1, 1]} : vector<16x16x64xf32> to vector<2x16x64xf32>
    %161 = arith.mulf %160, %154 : vector<2x16x64xf32>
    %162 = vector.extract_strided_slice %95 {offsets = [14, 0, 0], sizes = [2, 16, 64], strides = [1, 1, 1]} : vector<16x16x64xf32> to vector<2x16x64xf32>
    %163 = arith.addf %161, %162 : vector<2x16x64xf32>
    %164 = vector.extract_strided_slice %83 {offsets = [14, 0], sizes = [2, 16], strides = [1, 1]} : vector<16x16xf32> to vector<2x16xf32>
    %165 = vector.shape_cast %164 : vector<2x16xf32> to vector<2x16x1xf32>
    %166 = vector.broadcast %165 : vector<2x16x1xf32> to vector<2x16x64xf32>
    %167 = arith.mulf %163, %166 : vector<2x16x64xf32>
    %cst_49 = arith.constant dense<0.000000e+00> : vector<2x64xf32>
    %168 = vector.multi_reduction <add>, %167, %cst_49 [1] : vector<2x16x64xf32> to vector<2x64xf32>
    %169 = tpu.concatenate %105, %114, %123, %132, %141, %150, %159, %168 in 0 : vector<2x64xf32>, vector<2x64xf32>, vector<2x64xf32>, vector<2x64xf32>, vector<2x64xf32>, vector<2x64xf32>, vector<2x64xf32>, vector<2x64xf32> -> vector<16x64xf32>
    %170 = vector.broadcast %16 : vector<1x64xf32> to vector<16x64xf32>
    %171 = arith.mulf %170, %67 : vector<16x64xf32>
    %172 = arith.addf %169, %171 : vector<16x64xf32>
    %cst_50 = arith.constant 0.000000e+00 : f32
    %173 = vector.broadcast %cst_50 : f32 to vector<16x64xf32>
    %174 = arith.subf %173, %33 : vector<16x64xf32>
    %175 = math.exp %174 : vector<16x64xf32>
    %cst_51 = arith.constant 1.000000e+00 : f32
    %176 = vector.broadcast %cst_51 : f32 to vector<16x64xf32>
    %177 = arith.addf %176, %175 : vector<16x64xf32>
    %cst_52 = arith.constant 1.000000e+00 : f32
    %178 = vector.broadcast %cst_52 : f32 to vector<16x64xf32>
    %179 = arith.divf %178, %177 : vector<16x64xf32>
    %180 = arith.mulf %33, %179 : vector<16x64xf32>
    %181 = arith.mulf %172, %180 : vector<16x64xf32>
    %cst_53 = arith.constant dense<0.000000e+00> : vector<16x32xf32>
    %182 = tpu.matmul %181, %18, %cst_53 {dimension_numbers = #tpu.dot_dimension_numbers<[1], [0], [0], [1], [0, 0, 1, 1], [], []>} : vector<16x64xf32>, vector<64x32xf32>, vector<16x32xf32> -> vector<16x32xf32>
    %183 = arith.addf %0, %182 : vector<16x32xf32>
    %c1 = arith.constant 1 : index
    %c0_54 = arith.constant 0 : index
    %c0_55 = arith.constant 0 : index
    %184 = vector.load %arg1[%c1, %c0_54, %c0_55] : memref<2x1x32xf32, #tpu.memory_space<vmem>>, vector<1x1x32xf32>
    %185 = vector.shape_cast %184 : vector<1x1x32xf32> to vector<1x32xf32>
    %c1_56 = arith.constant 1 : index
    %c0_57 = arith.constant 0 : index
    %c0_58 = arith.constant 0 : index
    %186 = vector.load %arg2[%c1_56, %c0_57, %c0_58] : memref<2x32x128xf32, #tpu.memory_space<vmem>>, vector<1x32x128xf32>
    %187 = vector.shape_cast %186 : vector<1x32x128xf32> to vector<32x128xf32>
    %c1_59 = arith.constant 1 : index
    %c0_60 = arith.constant 0 : index
    %c0_61 = arith.constant 0 : index
    %188 = vector.load %arg3[%c1_59, %c0_60, %c0_61] : memref<2x4x64xf32, #tpu.memory_space<vmem>>, vector<1x4x64xf32>
    %189 = vector.shape_cast %188 : vector<1x4x64xf32> to vector<4x64xf32>
    %c1_62 = arith.constant 1 : index
    %c0_63 = arith.constant 0 : index
    %c0_64 = arith.constant 0 : index
    %190 = vector.load %arg4[%c1_62, %c0_63, %c0_64] : memref<2x1x64xf32, #tpu.memory_space<vmem>>, vector<1x1x64xf32>
    %191 = vector.shape_cast %190 : vector<1x1x64xf32> to vector<1x64xf32>
    %c1_65 = arith.constant 1 : index
    %c0_66 = arith.constant 0 : index
    %c0_67 = arith.constant 0 : index
    %192 = vector.load %arg5[%c1_65, %c0_66, %c0_67] : memref<2x64x128xf32, #tpu.memory_space<vmem>>, vector<1x64x128xf32>
    %193 = vector.shape_cast %192 : vector<1x64x128xf32> to vector<64x128xf32>
    %c1_68 = arith.constant 1 : index
    %c0_69 = arith.constant 0 : index
    %c0_70 = arith.constant 0 : index
    %194 = vector.load %arg6[%c1_68, %c0_69, %c0_70] : memref<2x1x64xf32, #tpu.memory_space<vmem>>, vector<1x1x64xf32>
    %195 = vector.shape_cast %194 : vector<1x1x64xf32> to vector<1x64xf32>
    %c1_71 = arith.constant 1 : index
    %c0_72 = arith.constant 0 : index
    %c0_73 = arith.constant 0 : index
    %196 = vector.load %arg7[%c1_71, %c0_72, %c0_73] : memref<2x16x64xf32, #tpu.memory_space<vmem>>, vector<1x16x64xf32>
    %197 = vector.shape_cast %196 : vector<1x16x64xf32> to vector<16x64xf32>
    %c1_74 = arith.constant 1 : index
    %c0_75 = arith.constant 0 : index
    %c0_76 = arith.constant 0 : index
    %198 = vector.load %arg8[%c1_74, %c0_75, %c0_76] : memref<2x1x64xf32, #tpu.memory_space<vmem>>, vector<1x1x64xf32>
    %199 = vector.shape_cast %198 : vector<1x1x64xf32> to vector<1x64xf32>
    %c1_77 = arith.constant 1 : index
    %c0_78 = arith.constant 0 : index
    %c0_79 = arith.constant 0 : index
    %200 = vector.load %arg9[%c1_77, %c0_78, %c0_79] : memref<2x64x32xf32, #tpu.memory_space<vmem>>, vector<1x64x32xf32>
    %201 = vector.shape_cast %200 : vector<1x64x32xf32> to vector<64x32xf32>
    %202 = arith.mulf %183, %183 : vector<16x32xf32>
    %cst_80 = arith.constant dense<0.000000e+00> : vector<16xf32>
    %203 = vector.multi_reduction <add>, %202, %cst_80 [1] : vector<16x32xf32> to vector<16xf32>
    %204 = vector.shape_cast %203 : vector<16xf32> to vector<16x1xf32>
    %cst_81 = arith.constant 3.200000e+01 : f32
    %205 = vector.broadcast %cst_81 : f32 to vector<16x1xf32>
    %206 = arith.divf %204, %205 : vector<16x1xf32>
    %cst_82 = arith.constant 9.99999974E-6 : f32
    %207 = vector.broadcast %cst_82 : f32 to vector<16x1xf32>
    %208 = arith.addf %206, %207 : vector<16x1xf32>
    %209 = math.rsqrt %208 : vector<16x1xf32>
    %210 = vector.broadcast %209 : vector<16x1xf32> to vector<16x32xf32>
    %211 = arith.mulf %183, %210 : vector<16x32xf32>
    %212 = vector.broadcast %185 : vector<1x32xf32> to vector<16x32xf32>
    %213 = arith.mulf %211, %212 : vector<16x32xf32>
    %cst_83 = arith.constant dense<0.000000e+00> : vector<16x128xf32>
    %214 = tpu.matmul %213, %187, %cst_83 {dimension_numbers = #tpu.dot_dimension_numbers<[1], [0], [0], [1], [0, 0, 1, 1], [], []>} : vector<16x32xf32>, vector<32x128xf32>, vector<16x128xf32> -> vector<16x128xf32>
    %215 = vector.extract_strided_slice %214 {offsets = [0, 0], sizes = [16, 64], strides = [1, 1]} : vector<16x128xf32> to vector<16x64xf32>
    %216 = vector.extract_strided_slice %214 {offsets = [0, 64], sizes = [16, 64], strides = [1, 1]} : vector<16x128xf32> to vector<16x64xf32>
    %217 = vector.extract_strided_slice %189 {offsets = [3, 0], sizes = [1, 64], strides = [1, 1]} : vector<4x64xf32> to vector<1x64xf32>
    %218 = vector.broadcast %217 : vector<1x64xf32> to vector<16x64xf32>
    %219 = arith.mulf %218, %215 : vector<16x64xf32>
    %220 = vector.broadcast %191 : vector<1x64xf32> to vector<16x64xf32>
    %221 = arith.addf %220, %219 : vector<16x64xf32>
    %cst_84 = arith.constant 0.000000e+00 : f32
    %222 = vector.broadcast %cst_84 : f32 to vector<6x64xf32>
    %223 = vector.extract_strided_slice %215 {offsets = [0, 0], sizes = [10, 64], strides = [1, 1]} : vector<16x64xf32> to vector<10x64xf32>
    %224 = tpu.concatenate %222, %223 in 0 : vector<6x64xf32>, vector<10x64xf32> -> vector<16x64xf32>
    %225 = vector.extract_strided_slice %189 {offsets = [0, 0], sizes = [1, 64], strides = [1, 1]} : vector<4x64xf32> to vector<1x64xf32>
    %226 = vector.broadcast %225 : vector<1x64xf32> to vector<16x64xf32>
    %227 = arith.mulf %226, %224 : vector<16x64xf32>
    %228 = arith.addf %221, %227 : vector<16x64xf32>
    %cst_85 = arith.constant 0.000000e+00 : f32
    %229 = vector.broadcast %cst_85 : f32 to vector<4x64xf32>
    %230 = vector.extract_strided_slice %215 {offsets = [0, 0], sizes = [12, 64], strides = [1, 1]} : vector<16x64xf32> to vector<12x64xf32>
    %231 = tpu.concatenate %229, %230 in 0 : vector<4x64xf32>, vector<12x64xf32> -> vector<16x64xf32>
    %232 = vector.extract_strided_slice %189 {offsets = [1, 0], sizes = [1, 64], strides = [1, 1]} : vector<4x64xf32> to vector<1x64xf32>
    %233 = vector.broadcast %232 : vector<1x64xf32> to vector<16x64xf32>
    %234 = arith.mulf %233, %231 : vector<16x64xf32>
    %235 = arith.addf %228, %234 : vector<16x64xf32>
    %cst_86 = arith.constant 0.000000e+00 : f32
    %236 = vector.broadcast %cst_86 : f32 to vector<2x64xf32>
    %237 = vector.extract_strided_slice %215 {offsets = [0, 0], sizes = [14, 64], strides = [1, 1]} : vector<16x64xf32> to vector<14x64xf32>
    %238 = tpu.concatenate %236, %237 in 0 : vector<2x64xf32>, vector<14x64xf32> -> vector<16x64xf32>
    %239 = vector.extract_strided_slice %189 {offsets = [2, 0], sizes = [1, 64], strides = [1, 1]} : vector<4x64xf32> to vector<1x64xf32>
    %240 = vector.broadcast %239 : vector<1x64xf32> to vector<16x64xf32>
    %241 = arith.mulf %240, %238 : vector<16x64xf32>
    %242 = arith.addf %235, %241 : vector<16x64xf32>
    %cst_87 = arith.constant 0.000000e+00 : f32
    %243 = vector.broadcast %cst_87 : f32 to vector<16x64xf32>
    %244 = arith.subf %243, %242 : vector<16x64xf32>
    %245 = math.exp %244 : vector<16x64xf32>
    %cst_88 = arith.constant 1.000000e+00 : f32
    %246 = vector.broadcast %cst_88 : f32 to vector<16x64xf32>
    %247 = arith.addf %246, %245 : vector<16x64xf32>
    %cst_89 = arith.constant 1.000000e+00 : f32
    %248 = vector.broadcast %cst_89 : f32 to vector<16x64xf32>
    %249 = arith.divf %248, %247 : vector<16x64xf32>
    %250 = arith.mulf %242, %249 : vector<16x64xf32>
    %cst_90 = arith.constant dense<0.000000e+00> : vector<16x128xf32>
    %251 = tpu.matmul %250, %193, %cst_90 {dimension_numbers = #tpu.dot_dimension_numbers<[1], [0], [0], [1], [0, 0, 1, 1], [], []>} : vector<16x64xf32>, vector<64x128xf32>, vector<16x128xf32> -> vector<16x128xf32>
    %252 = vector.extract_strided_slice %251 {offsets = [0, 0], sizes = [16, 64], strides = [1, 1]} : vector<16x128xf32> to vector<16x64xf32>
    %253 = vector.broadcast %195 : vector<1x64xf32> to vector<16x64xf32>
    %254 = arith.addf %252, %253 : vector<16x64xf32>
    %cst_91 = arith.constant 0.000000e+00 : f32
    %255 = vector.broadcast %cst_91 : f32 to vector<16x64xf32>
    %256 = arith.maximumf %254, %255 : vector<16x64xf32>
    %257 = math.absf %254 : vector<16x64xf32>
    %cst_92 = arith.constant 0.000000e+00 : f32
    %258 = vector.broadcast %cst_92 : f32 to vector<16x64xf32>
    %259 = arith.subf %258, %257 : vector<16x64xf32>
    %260 = math.exp %259 : vector<16x64xf32>
    %cst_93 = arith.constant 1.000000e+00 : f32
    %261 = vector.broadcast %cst_93 : f32 to vector<16x64xf32>
    %262 = arith.addf %261, %260 : vector<16x64xf32>
    %263 = math.log %262 : vector<16x64xf32>
    %264 = arith.addf %256, %263 : vector<16x64xf32>
    %265 = vector.extract_strided_slice %251 {offsets = [0, 64], sizes = [16, 16], strides = [1, 1]} : vector<16x128xf32> to vector<16x16xf32>
    %266 = vector.extract_strided_slice %251 {offsets = [0, 80], sizes = [16, 16], strides = [1, 1]} : vector<16x128xf32> to vector<16x16xf32>
    %267 = vector.shape_cast %264 : vector<16x64xf32> to vector<16x1x64xf32>
    %268 = vector.shape_cast %197 : vector<16x64xf32> to vector<1x16x64xf32>
    %269 = vector.broadcast %267 : vector<16x1x64xf32> to vector<16x16x64xf32>
    %270 = vector.broadcast %268 : vector<1x16x64xf32> to vector<16x16x64xf32>
    %271 = arith.mulf %269, %270 : vector<16x16x64xf32>
    %272 = math.exp %271 : vector<16x16x64xf32>
    %273 = arith.mulf %264, %250 : vector<16x64xf32>
    %274 = vector.shape_cast %273 : vector<16x64xf32> to vector<16x1x64xf32>
    %275 = vector.shape_cast %265 : vector<16x16xf32> to vector<16x16x1xf32>
    %276 = vector.broadcast %274 : vector<16x1x64xf32> to vector<16x16x64xf32>
    %277 = vector.broadcast %275 : vector<16x16x1xf32> to vector<16x16x64xf32>
    %278 = arith.mulf %276, %277 : vector<16x16x64xf32>
    %cst_94 = arith.constant 0.000000e+00 : f32
    %279 = vector.broadcast %cst_94 : f32 to vector<2x16x64xf32>
    %280 = vector.extract_strided_slice %272 {offsets = [0, 0, 0], sizes = [2, 16, 64], strides = [1, 1, 1]} : vector<16x16x64xf32> to vector<2x16x64xf32>
    %281 = arith.mulf %280, %279 : vector<2x16x64xf32>
    %282 = vector.extract_strided_slice %278 {offsets = [0, 0, 0], sizes = [2, 16, 64], strides = [1, 1, 1]} : vector<16x16x64xf32> to vector<2x16x64xf32>
    %283 = arith.addf %281, %282 : vector<2x16x64xf32>
    %284 = vector.extract_strided_slice %266 {offsets = [0, 0], sizes = [2, 16], strides = [1, 1]} : vector<16x16xf32> to vector<2x16xf32>
    %285 = vector.shape_cast %284 : vector<2x16xf32> to vector<2x16x1xf32>
    %286 = vector.broadcast %285 : vector<2x16x1xf32> to vector<2x16x64xf32>
    %287 = arith.mulf %283, %286 : vector<2x16x64xf32>
    %cst_95 = arith.constant dense<0.000000e+00> : vector<2x64xf32>
    %288 = vector.multi_reduction <add>, %287, %cst_95 [1] : vector<2x16x64xf32> to vector<2x64xf32>
    %289 = vector.extract_strided_slice %272 {offsets = [2, 0, 0], sizes = [2, 16, 64], strides = [1, 1, 1]} : vector<16x16x64xf32> to vector<2x16x64xf32>
    %290 = arith.mulf %289, %283 : vector<2x16x64xf32>
    %291 = vector.extract_strided_slice %278 {offsets = [2, 0, 0], sizes = [2, 16, 64], strides = [1, 1, 1]} : vector<16x16x64xf32> to vector<2x16x64xf32>
    %292 = arith.addf %290, %291 : vector<2x16x64xf32>
    %293 = vector.extract_strided_slice %266 {offsets = [2, 0], sizes = [2, 16], strides = [1, 1]} : vector<16x16xf32> to vector<2x16xf32>
    %294 = vector.shape_cast %293 : vector<2x16xf32> to vector<2x16x1xf32>
    %295 = vector.broadcast %294 : vector<2x16x1xf32> to vector<2x16x64xf32>
    %296 = arith.mulf %292, %295 : vector<2x16x64xf32>
    %cst_96 = arith.constant dense<0.000000e+00> : vector<2x64xf32>
    %297 = vector.multi_reduction <add>, %296, %cst_96 [1] : vector<2x16x64xf32> to vector<2x64xf32>
    %298 = vector.extract_strided_slice %272 {offsets = [4, 0, 0], sizes = [2, 16, 64], strides = [1, 1, 1]} : vector<16x16x64xf32> to vector<2x16x64xf32>
    %299 = arith.mulf %298, %292 : vector<2x16x64xf32>
    %300 = vector.extract_strided_slice %278 {offsets = [4, 0, 0], sizes = [2, 16, 64], strides = [1, 1, 1]} : vector<16x16x64xf32> to vector<2x16x64xf32>
    %301 = arith.addf %299, %300 : vector<2x16x64xf32>
    %302 = vector.extract_strided_slice %266 {offsets = [4, 0], sizes = [2, 16], strides = [1, 1]} : vector<16x16xf32> to vector<2x16xf32>
    %303 = vector.shape_cast %302 : vector<2x16xf32> to vector<2x16x1xf32>
    %304 = vector.broadcast %303 : vector<2x16x1xf32> to vector<2x16x64xf32>
    %305 = arith.mulf %301, %304 : vector<2x16x64xf32>
    %cst_97 = arith.constant dense<0.000000e+00> : vector<2x64xf32>
    %306 = vector.multi_reduction <add>, %305, %cst_97 [1] : vector<2x16x64xf32> to vector<2x64xf32>
    %307 = vector.extract_strided_slice %272 {offsets = [6, 0, 0], sizes = [2, 16, 64], strides = [1, 1, 1]} : vector<16x16x64xf32> to vector<2x16x64xf32>
    %308 = arith.mulf %307, %301 : vector<2x16x64xf32>
    %309 = vector.extract_strided_slice %278 {offsets = [6, 0, 0], sizes = [2, 16, 64], strides = [1, 1, 1]} : vector<16x16x64xf32> to vector<2x16x64xf32>
    %310 = arith.addf %308, %309 : vector<2x16x64xf32>
    %311 = vector.extract_strided_slice %266 {offsets = [6, 0], sizes = [2, 16], strides = [1, 1]} : vector<16x16xf32> to vector<2x16xf32>
    %312 = vector.shape_cast %311 : vector<2x16xf32> to vector<2x16x1xf32>
    %313 = vector.broadcast %312 : vector<2x16x1xf32> to vector<2x16x64xf32>
    %314 = arith.mulf %310, %313 : vector<2x16x64xf32>
    %cst_98 = arith.constant dense<0.000000e+00> : vector<2x64xf32>
    %315 = vector.multi_reduction <add>, %314, %cst_98 [1] : vector<2x16x64xf32> to vector<2x64xf32>
    %316 = vector.extract_strided_slice %272 {offsets = [8, 0, 0], sizes = [2, 16, 64], strides = [1, 1, 1]} : vector<16x16x64xf32> to vector<2x16x64xf32>
    %317 = arith.mulf %316, %310 : vector<2x16x64xf32>
    %318 = vector.extract_strided_slice %278 {offsets = [8, 0, 0], sizes = [2, 16, 64], strides = [1, 1, 1]} : vector<16x16x64xf32> to vector<2x16x64xf32>
    %319 = arith.addf %317, %318 : vector<2x16x64xf32>
    %320 = vector.extract_strided_slice %266 {offsets = [8, 0], sizes = [2, 16], strides = [1, 1]} : vector<16x16xf32> to vector<2x16xf32>
    %321 = vector.shape_cast %320 : vector<2x16xf32> to vector<2x16x1xf32>
    %322 = vector.broadcast %321 : vector<2x16x1xf32> to vector<2x16x64xf32>
    %323 = arith.mulf %319, %322 : vector<2x16x64xf32>
    %cst_99 = arith.constant dense<0.000000e+00> : vector<2x64xf32>
    %324 = vector.multi_reduction <add>, %323, %cst_99 [1] : vector<2x16x64xf32> to vector<2x64xf32>
    %325 = vector.extract_strided_slice %272 {offsets = [10, 0, 0], sizes = [2, 16, 64], strides = [1, 1, 1]} : vector<16x16x64xf32> to vector<2x16x64xf32>
    %326 = arith.mulf %325, %319 : vector<2x16x64xf32>
    %327 = vector.extract_strided_slice %278 {offsets = [10, 0, 0], sizes = [2, 16, 64], strides = [1, 1, 1]} : vector<16x16x64xf32> to vector<2x16x64xf32>
    %328 = arith.addf %326, %327 : vector<2x16x64xf32>
    %329 = vector.extract_strided_slice %266 {offsets = [10, 0], sizes = [2, 16], strides = [1, 1]} : vector<16x16xf32> to vector<2x16xf32>
    %330 = vector.shape_cast %329 : vector<2x16xf32> to vector<2x16x1xf32>
    %331 = vector.broadcast %330 : vector<2x16x1xf32> to vector<2x16x64xf32>
    %332 = arith.mulf %328, %331 : vector<2x16x64xf32>
    %cst_100 = arith.constant dense<0.000000e+00> : vector<2x64xf32>
    %333 = vector.multi_reduction <add>, %332, %cst_100 [1] : vector<2x16x64xf32> to vector<2x64xf32>
    %334 = vector.extract_strided_slice %272 {offsets = [12, 0, 0], sizes = [2, 16, 64], strides = [1, 1, 1]} : vector<16x16x64xf32> to vector<2x16x64xf32>
    %335 = arith.mulf %334, %328 : vector<2x16x64xf32>
    %336 = vector.extract_strided_slice %278 {offsets = [12, 0, 0], sizes = [2, 16, 64], strides = [1, 1, 1]} : vector<16x16x64xf32> to vector<2x16x64xf32>
    %337 = arith.addf %335, %336 : vector<2x16x64xf32>
    %338 = vector.extract_strided_slice %266 {offsets = [12, 0], sizes = [2, 16], strides = [1, 1]} : vector<16x16xf32> to vector<2x16xf32>
    %339 = vector.shape_cast %338 : vector<2x16xf32> to vector<2x16x1xf32>
    %340 = vector.broadcast %339 : vector<2x16x1xf32> to vector<2x16x64xf32>
    %341 = arith.mulf %337, %340 : vector<2x16x64xf32>
    %cst_101 = arith.constant dense<0.000000e+00> : vector<2x64xf32>
    %342 = vector.multi_reduction <add>, %341, %cst_101 [1] : vector<2x16x64xf32> to vector<2x64xf32>
    %343 = vector.extract_strided_slice %272 {offsets = [14, 0, 0], sizes = [2, 16, 64], strides = [1, 1, 1]} : vector<16x16x64xf32> to vector<2x16x64xf32>
    %344 = arith.mulf %343, %337 : vector<2x16x64xf32>
    %345 = vector.extract_strided_slice %278 {offsets = [14, 0, 0], sizes = [2, 16, 64], strides = [1, 1, 1]} : vector<16x16x64xf32> to vector<2x16x64xf32>
    %346 = arith.addf %344, %345 : vector<2x16x64xf32>
    %347 = vector.extract_strided_slice %266 {offsets = [14, 0], sizes = [2, 16], strides = [1, 1]} : vector<16x16xf32> to vector<2x16xf32>
    %348 = vector.shape_cast %347 : vector<2x16xf32> to vector<2x16x1xf32>
    %349 = vector.broadcast %348 : vector<2x16x1xf32> to vector<2x16x64xf32>
    %350 = arith.mulf %346, %349 : vector<2x16x64xf32>
    %cst_102 = arith.constant dense<0.000000e+00> : vector<2x64xf32>
    %351 = vector.multi_reduction <add>, %350, %cst_102 [1] : vector<2x16x64xf32> to vector<2x64xf32>
    %352 = tpu.concatenate %288, %297, %306, %315, %324, %333, %342, %351 in 0 : vector<2x64xf32>, vector<2x64xf32>, vector<2x64xf32>, vector<2x64xf32>, vector<2x64xf32>, vector<2x64xf32>, vector<2x64xf32>, vector<2x64xf32> -> vector<16x64xf32>
    %353 = vector.broadcast %199 : vector<1x64xf32> to vector<16x64xf32>
    %354 = arith.mulf %353, %250 : vector<16x64xf32>
    %355 = arith.addf %352, %354 : vector<16x64xf32>
    %cst_103 = arith.constant 0.000000e+00 : f32
    %356 = vector.broadcast %cst_103 : f32 to vector<16x64xf32>
    %357 = arith.subf %356, %216 : vector<16x64xf32>
    %358 = math.exp %357 : vector<16x64xf32>
    %cst_104 = arith.constant 1.000000e+00 : f32
    %359 = vector.broadcast %cst_104 : f32 to vector<16x64xf32>
    %360 = arith.addf %359, %358 : vector<16x64xf32>
    %cst_105 = arith.constant 1.000000e+00 : f32
    %361 = vector.broadcast %cst_105 : f32 to vector<16x64xf32>
    %362 = arith.divf %361, %360 : vector<16x64xf32>
    %363 = arith.mulf %216, %362 : vector<16x64xf32>
    %364 = arith.mulf %355, %363 : vector<16x64xf32>
    %cst_106 = arith.constant dense<0.000000e+00> : vector<16x32xf32>
    %365 = tpu.matmul %364, %201, %cst_106 {dimension_numbers = #tpu.dot_dimension_numbers<[1], [0], [0], [1], [0, 0, 1, 1], [], []>} : vector<16x64xf32>, vector<64x32xf32>, vector<16x32xf32> -> vector<16x32xf32>
    %366 = arith.addf %183, %365 : vector<16x32xf32>
    %367 = vector.extract_strided_slice %366 {offsets = [14, 0], sizes = [2, 32], strides = [1, 1]} : vector<16x32xf32> to vector<2x32xf32>
    %368 = arith.mulf %367, %367 : vector<2x32xf32>
    %cst_107 = arith.constant dense<0.000000e+00> : vector<2xf32>
    %369 = vector.multi_reduction <add>, %368, %cst_107 [1] : vector<2x32xf32> to vector<2xf32>
    %370 = vector.shape_cast %369 : vector<2xf32> to vector<2x1xf32>
    %cst_108 = arith.constant 3.200000e+01 : f32
    %371 = vector.broadcast %cst_108 : f32 to vector<2x1xf32>
    %372 = arith.divf %370, %371 : vector<2x1xf32>
    %cst_109 = arith.constant 9.99999974E-6 : f32
    %373 = vector.broadcast %cst_109 : f32 to vector<2x1xf32>
    %374 = arith.addf %372, %373 : vector<2x1xf32>
    %375 = math.rsqrt %374 : vector<2x1xf32>
    %376 = vector.broadcast %375 : vector<2x1xf32> to vector<2x32xf32>
    %377 = arith.mulf %367, %376 : vector<2x32xf32>
    %c0_110 = arith.constant 0 : index
    %c0_111 = arith.constant 0 : index
    %378 = vector.load %arg10[%c0_110, %c0_111] : memref<1x32xf32, #tpu.memory_space<vmem>>, vector<1x32xf32>
    %379 = vector.broadcast %378 : vector<1x32xf32> to vector<2x32xf32>
    %380 = arith.mulf %377, %379 : vector<2x32xf32>
    %c0_112 = arith.constant 0 : index
    %c0_113 = arith.constant 0 : index
    %381 = vector.load %arg11[%c0_112, %c0_113] : memref<32x1xf32, #tpu.memory_space<vmem>>, vector<32x1xf32>
    %cst_114 = arith.constant dense<0.000000e+00> : vector<2x1xf32>
    %382 = tpu.matmul %380, %381, %cst_114 {dimension_numbers = #tpu.dot_dimension_numbers<[1], [0], [0], [1], [0, 0, 1, 1], [], []>} : vector<2x32xf32>, vector<32x1xf32>, vector<2x1xf32> -> vector<2x1xf32>
    %c0_115 = arith.constant 0 : index
    %c0_116 = arith.constant 0 : index
    %383 = vector.load %arg12[%c0_115, %c0_116] : memref<1x1xf32, #tpu.memory_space<vmem>>, vector<1x1xf32>
    %384 = vector.broadcast %383 : vector<1x1xf32> to vector<2x1xf32>
    %385 = arith.addf %382, %384 : vector<2x1xf32>
    %c0_117 = arith.constant 0 : index
    %c0_118 = arith.constant 0 : index
    %386 = vector.load %arg13[%c0_117, %c0_118] : memref<2x1xf32, #tpu.memory_space<vmem>>, vector<2x1xf32>
    tpu.vector_store %arg13[%c0_117, %c0_118], %385 {strides = array<i32>} : memref<2x1xf32, #tpu.memory_space<vmem>>, vector<2x1xf32>,
    return
  }
}

</mosaic_0001>

<bundles_post_ra>
// kernel: mamba_for_regression.1
= control target key start
LH: loop header
LB: loop body
LE: loop exit
PB: predicated region body
PF: predicated region fallthrough
CT: control target
= control target key end

     0   :  { %vm77_vm0 = vcmask 261120   ;;  %v182_v37 = vlaneseq  ;;  %vm198_vm1 = vcmask 1045504   ;;  %vm213_vm2 = vcmask 1043456   ;;  %s3701_s27 = smov 64   ;;  %s5274_s0 = inlined_call_operand.vmem [shape: f32[16,32], index: 0, kind: input, shape index: {}]   ;;  %s5275_s2 = inlined_call_operand.vmem [shape: f32[2,32,128], index: 2, kind: input, shape index: {}]   ;;  %s5276_s1 = inlined_call_operand.vmem [shape: f32[2,1,32], index: 1, kind: input, shape index: {}]   ;;  %s5277_s5 = inlined_call_operand.vmem [shape: f32[2,64,128], index: 5, kind: input, shape index: {}]   ;;  %s5278_s3 = inlined_call_operand.vmem [shape: f32[2,4,64], index: 3, kind: input, shape index: {}]   ;;  %s5279_s4 = inlined_call_operand.vmem [shape: f32[2,1,64], index: 4, kind: input, shape index: {}]   ;;  %s5280_s6 = inlined_call_operand.vmem [shape: f32[2,1,64], index: 6, kind: input, shape index: {}]   ;;  %s5281_s9 = inlined_call_operand.vmem [shape: f32[2,64,32], index: 9, kind: input, shape index: {}]   ;;  %s5282_s8 = inlined_call_operand.vmem [shape: f32[2,1,64], index: 8, kind: input, shape index: {}]   ;;  %s5283_s7 = inlined_call_operand.vmem [shape: f32[2,16,64], index: 7, kind: input, shape index: {}]   ;;  %s5284_s11 = inlined_call_operand.vmem [shape: f32[32,1], index: 11, kind: input, shape index: {}]   ;;  %s5285_s12 = inlined_call_operand.<no memory space> [shape: f32[1,1], index: 12, kind: input, shape index: {}]   ;;  %s5286_s10 = inlined_call_operand.vmem [shape: f32[1,32], index: 10, kind: input, shape index: {}]   ;;  %s5287_s13 = inlined_call_operand.vmem [shape: f32[2,1], index: 13, kind: output, shape index: {}]  }
   0x1   :  { %v46_v0 = vld [vmem:[%s5274_s0] sm:$0xff]  ;;  %v47_v1 = vld [vmem:[%s5274_s0 + $0x8] sm:$0xff]  ;;  %v51_v8 = vld [vmem:[%s5275_s2 + $0x10] sm:$0xff]  ;;  %vm228_vm3 = vcmask 1041408   ;;  %vm257_vm4 = vcmask 523264   ;;  %vm1417_vm5 = vcmask 1041409  }
   0x2   :  { %v75_v2 = vmul.f32 %v46_v0, %v46_v0  ;;  %v76_v3 = vmul.f32 %v47_v1, %v47_v1  ;;  %v49_v6 = vld [vmem:[%s5275_s2] sm:$0xff]  ;;  %v50_v7 = vld [vmem:[%s5275_s2 + $0x8] sm:$0xff]  ;;  %v52_v10 = vld [vmem:[%s5275_s2 + $0x18] sm:$0xff]  ;;  %v3825_v38 = vshrl.u32 %v182_v37, 7  ;;  %vm1422_vm6 = vcmask 1043459  }
   0x3   :  { %v3421_v9 = vpack.c.bf16 %v50_v7, %v49_v6  ;;  %v3425_v11 = vpack.c.bf16 %v52_v10, %v51_v8  ;;  %v3205_v19 = vld [vmem:[%s5276_s1] ss:$0 sm:$0xff]  ;;  %v56_v26 = vld [vmem:[%s5277_s5 + $0x8] sm:$0xff]  ;;  %v57_v27 = vld [vmem:[%s5277_s5 + $0x10] sm:$0xff]  ;;  %vm1427_vm7 = vcmask 1045509   ;;  %vm1432_vm8 = vcmask 1047559  }
   0x4   :  { %v78_v4 = vsel %vm77_vm0, %v75_v2, 0.0  ;;  %v81_v5 = vsel %vm77_vm0, %v76_v3, 0.0  ;;  %v55_v25 = vld [vmem:[%s5277_s5] sm:$0xff]  ;;  %v58_v29 = vld [vmem:[%s5277_s5 + $0x18] sm:$0xff]  ;;  %v60_v32 = vld [vmem:[%s5277_s5 + $0x28] sm:$0xff]  ;;  %v3828_v39 = vsub.s32 3, %v3825_v38 }
   0x5   :  { %79 = vadd.xlane.f32.xlu0 %v78_v4  ;;  %3422 = vmatprep.subr.bf16.mxu0 %v3421_v9  ;;  %v3429_v28 = vpack.c.bf16 %v56_v26, %v55_v25  ;;  %v3433_v30 = vpack.c.bf16 %v58_v29, %v57_v27  ;;  %v59_v31 = vld [vmem:[%s5277_s5 + $0x20] sm:$0xff]  ;;  %v61_v34 = vld [vmem:[%s5277_s5 + $0x30] sm:$0xff]  ;;  %v62_v35 = vld [vmem:[%s5277_s5 + $0x38] sm:$0xff]  ;;  %v3834_v41 = vsub.s32 0, %v3825_v38  ;;  %v3837_v42 = vsub.s32 1, %v3825_v38 }
   0x6   :  { %3424 = vmatpush3.bf16.msra.mxu0 %v3421_v9  ;;  %v3437_v33 = vpack.c.bf16 %v60_v32, %v59_v31  ;;  %v3441_v36 = vpack.c.bf16 %v62_v35, %v61_v34  ;;  %5308 = vst [vmem:[#allocation3_spill] sm:$0xff] %v3828_v39  ;;  %v53_v40 = vld [vmem:[%s5278_s3] sm:$0xf]  ;;  %v3843_v45 = vsub.s32 2, %v3825_v38  ;;  %v3893_v35 = vsub.s32 5, %v3825_v38 }
   0x7   :  { %3426 = vmatprep.subr.bf16.mxu0 %v3425_v11  ;;  %3430 = vmatprep.subr.bf16.mxu1 %v3429_v28  ;;  %5309 = vst [vmem:[#allocation4_spill] sm:$0xff] %v3837_v42  ;;  %v185_v43 = vrot.slane %v53_v40, %v3828_v39  ;;  %v3208_v48 = vld [vmem:[%s5279_s4] ss:$0 sm:$0xff]  ;;  %v208_v49 = vrot.slane %v53_v40, %v3834_v41  ;;  %v3898_v37 = vsub.s32 6, %v3825_v38  ;;  %vm3098_vm9 = vcmask 261126  }
   0x8   :  { %3432 = vmatpush3.bf16.msra.mxu1 %v3429_v28  ;;  %5310 = vst [vmem:[#allocation5_spill] sm:$0xff] %v3843_v45  ;;  %v223_v50 = vrot.slane %v53_v40, %v3837_v42  ;;  %v238_v63 = vrot.slane %v53_v40, %v3843_v45  ;;  %5313 = vst [vmem:[#allocation8_spill] sm:$0xff] %v3893_v35  ;;  %vm3704_vm10 = vmmov 0   ;;  %vm3199_vm11 = vcmask 1024  }
   0x9   :  { %82 = vadd.xlane.f32.xlu0 %v81_v5  ;;  %3434 = vmatprep.subr.bf16.mxu1 %v3433_v30  ;;  %5314 = vst [vmem:[#allocation9_spill] sm:$0xff] %v3898_v37 }
   0xa   :  { %3428 = vmatpush3.bf16.msra.mxu0 %v3425_v11 }
   0xc   :  { %3436 = vmatpush3.bf16.msra.mxu1 %v3433_v30 }
   0xd   :  { %3438 = vmatprep.subr.bf16.mxu1 %v3437_v33 }
  0x10   :  { %3440 = vmatpush3.bf16.msra.mxu1 %v3437_v33  ;;  %v3888_v33 = vsub.s32 4, %v3825_v38 }
  0x11   :  { %3442 = vmatprep.subr.bf16.mxu1 %v3441_v36 }
  0x12   :  { %5312 = vst [vmem:[#allocation7_spill] sm:$0xff] %v3888_v33 }
  0x14   :  { %3444 = vmatpush3.bf16.msra.mxu1 %v3441_v36 }
  0x92   :  { %v80_v12 = vpop.xlane.xlu0 %79 }
  0x93   :  { %v85_v13 = vmul.f32 0.03125, %v80_v12 }
  0x95   :  { %v87_v14 = vadd.f32 1e-05, %v85_v13 }
  0x96   :  { %v83_v15 = vpop.xlane.xlu0 %82 }
  0x97   :  { %3512 = vrsqrt.f32 %v87_v14  ;;  %v86_v16 = vmul.f32 0.03125, %v83_v15 }
  0x99   :  { %v88_v17 = vadd.f32 1e-05, %v86_v16 }
  0x9b   :  { %3514 = vrsqrt.f32 %v88_v17 }
  0xa1   :  { %v3513_v18 = vpop.eup %3512 }
  0xa2   :  { %v91_v20 = vmul.f32 %v3513_v18, %v46_v0 }
  0xa4   :  { %v99_v21 = vmul.f32 %v3205_v19, %v91_v20 }
  0xa5   :  { %v3515_v22 = vpop.eup %3514 }
  0xa6   :  { %v92_v23 = vmul.f32 %v3515_v22, %v47_v1  ;;  %3320 = vmatprep.mubr.msk.f32.mxu0 %vm77_vm0, %v99_v21 }
  0xa8   :  { %v100_v24 = vmul.f32 %v3205_v19, %v92_v23 }
  0xaa   :  { %3321 = vmatmul.mubr.msk.f32.vlgmr.msra.gmra.mrb[0].mxu0 %vm77_vm0, %v100_v24 }
 0x17d   :  { %v3840_v44 = vpop.f32.mrb[0].mxu0 }
 0x17e   :  { %v200_v46 = vrot.slane %v3840_v44, 2  ;;  %v3846_v47 = vpop.f32.mrb[1].mxu0  ;;  %v187_v51 = vmul.f32 %v3840_v44, %v185_v43  ;;  %v215_v55 = vrot.slane %v3840_v44, 4  ;;  %v230_v56 = vrot.slane %v3840_v44, 6 }
 0x17f   :  { %v186_v52 = vmul.f32 %v185_v43, %v3846_v47  ;;  %v199_v53 = vrot.slane %v3846_v47, 2  ;;  %v214_v54 = vrot.slane %v3846_v47, 4  ;;  %v229_v57 = vrot.slane %v3846_v47, 6 }
 0x180   :  { %v195_v0 = vadd.f32 %v3208_v48, %v187_v51  ;;  %v3903_v43 = vsub.s32 7, %v3825_v38 }
 0x181   :  { %v201_v58 = vsel %vm198_vm1, %v199_v53, %v200_v46  ;;  %v194_v59 = vadd.f32 %v3208_v48, %v186_v52  ;;  %v204_v60 = vsel %vm198_vm1, 0.0, %v199_v53  ;;  %v219_v62 = vsel %vm213_vm2, 0.0, %v214_v54 }
 0x182   :  { %v209_v61 = vmul.f32 %v208_v49, %v204_v60  ;;  %v234_v1 = vsel %vm228_vm3, 0.0, %v229_v57  ;;  %v210_v2 = vmul.f32 %v208_v49, %v201_v58  ;;  %v224_v4 = vmul.f32 %v223_v50, %v219_v62  ;;  %5315 = vst [vmem:[#allocation10_spill] sm:$0xff] %v3903_v43  ;;  %v3211_v58 = vld [vmem:[%s5280_s6] ss:$0 sm:$0xff] }
 0x183   :  { %v216_v5 = vsel %vm213_vm2, %v214_v54, %v215_v55  ;;  %v231_v6 = vsel %vm228_vm3, %v229_v57, %v230_v56  ;;  %v239_v10 = vmul.f32 %v238_v63, %v234_v1  ;;  %v1468_v55 = vsub.f32 0.0, %v3840_v44 }
 0x184   :  { %v211_v3 = vadd.f32 %v209_v61, %v194_v59  ;;  %v212_v7 = vadd.f32 %v210_v2, %v195_v0  ;;  %v225_v8 = vmul.f32 %v223_v50, %v216_v5  ;;  %v240_v12 = vmul.f32 %v238_v63, %v231_v6 }
 0x185   :  { %v1471_v57 = vmul.f32 1.442695, %v1468_v55 }
 0x186   :  { %v226_v9 = vadd.f32 %v224_v4, %v211_v3  ;;  %v227_v11 = vadd.f32 %v225_v8, %v212_v7  ;;  %v1467_v3 = vsub.f32 0.0, %v3846_v47 }
 0x188   :  { %v241_v13 = vadd.f32 %v239_v10, %v226_v9  ;;  %v242_v14 = vadd.f32 %v240_v12, %v227_v11  ;;  %v1469_v6 = vmul.f32 1.442695, %v1467_v3 }
 0x18a   :  { %v243_v15 = vsub.f32 0.0, %v241_v13  ;;  %v244_v16 = vsub.f32 0.0, %v242_v14 }
 0x18c   :  { %v245_v17 = vmul.f32 1.442695, %v243_v15  ;;  %v247_v18 = vmul.f32 1.442695, %v244_v16 }
 0x18e   :  { %3516 = vpow2.f32 %v245_v17 }
 0x18f   :  { %3518 = vpow2.f32 %v247_v18 }
 0x198   :  { %v3517_v19 = vpop.eup %3516 }
 0x199   :  { %v3519_v20 = vpop.eup %3518  ;;  %v249_v21 = vadd.f32 1.0, %v3517_v19 }
 0x19a   :  { %v250_v22 = vadd.f32 1.0, %v3519_v20 }
 0x19b   :  { %3520 = vrcp.f32 %v249_v21 }
 0x19c   :  { %3522 = vrcp.f32 %v250_v22 }
 0x19d   :  { %3524 = vpow2.f32 %v1471_v57 }
 0x1a5   :  { %v3521_v23 = vpop.eup %3520 }
 0x1a6   :  { %v3523_v24 = vpop.eup %3522  ;;  %v3867_v25 = vmul.f32 %v3521_v23, %v241_v13 }
 0x1a7   :  { %v3869_v26 = vmul.f32 %v3523_v24, %v242_v14  ;;  %v3525_v62 = vpop.eup %3524 }
 0x1a8   :  { %3339 = vmatprep.mubr.msk.f32.mxu1 %vm257_vm4, %v3867_v25  ;;  %v1474_v1 = vadd.f32 1.0, %v3525_v62 }
 0x1a9   :  { %5311 = vst [vmem:[#allocation6_spill] sm:$0xff] %v3869_v26  ;;  %3340 = vmatmul.mubr.msk.f32.vlgmr.msra.gmra.mrb[0].mxu1 %vm257_vm4, %v3869_v26 }
 0x1aa   :  { %3526 = vrcp.f32 %v1474_v1 }
 0x1b4   :  { %v3527_v7 = vpop.eup %3526 }
 0x1b5   :  { %v1480_v10 = vmul.f32 %v3527_v7, %v3840_v44  ;;  %v71_v7 = vld [vmem:[%s5281_s9 + $0x20] sm:$0xff] }
 0x27c   :  { %v3875_v27 = vpop.f32.mrb[0].mxu1 }
 0x27d   :  { %v3877_v28 = vpop.f32.mrb[1].mxu1  ;;  %v842_v29 = vrot.slane %v3875_v27, %v3834_v41  ;;  %v854_v30 = vrot.slane %v3875_v27, %v3837_v42  ;;  %v866_v31 = vrot.slane %v3875_v27, %v3843_v45  ;;  %v878_v32 = vrot.slane %v3875_v27, %v3828_v39 }
 0x27e   :  { %v890_v34 = vrot.slane %v3875_v27, %v3888_v33  ;;  %v902_v36 = vrot.slane %v3875_v27, %v3893_v35  ;;  %v914_v40 = vrot.slane %v3875_v27, %v3898_v37  ;;  %v3907_v46 = vrot.slane %v3875_v27, %v3903_v43 }
 0x27f   :  { %849 = vbcast.lane.b32.xlu0 %v842_v29, 328  ;;  %845 = vbcast.lane.b32.xlu1 %v842_v29, 320  ;;  %v758_v48 = vrot.slane %v3877_v28, %v3837_v42  ;;  %v746_v49 = vrot.slane %v3877_v28, %v3834_v41  ;;  %v3917_v50 = vrot.slane %v3877_v28, %v3888_v33 }
 0x280   :  { %v3922_v51 = vrot.slane %v3877_v28, %v3893_v35  ;;  %v3927_v52 = vrot.slane %v3877_v28, %v3898_v37  ;;  %v770_v53 = vrot.slane %v3877_v28, %v3843_v45  ;;  %v3934_v54 = vrot.slane %v3877_v28, %v3903_v43 }
 0x281   :  { %v782_v56 = vrot.slane %v3877_v28, %v3828_v39  ;;  %v3945_v59 = vadd.f32 %v3211_v58, %v3877_v28  ;;  %v3948_v60 = vadd.f32 %v3875_v27, %v3211_v58  ;;  %v3702_v28 = vmov 1966171168  }
 0x283   :  { %861 = vbcast.lane.b32.xlu0 %v854_v30, 328  ;;  %857 = vbcast.lane.b32.xlu1 %v854_v30, 320  ;;  %v349_v61 = vand.u32 2147483647, %v3945_v59  ;;  %v350_v63 = vand.u32 2147483647, %v3948_v60 }
 0x285   :  { %v351_v0 = vsub.f32 0.0, %v349_v61  ;;  %v352_v2 = vsub.f32 0.0, %v350_v63  ;;  %v68_v63 = vld [vmem:[%s5281_s9 + $0x8] sm:$0xff] }
 0x287   :  { %873 = vbcast.lane.b32.xlu0 %v866_v31, 328  ;;  %869 = vbcast.lane.b32.xlu1 %v866_v31, 320  ;;  %v353_v4 = vmul.f32 1.442695, %v351_v0  ;;  %v355_v5 = vmul.f32 1.442695, %v352_v2 }
 0x288   :  { %v69_v0 = vld [vmem:[%s5281_s9 + $0x10] sm:$0xff] }
 0x289   :  { %3528 = vpow2.f32 %v353_v4  ;;  %v70_v4 = vld [vmem:[%s5281_s9 + $0x18] sm:$0xff] }
 0x28a   :  { %3530 = vpow2.f32 %v355_v5 }
 0x28b   :  { %885 = vbcast.lane.b32.xlu0 %v878_v32, 328  ;;  %881 = vbcast.lane.b32.xlu1 %v878_v32, 320  ;;  %3532 = vpow2.f32 %v1469_v6  ;;  %v3449_v6 = vpack.c.bf16 %v70_v4, %v69_v0 }
 0x28f   :  { %897 = vbcast.lane.b32.xlu0 %v890_v34, 328  ;;  %893 = vbcast.lane.b32.xlu1 %v890_v34, 320 }
 0x293   :  { %909 = vbcast.lane.b32.xlu0 %v902_v36, 328  ;;  %905 = vbcast.lane.b32.xlu1 %v902_v36, 320  ;;  %v3529_v11 = vpop.eup %3528 }
 0x294   :  { %v3531_v12 = vpop.eup %3530  ;;  %v357_v16 = vadd.f32 1.0, %v3529_v11 }
 0x295   :  { %v3533_v13 = vpop.eup %3532  ;;  %v358_v17 = vadd.f32 1.0, %v3531_v12 }
 0x296   :  { %v1473_v18 = vadd.f32 1.0, %v3533_v13  ;;  %3534 = vlog2.f32 %v357_v16 }
 0x297   :  { %921 = vbcast.lane.b32.xlu0 %v914_v40, 328  ;;  %917 = vbcast.lane.b32.xlu1 %v914_v40, 320  ;;  %3536 = vlog2.f32 %v358_v17 }
 0x298   :  { %3538 = vrcp.f32 %v1473_v18 }
 0x29b   :  { %933 = vbcast.lane.b32.xlu0 %v3907_v46, 328  ;;  %929 = vbcast.lane.b32.xlu1 %v3907_v46, 320 }
 0x29f   :  { %1245 = vbcast.lane.b32.xlu0 %v842_v29, 344  ;;  %1241 = vbcast.lane.b32.xlu1 %v842_v29, 336  ;;  %v369_v29 = vunpack.c.l.s4 %v3702_v28 }
 0x2a0   :  { %v3535_v24 = vpop.eup %3534 }
 0x2a1   :  { %v3537_v27 = vpop.eup %3536 }
 0x2a3   :  { %1253 = vbcast.lane.b32.xlu0 %v854_v30, 344  ;;  %1249 = vbcast.lane.b32.xlu1 %v854_v30, 336 }
 0x2a7   :  { %1291 = vbcast.lane.b32.xlu0 %v866_v31, 344  ;;  %1287 = vbcast.lane.b32.xlu1 %v866_v31, 336 }
 0x2ab   :  { %1299 = vbcast.lane.b32.xlu0 %v878_v32, 344  ;;  %1295 = vbcast.lane.b32.xlu1 %v878_v32, 336  ;;  %v3539_v32 = vpop.eup %3538 }
 0x2af   :  { %1337 = vbcast.lane.b32.xlu0 %v890_v34, 344  ;;  %1333 = vbcast.lane.b32.xlu1 %v890_v34, 336  ;;  %v360_v34 = vmul.f32 0.6931472, %v3535_v24 }
 0x2b3   :  { %1345 = vbcast.lane.b32.xlu0 %v902_v36, 344  ;;  %1341 = vbcast.lane.b32.xlu1 %v902_v36, 336  ;;  %v362_v36 = vmul.f32 0.6931472, %v3537_v27  ;;  %v3212_v27 = vld [vmem:[%s5282_s8] ss:$0 sm:$0xff] }
 0x2b7   :  { %1383 = vbcast.lane.b32.xlu0 %v914_v40, 344  ;;  %1379 = vbcast.lane.b32.xlu1 %v914_v40, 336  ;;  %v347_v40 = vmax.f32 %v3945_v59, 0.0 }
 0x2bb   :  { %761 = vbcast.lane.b32.xlu0 %v758_v48, 320  ;;  %749 = vbcast.lane.b32.xlu1 %v746_v49, 320 }
 0x2bf   :  { %801 = vbcast.lane.b32.xlu0 %v3917_v50, 328  ;;  %753 = vbcast.lane.b32.xlu1 %v746_v49, 328 }
 0x2c3   :  { %813 = vbcast.lane.b32.xlu0 %v3922_v51, 328  ;;  %765 = vbcast.lane.b32.xlu1 %v758_v48, 328 }
 0x2c7   :  { %825 = vbcast.lane.b32.xlu0 %v3927_v52, 328  ;;  %773 = vbcast.lane.b32.xlu1 %v770_v53, 320 }
 0x2cb   :  { %837 = vbcast.lane.b32.xlu0 %v3934_v54, 328  ;;  %777 = vbcast.lane.b32.xlu1 %v770_v53, 328 }
 0x2cf   :  { %1061 = vbcast.lane.b32.xlu0 %v746_v49, 344  ;;  %785 = vbcast.lane.b32.xlu1 %v782_v56, 320 }
 0x2d3   :  { %1069 = vbcast.lane.b32.xlu0 %v758_v48, 344  ;;  %789 = vbcast.lane.b32.xlu1 %v782_v56, 328 }
 0x2d7   :  { %1107 = vbcast.lane.b32.xlu0 %v770_v53, 344  ;;  %797 = vbcast.lane.b32.xlu1 %v3917_v50, 320 }
 0x2db   :  { %1115 = vbcast.lane.b32.xlu0 %v782_v56, 344  ;;  %809 = vbcast.lane.b32.xlu1 %v3922_v51, 320 }
 0x2df   :  { %1153 = vbcast.lane.b32.xlu0 %v3917_v50, 344  ;;  %821 = vbcast.lane.b32.xlu1 %v3927_v52, 320 }
 0x2e3   :  { %1161 = vbcast.lane.b32.xlu0 %v3922_v51, 344  ;;  %833 = vbcast.lane.b32.xlu1 %v3934_v54, 320 }
 0x2e7   :  { %1199 = vbcast.lane.b32.xlu0 %v3927_v52, 344  ;;  %1057 = vbcast.lane.b32.xlu1 %v746_v49, 336  ;;  %v348_v49 = vmax.f32 %v3948_v60, 0.0 }
 0x2eb   :  { %1207 = vbcast.lane.b32.xlu0 %v3934_v54, 344  ;;  %1065 = vbcast.lane.b32.xlu1 %v758_v48, 336  ;;  %v370_v48 = vunpack.c.0.s8 %v369_v29 }
 0x2ed   :  { %v4001_v55 = vsub.s32 %v370_v48, %v3825_v38  ;;  %v67_v38 = vld [vmem:[%s5281_s9] sm:$0xff]  ;;  %v73_v48 = vld [vmem:[%s5281_s9 + $0x30] sm:$0xff] }
 0x2ee   :  { %v3445_v3 = vpack.c.bf16 %v68_v63, %v67_v38 }
 0x2ef   :  { %1391 = vbcast.lane.b32.xlu0 %v3907_v46, 344  ;;  %1103 = vbcast.lane.b32.xlu1 %v770_v53, 336  ;;  %v363_v53 = vadd.f32 %v360_v34, %v347_v40  ;;  %5321 = vst [vmem:[#allocation16_spill] sm:$0xff] %v4001_v55 }
 0x2f0   :  { %3446 = vmatprep.subr.bf16.mxu0 %v3445_v3 }
 0x2f1   :  { %v3961_v8 = vpop.permute.xlu0 %849  ;;  %v3963_v9 = vpop.permute.xlu1 %845  ;;  %v641_v57 = vmul.f32 %v363_v53, %v3867_v25  ;;  %v367_v5 = vcombine.high %v363_v53, %v363_v53  ;;  %3448 = vmatpush3.bf16.msra.mxu0 %v3445_v3 }
 0x2f2   :  { %3450 = vmatprep.subr.bf16.mxu0 %v3449_v6 }
 0x2f3   :  { %1485 = vrot.lane.b32.xlu0 %v1480_v10, %s3701_s27  ;;  %1111 = vbcast.lane.b32.xlu1 %v782_v56, 336  ;;  %v652_v62 = vrot.slane %v641_v57, %v4001_v55  ;;  %v72_v10 = vld [vmem:[%s5281_s9 + $0x28] sm:$0xff]  ;;  %v645_v24 = vcombine.high %v641_v57, %v641_v57  ;;  %v381_v40 = vrot.slane %v367_v5, %v4001_v55 }
 0x2f4   :  { %v3453_v34 = vpack.c.bf16 %v72_v10, %v71_v7 }
 0x2f5   :  { %v3967_v14 = vpop.permute.xlu0 %861  ;;  %v3969_v15 = vpop.permute.xlu1 %857  ;;  %v660_v18 = vcombine.high %v652_v62, %v652_v62  ;;  %v4075_v38 = vrot.slane %v645_v24, %v4001_v55  ;;  %3452 = vmatpush3.bf16.msra.mxu0 %v3449_v6  ;;  %v383_v6 = vcombine.high %v381_v40, %v381_v40 }
 0x2f6   :  { %3454 = vmatprep.subr.bf16.mxu0 %v3453_v34 }
 0x2f7   :  { %1149 = vbcast.lane.b32.xlu1 %v3917_v50, 336 }
 0x2f9   :  { %v3972_v19 = vpop.permute.xlu0 %873  ;;  %v3974_v20 = vpop.permute.xlu1 %869  ;;  %3456 = vmatpush3.bf16.msra.mxu0 %v3453_v34 }
 0x2fb   :  { %1157 = vbcast.lane.b32.xlu1 %v3922_v51, 336 }
 0x2fd   :  { %v3977_v44 = vpop.permute.xlu0 %885  ;;  %v3979_v21 = vpop.permute.xlu1 %881 }
 0x2ff   :  { %1195 = vbcast.lane.b32.xlu1 %v3927_v52, 336  ;;  %v1479_v52 = vmul.f32 %v3539_v32, %v3846_v47  ;;  %v374_v47 = vrot.slane %v363_v53, %v4001_v55 }
 0x301   :  { %v3982_v22 = vpop.permute.xlu0 %897  ;;  %v3984_v23 = vpop.permute.xlu1 %893  ;;  %v390_v16 = vrot.slane %v374_v47, %v4001_v55  ;;  %v382_v32 = vcombine.high %v374_v47, %v374_v47 }
 0x302   :  { %5316 = vst [vmem:[#allocation11_spill] sm:$0xff] %v3984_v23 }
 0x303   :  { %1203 = vbcast.lane.b32.xlu1 %v3934_v54, 336  ;;  %v364_v54 = vadd.f32 %v362_v36, %v348_v49  ;;  %v4051_v36 = vrot.slane %v652_v62, %v4001_v55  ;;  %v74_v49 = vld [vmem:[%s5281_s9 + $0x38] sm:$0xff]  ;;  %v4072_v62 = vrot.slane %v660_v18, %v4001_v55  ;;  %v4078_v63 = vrot.slane %v390_v16, %v3834_v41 }
 0x304   :  { %v404_v3 = vrot.slane %v382_v32, %v4001_v55  ;;  %v3457_v4 = vpack.c.bf16 %v74_v49, %v73_v48 }
 0x305   :  { %v3987_v30 = vpop.permute.xlu0 %909  ;;  %v3989_v31 = vpop.permute.xlu1 %905  ;;  %v416_v58 = vcombine.high %v364_v54, %v364_v54  ;;  %v642_v59 = vmul.f32 %v364_v54, %v3869_v26  ;;  %v4038_v11 = vrot.slane %v364_v54, %v4001_v55  ;;  %v4091_v7 = vrot.slane %v4051_v36, %v3834_v41 }
 0x306   :  { %5317 = vst [vmem:[#allocation12_spill] sm:$0xff] %v3987_v30  ;;  %5318 = vst [vmem:[#allocation13_spill] sm:$0xff] %v3989_v31  ;;  %3458 = vmatprep.subr.bf16.mxu0 %v3457_v4  ;;  %v472_v33 = vrot.slane %v404_v3, %v3834_v41  ;;  %v690_v31 = vcombine.high %v4051_v36, %v4051_v36 }
 0x307   :  { %1387 = vbcast.lane.b32.xlu1 %v3907_v46, 336  ;;  %v4025_v1 = vrot.slane %v416_v58, %v4001_v55  ;;  %v701_v2 = vrot.slane %v642_v59, %v4001_v55  ;;  %v694_v17 = vcombine.high %v642_v59, %v642_v59  ;;  %v412_v58 = vcombine.high %v390_v16, %v390_v16 }
 0x308   :  { %v4068_v59 = vmul.f32 %v3212_v27, %v3867_v25  ;;  %v4084_v25 = vld [vmem:[%s5283_s7 + $0x8] sm:$0xff]  ;;  %v439_v10 = vrot.slane %v4038_v11, %v4001_v55  ;;  %3460 = vmatpush3.bf16.msra.mxu0 %v3457_v4 }
 0x309   :  { %v3994_v50 = vpop.permute.xlu0 %921  ;;  %v3996_v51 = vpop.permute.xlu1 %917  ;;  %v446_v28 = vrot.slane %v4025_v1, %v4001_v55  ;;  %v709_v29 = vcombine.high %v701_v2, %v701_v2  ;;  %v717_v53 = vrot.slane %v701_v2, %v4001_v55  ;;  %v708_v47 = vrot.slane %v694_v17, %v4001_v55 }
 0x30a   :  { %5319 = vst [vmem:[#allocation14_spill] sm:$0xff] %v3994_v50  ;;  %5320 = vst [vmem:[#allocation15_spill] sm:$0xff] %v3996_v51  ;;  %v432_v5 = vcombine.high %v4025_v1, %v4025_v1  ;;  %v4106_v1 = vrot.slane %v412_v58, %v3834_v41  ;;  %v414_v58 = vcombine.high %v404_v3, %v404_v3 }
 0x30b   :  { %1483 = vrot.lane.b32.xlu1 %v1479_v52, %s3701_s27  ;;  %v431_v52 = vcombine.high %v4038_v11, %v4038_v11  ;;  %5330 = vst [vmem:[#allocation25_spill] sm:$0xff] %v4068_v59  ;;  %v462_v0 = vcombine.high %v446_v28, %v446_v28  ;;  %v731_v2 = vrot.slane %v709_v29, %v4001_v55 }
 0x30c   :  { %v4096_v16 = vrot.slane %v446_v28, %v3834_v41  ;;  %v4099_v17 = vrot.slane %v717_v53, %v3834_v41  ;;  %v739_v18 = vcombine.high %v717_v53, %v717_v53  ;;  %v4109_v29 = vrot.slane %v708_v47, %v4001_v55 }
 0x30d   :  { %v4003_v56 = vpop.permute.xlu0 %933  ;;  %v4005_v46 = vpop.permute.xlu1 %929  ;;  %v710_v32 = vcombine.high %v708_v47, %v708_v47  ;;  %v546_v11 = vmul.f32 %v4078_v63, %v4084_v25  ;;  %v397_v28 = vrot.slane %v381_v40, %v4001_v55  ;;  %v4115_v48 = vrot.slane %v462_v0, %v3834_v41 }
 0x30e   :  { %5322 = vst [vmem:[#allocation17_spill] sm:$0xff] %v4003_v56  ;;  %5323 = vst [vmem:[#allocation18_spill] sm:$0xff] %v4005_v46  ;;  %v4118_v49 = vrot.slane %v731_v2, %v3834_v41  ;;  %v4122_v53 = vrot.slane %v4072_v62, %v3834_v41  ;;  %v741_v43 = vcombine.high %v731_v2, %v731_v2 }
 0x30f   :  { %v4126_v47 = vrot.slane %v4075_v38, %v4001_v55  ;;  %v411_v40 = vrot.slane %v383_v6, %v4001_v55  ;;  %v4130_v34 = vrot.slane %v439_v10, %v3834_v41  ;;  %v4133_v0 = vrot.slane %v739_v18, %v3834_v41 }
 0x310   :  { %v550_v2 = vmul.f32 %v4106_v1, %v4084_v25  ;;  %v461_v45 = vcombine.high %v439_v10, %v439_v10  ;;  %v4144_v42 = vrot.slane %v4109_v29, %v3834_v41  ;;  %v579_v6 = vmul.f32 1.442695, %v546_v11 }
 0x311   :  { %v4009_v60 = vpop.permute.xlu0 %1245  ;;  %v4011_v61 = vpop.permute.xlu1 %1241  ;;  %v4147_v39 = vrot.slane %v397_v28, %v3834_v41  ;;  %v570_v18 = vmul.f32 %v4096_v16, %v4084_v25  ;;  %v4152_v26 = vrot.slane %v414_v58, %v3834_v41  ;;  %v574_v3 = vmul.f32 %v4115_v48, %v4084_v25 }
 0x312   :  { %5324 = vst [vmem:[#allocation19_spill] sm:$0xff] %v4009_v60  ;;  %5325 = vst [vmem:[#allocation20_spill] sm:$0xff] %v4011_v61  ;;  %v413_v59 = vcombine.high %v397_v28, %v397_v28  ;;  %v453_v10 = vrot.slane %v431_v52, %v4001_v55  ;;  %v4161_v11 = vrot.slane %v710_v32, %v4001_v55  ;;  %3540 = vpow2.f32 %v579_v6 }
 0x313   :  { %v562_v4 = vmul.f32 %v4130_v34, %v4084_v25  ;;  %v548_v28 = vmul.f32 %v472_v33, %v4084_v25  ;;  %v4174_v52 = vrot.slane %v461_v45, %v3834_v41  ;;  %v627_v61 = vmul.f32 1.442695, %v570_v18  ;;  %v4188_v45 = vld [vmem:[%s5283_s7] sm:$0xff] }
 0x314   :  { %v4193_v32 = vrot.slane %v453_v10, %v3834_v41  ;;  %v460_v18 = vrot.slane %v432_v5, %v4001_v55  ;;  %v545_v5 = vmul.f32 %v4078_v63, %v4188_v45  ;;  %v661_v63 = vcombine.high %v4075_v38, %v4075_v38 }
 0x315   :  { %v4040_v12 = vpop.permute.xlu0 %1253  ;;  %v4042_v13 = vpop.permute.xlu1 %1249  ;;  %v611_v6 = vmul.f32 1.442695, %v562_v4  ;;  %v4207_v4 = vrot.slane %v4126_v47, %v3834_v41  ;;  %v691_v50 = vcombine.high %v4126_v47, %v4126_v47 }
 0x316   :  { %5326 = vst [vmem:[#allocation21_spill] sm:$0xff] %v4040_v12  ;;  %5327 = vst [vmem:[#allocation22_spill] sm:$0xff] %v4042_v13  ;;  %v635_v12 = vmul.f32 1.442695, %v574_v3  ;;  %v464_v60 = vcombine.high %v460_v18, %v460_v18 }
 0x319   :  { %v4063_v54 = vpop.permute.xlu0 %1291  ;;  %v4065_v57 = vpop.permute.xlu1 %1287 }
 0x31a   :  { %5328 = vst [vmem:[#allocation23_spill] sm:$0xff] %v4063_v54  ;;  %5329 = vst [vmem:[#allocation24_spill] sm:$0xff] %v4065_v57  ;;  %v587_v57 = vmul.f32 1.442695, %v550_v2  ;;  %v566_v54 = vmul.f32 %v4174_v52, %v4084_v25 }
 0x31c   :  { %3542 = vpow2.f32 %v587_v57 }
 0x31d   :  { %v4101_v24 = vpop.permute.xlu0 %1299  ;;  %v4103_v27 = vpop.permute.xlu1 %1295  ;;  %3544 = vpow2.f32 %v627_v61 }
 0x31e   :  { %5331 = vst [vmem:[#allocation26_spill] sm:$0xff] %v4101_v24  ;;  %5332 = vst [vmem:[#allocation27_spill] sm:$0xff] %v4103_v27  ;;  %v4158_v27 = vrot.slane %v741_v43, %v3834_v41  ;;  %v415_v43 = vcombine.high %v411_v40, %v411_v40  ;;  %v554_v24 = vmul.f32 %v4147_v39, %v4084_v25  ;;  %3546 = vpow2.f32 %v635_v12 }
 0x31f   :  { %3548 = vpow2.f32 %v611_v6  ;;  %v619_v12 = vmul.f32 1.442695, %v566_v54  ;;  %v4232_v6 = vrot.slane %v4161_v11, %v3834_v41  ;;  %v3541_v54 = vpop.eup %3540 }
 0x320   :  { %v4203_v46 = vrot.slane %v415_v43, %v3834_v41  ;;  %v564_v43 = vmul.f32 %v4193_v32, %v4084_v25 }
 0x321   :  { %v4135_v37 = vpop.permute.xlu0 %1337  ;;  %v4137_v35 = vpop.permute.xlu1 %1333  ;;  %5339 = vst [vmem:[#allocation34_spill] sm:$0xff] %v4232_v6 }
 0x322   :  { %5333 = vst [vmem:[#allocation28_spill] sm:$0xff] %v4135_v37  ;;  %5334 = vst [vmem:[#allocation29_spill] sm:$0xff] %v4137_v35  ;;  %v4164_v35 = vrot.slane %v411_v40, %v3834_v41  ;;  %v463_v40 = vcombine.high %v453_v10, %v453_v10  ;;  %v595_v10 = vmul.f32 1.442695, %v554_v24  ;;  %v560_v24 = vmul.f32 %v4203_v46, %v4084_v25 }
 0x324   :  { %v556_v2 = vmul.f32 %v4164_v35, %v4084_v25 }
 0x325   :  { %v4168_v58 = vpop.permute.xlu0 %1345  ;;  %v4170_v13 = vpop.permute.xlu1 %1341 }
 0x326   :  { %5335 = vst [vmem:[#allocation30_spill] sm:$0xff] %v4168_v58  ;;  %5336 = vst [vmem:[#allocation31_spill] sm:$0xff] %v4170_v13  ;;  %v552_v58 = vmul.f32 %v4152_v26, %v4084_v25  ;;  %v4183_v13 = vrot.slane %v413_v59, %v3834_v41  ;;  %v583_v59 = vmul.f32 1.442695, %v548_v28  ;;  %v4214_v28 = vrot.slane %v463_v40, %v3834_v41 }
 0x327   :  { %v547_v40 = vmul.f32 %v472_v33, %v4188_v45  ;;  %v549_v33 = vmul.f32 %v4106_v1, %v4188_v45  ;;  %v4251_v1 = vpop.eup %3542 }
 0x328   :  { %v558_v57 = vmul.f32 %v4183_v13, %v4084_v25  ;;  %3550 = vpow2.f32 %v583_v59  ;;  %v568_v38 = vmul.f32 %v4214_v28, %v4084_v25  ;;  %v615_v59 = vmul.f32 1.442695, %v564_v43 }
 0x329   :  { %v4196_v37 = vpop.permute.xlu0 %1383  ;;  %v4198_v3 = vpop.permute.xlu1 %1379  ;;  %3552 = vpow2.f32 %v595_v10  ;;  %v4237_v10 = vrot.slane %v464_v60, %v3834_v41  ;;  %v581_v60 = vmul.f32 1.442695, %v547_v40  ;;  %v585_v40 = vmul.f32 1.442695, %v549_v33 }
 0x32a   :  { %5337 = vst [vmem:[#allocation32_spill] sm:$0xff] %v4196_v37  ;;  %5338 = vst [vmem:[#allocation33_spill] sm:$0xff] %v4198_v3  ;;  %v591_v37 = vmul.f32 1.442695, %v552_v58  ;;  %v599_v3 = vmul.f32 1.442695, %v556_v2  ;;  %v4228_v2 = vrot.slane %v460_v18, %v3834_v41  ;;  %v561_v33 = vmul.f32 %v4130_v34, %v4188_v45 }
 0x32b   :  { %v577_v58 = vmul.f32 1.442695, %v545_v5  ;;  %v603_v51 = vmul.f32 1.442695, %v558_v57  ;;  %v551_v57 = vmul.f32 %v4152_v26, %v4188_v45  ;;  %v623_v47 = vmul.f32 1.442695, %v568_v38 }
 0x32c   :  { %3554 = vpow2.f32 %v591_v37  ;;  %v607_v37 = vmul.f32 1.442695, %v560_v24  ;;  %v572_v43 = vmul.f32 %v4228_v2, %v4084_v25  ;;  %v4257_v24 = vpop.eup %3544  ;;  %v4260_v26 = vrot.slane %v661_v63, %v4001_v55 }
 0x32d   :  { %v4218_v56 = vpop.permute.xlu0 %761  ;;  %v4220_v61 = vpop.permute.xlu1 %749  ;;  %3556 = vpow2.f32 %v599_v3  ;;  %5340 = vst [vmem:[#allocation35_spill] sm:$0xff] %v4257_v24  ;;  %v555_v38 = vmul.f32 %v4164_v35, %v4188_v45  ;;  %v569_v35 = vmul.f32 %v4096_v16, %v4188_v45  ;;  %v692_v16 = vcombine.high %v4072_v62, %v4072_v62 }
 0x32e   :  { %3558 = vpow2.f32 %v619_v12  ;;  %v553_v12 = vmul.f32 %v4147_v39, %v4188_v45  ;;  %v4264_v3 = vpop.eup %3546  ;;  %v589_v39 = vmul.f32 1.442695, %v551_v57  ;;  %v1015_v62 = vmul.f32 %v4091_v7, %v4220_v61 }
 0x32f   :  { %3560 = vpow2.f32 %v577_v58  ;;  %v576_v58 = vmul.f32 %v4237_v10, %v4084_v25  ;;  %5341 = vst [vmem:[#allocation36_spill] sm:$0xff] %v4264_v3  ;;  %v4273_v63 = vpop.eup %3548  ;;  %v631_v25 = vmul.f32 1.442695, %v572_v43  ;;  %v1048_v3 = vmul.f32 0.0, %v3541_v54 }
 0x330   :  { %3562 = vpow2.f32 %v603_v51  ;;  %v4269_v51 = vrot.slane %v691_v50, %v3834_v41  ;;  %v593_v24 = vmul.f32 1.442695, %v553_v12  ;;  %v565_v50 = vmul.f32 %v4174_v52, %v4188_v45 }
 0x331   :  { %v4241_v18 = vpop.permute.xlu0 %801  ;;  %v754_v5 = vpop.permute.xlu1 %753  ;;  %3564 = vpow2.f32 %v615_v59  ;;  %v639_v57 = vmul.f32 1.442695, %v576_v58  ;;  %v946_v54 = vrot.slane %v690_v31, %v3834_v41  ;;  %v557_v52 = vmul.f32 %v4183_v13, %v4188_v45 }
 0x332   :  { %3566 = vpow2.f32 %v607_v37  ;;  %v1016_v59 = vmul.f32 %v4091_v7, %v754_v5  ;;  %v3551_v55 = vpop.eup %3550  ;;  %v573_v5 = vmul.f32 %v4115_v48, %v4188_v45  ;;  %v609_v48 = vmul.f32 1.442695, %v561_v33 }
 0x333   :  { %3568 = vpow2.f32 %v581_v60  ;;  %v3553_v37 = vpop.eup %3552  ;;  %v1050_v30 = vmul.f32 0.0, %v3551_v55  ;;  %v617_v23 = vmul.f32 1.442695, %v565_v50  ;;  %v563_v31 = vmul.f32 %v4193_v32, %v4188_v45 }
 0x334   :  { %3570 = vpow2.f32 %v623_v47  ;;  %v597_v47 = vmul.f32 1.442695, %v555_v38  ;;  %v4293_v58 = vadd.f32 %v1048_v3, %v1016_v59  ;;  %v625_v13 = vmul.f32 1.442695, %v569_v35 }
 0x335   :  { %v4266_v6 = vpop.permute.xlu0 %813  ;;  %v766_v36 = vpop.permute.xlu1 %765  ;;  %3572 = vpow2.f32 %v585_v40  ;;  %v633_v38 = vmul.f32 1.442695, %v573_v5  ;;  %v567_v3 = vmul.f32 %v4214_v28, %v4188_v45  ;;  %v601_v55 = vmul.f32 1.442695, %v557_v52 }
 0x336   :  { %v4284_v60 = vpop.eup %3554  ;;  %3574 = vpow2.f32 %v589_v39  ;;  %v1018_v50 = vmul.f32 %v4122_v53, %v766_v36  ;;  %v1094_v28 = vmul.f32 %v4251_v1, %v4293_v58  ;;  %v613_v61 = vmul.f32 1.442695, %v563_v31 }
 0x337   :  { %v4291_v12 = vpop.eup %3556  ;;  %3576 = vpow2.f32 %v631_v25  ;;  %v571_v5 = vmul.f32 %v4228_v2, %v4188_v45  ;;  %v575_v36 = vmul.f32 %v4237_v10, %v4188_v45  ;;  %v1017_v1 = vmul.f32 %v4122_v53, %v4218_v56 }
 0x338   :  { %v4297_v40 = vpop.eup %3558  ;;  %3578 = vpow2.f32 %v593_v24  ;;  %v559_v24 = vmul.f32 %v4203_v46, %v4188_v45  ;;  %v621_v46 = vmul.f32 1.442695, %v567_v3  ;;  %v4332_v3 = vadd.f32 %v1050_v30, %v1018_v50 }
 0x339   :  { %v4286_v43 = vpop.permute.xlu0 %825  ;;  %v774_v34 = vpop.permute.xlu1 %773  ;;  %3580 = vpow2.f32 %v639_v57  ;;  %v693_v56 = vcombine.high %v4260_v26, %v4260_v26 }
 0x33a   :  { %v3561_v39 = vpop.eup %3560  ;;  %3582 = vpow2.f32 %v597_v47  ;;  %v605_v2 = vmul.f32 1.442695, %v559_v24  ;;  %v950_v24 = vrot.slane %v692_v16, %v3834_v41  ;;  %v1096_v16 = vmul.f32 %v4284_v60, %v4332_v3 }
 0x33b   :  { %v3563_v59 = vpop.eup %3562  ;;  %3584 = vpow2.f32 %v609_v48  ;;  %v1047_v7 = vmul.f32 0.0, %v3561_v39 }
 0x33c   :  { %v4309_v32 = vpop.eup %3564  ;;  %3586 = vpow2.f32 %v617_v23 }
 0x33d   :  { %v4305_v25 = vpop.permute.xlu0 %837  ;;  %v778_v33 = vpop.permute.xlu1 %777  ;;  %3588 = vpow2.f32 %v625_v13  ;;  %v4328_v31 = vadd.f32 %v1047_v7, %v1015_v62  ;;  %v1024_v13 = vmul.f32 %v4207_v4, %v4241_v18  ;;  %v637_v7 = vmul.f32 1.442695, %v575_v36 }
 0x33e   :  { %v1020_v57 = vmul.f32 %v946_v54, %v778_v33  ;;  %v4314_v35 = vpop.eup %3566  ;;  %3590 = vpow2.f32 %v633_v38  ;;  %v1019_v38 = vmul.f32 %v946_v54, %v774_v34  ;;  %v1028_v34 = vmul.f32 %v4269_v51, %v4286_v43 }
 0x33f   :  { %v3569_v47 = vpop.eup %3568  ;;  %3592 = vpow2.f32 %v601_v55  ;;  %v5343_v36 = vcombine.high %v4161_v11, %v4161_v11  ;;  %v958_v43 = vrot.slane %v4260_v26, %v3834_v41  ;;  %v4377_v11 = vrot.slane %v693_v56, %v3834_v41 }
 0x340   :  { %v4318_v52 = vadd.f32 %v1094_v28, %v1020_v57  ;;  %v4322_v33 = vpop.eup %3570  ;;  %v1049_v53 = vmul.f32 0.0, %v3569_v47  ;;  %3594 = vpow2.f32 %v613_v61  ;;  %v629_v57 = vmul.f32 1.442695, %v571_v5 }
 0x341   :  { %v4326_v48 = vpop.permute.xlu0 %1061  ;;  %v786_v23 = vpop.permute.xlu1 %785  ;;  %3596 = vpow2.f32 %v621_v46  ;;  %v5342_v46 = vcombine.high %v4109_v29, %v4109_v29  ;;  %v4391_v56 = vmul.f32 %v4099_v17, %v3963_v9  ;;  %v4408_v9 = vmul.f32 %v4133_v0, %v3974_v20 }
 0x342   :  { %v3573_v39 = vpop.eup %3572  ;;  %v1140_v45 = vmul.f32 %v3553_v37, %v4318_v52  ;;  %v4344_v55 = vadd.f32 %v1049_v53, %v1017_v1  ;;  %3598 = vpow2.f32 %v605_v2  ;;  %v4362_v2 = vrot.slane %v5343_v36, %v3834_v41 }
 0x343   :  { %v3575_v10 = vpop.eup %3574  ;;  %v1093_v50 = vmul.f32 %v3573_v39, %v4328_v31  ;;  %v994_v1 = vrot.slane %v5342_v46, %v3834_v41  ;;  %3600 = vpow2.f32 %v629_v57  ;;  %v1021_v60 = vmul.f32 %v950_v24, %v786_v23 }
 0x344   :  { %v4337_v62 = vpop.eup %3576  ;;  %v4340_v28 = vadd.f32 %v1140_v45, %v1024_v13  ;;  %v1032_v53 = vmul.f32 %v4099_v17, %v3961_v8  ;;  %v1095_v26 = vmul.f32 %v3575_v10, %v4344_v55  ;;  %3602 = vpow2.f32 %v637_v7 }
 0x345   :  { %v3579_v30 = vpop.eup %3578  ;;  %v4342_v18 = vpop.permute.xlu0 %1069  ;;  %v4370_v45 = vadd.f32 %v1093_v50, %v1019_v38  ;;  %v1026_v23 = vmul.f32 %v958_v43, %v4266_v6  ;;  %v1034_v10 = vmul.f32 %v4118_v49, %v3967_v14  ;;  %v4397_v7 = vmul.f32 %v4118_v49, %v3969_v15 }
 0x346   :  { %v790_v37 = vpop.permute.xlu1 %789  ;;  %v4347_v61 = vpop.eup %3580  ;;  %v1186_v5 = vmul.f32 %v3563_v59, %v4340_v28  ;;  %v1038_v14 = vmul.f32 %v4158_v27, %v3977_v44  ;;  %v4414_v15 = vmul.f32 %v4158_v27, %v3979_v21  ;;  %v5346_v21 = vld [vmem:[#allocation34_spill] sm:$0xff] }
 0x347   :  { %v1022_v54 = vmul.f32 %v950_v24, %v790_v37  ;;  %v3583_v47 = vpop.eup %3582 }
 0x348   :  { %v4366_v39 = vpop.eup %3584  ;;  %v4368_v13 = vadd.f32 %v1186_v5, %v1028_v34 }
 0x349   :  { %v1100_v59 = vadd.f32 %v1096_v16, %v1022_v54  ;;  %v4372_v29 = vpop.eup %3586  ;;  %v1108_v37 = vpop.permute.xlu0 %1107  ;;  %v1139_v54 = vmul.f32 %v3579_v30, %v4370_v45  ;;  %v5344_v30 = vld [vmem:[#allocation11_spill] sm:$0xff] }
 0x34a   :  { %v798_v46 = vpop.permute.xlu1 %797  ;;  %v4380_v57 = vpop.eup %3588  ;;  %v1232_v50 = vmul.f32 %v4273_v63, %v4368_v13  ;;  %v4401_v63 = vadd.f32 %v1095_v26, %v1021_v60  ;;  %v4422_v36 = vmul.f32 %v4144_v42, %v5344_v30  ;;  %v1030_v26 = vmul.f32 %v4377_v11, %v4305_v25 }
 0x34b   :  { %v1023_v38 = vmul.f32 %v4207_v4, %v798_v46  ;;  %v1142_v24 = vmul.f32 %v4291_v12, %v1100_v59  ;;  %v4387_v8 = vpop.eup %3590  ;;  %v1036_v4 = vmul.f32 %v4133_v0, %v3972_v19  ;;  %v1040_v19 = vmul.f32 %v4144_v42, %v3982_v22  ;;  %v5347_v46 = vld [vmem:[#allocation13_spill] sm:$0xff] }
 0x34c   :  { %v3593_v6 = vpop.eup %3592  ;;  %v1236_v34 = vadd.f32 %v1232_v50, %v1032_v53  ;;  %v5345_v53 = vld [vmem:[#allocation12_spill] sm:$0xff]  ;;  %v4433_v22 = vmul.f32 %v5346_v21, %v5347_v46  ;;  %v1141_v50 = vmul.f32 %v3583_v47, %v4401_v63  ;;  %v1074_v30 = vmul.f32 %v4342_v18, %v4332_v3  ;;  %v5350_v46 = vld [vmem:[#allocation35_spill] sm:$0xff] }
 0x34d   :  { %v1146_v12 = vadd.f32 %v1142_v24, %v1026_v23  ;;  %v4404_v16 = vpop.eup %3594  ;;  %v1116_v17 = vpop.permute.xlu0 %1115  ;;  %v4425_v60 = vadd.f32 %v1139_v54, %v1023_v38  ;;  %v4429_v27 = vmul.f32 %v5346_v21, %v5345_v53  ;;  %v5348_v23 = vld [vmem:[#allocation14_spill] sm:$0xff]  ;;  %v5349_v24 = vld [vmem:[#allocation15_spill] sm:$0xff]  ;;  %v1118_v25 = vmul.f32 %v1108_v37, %v4318_v52 }
 0x34e   :  { %v810_v49 = vpop.permute.xlu1 %809  ;;  %v4418_v5 = vpop.eup %3596  ;;  %v1278_v0 = vmul.f32 %v4297_v40, %v1236_v34  ;;  %v4440_v40 = vmul.f32 %v994_v1, %v5349_v24  ;;  %v1120_v3 = vmul.f32 %v1116_v17, %v1100_v59  ;;  %v5352_v52 = vld [vmem:[#allocation19_spill] sm:$0xff] }
 0x34f   :  { %v1025_v20 = vmul.f32 %v958_v43, %v810_v49  ;;  %v3599_v44 = vpop.eup %3598  ;;  %v1188_v42 = vmul.f32 %v4314_v35, %v1146_v12  ;;  %v1044_v43 = vmul.f32 %v994_v1, %v5348_v23  ;;  %v1072_v49 = vmul.f32 %v4326_v48, %v4293_v58  ;;  %v5351_v58 = vld [vmem:[#allocation17_spill] sm:$0xff]  ;;  %v5354_v17 = vld [vmem:[#allocation23_spill] sm:$0xff] }
 0x350   :  { %v1282_v38 = vadd.f32 %v1278_v0, %v1036_v4  ;;  %v4443_v54 = vpop.eup %3600  ;;  %v1185_v47 = vmul.f32 %v3593_v6, %v4425_v60  ;;  %v4461_v48 = vmul.f32 %v4362_v2, %v5351_v58  ;;  %v1256_v18 = vmul.f32 %v5352_v52, %v1236_v34  ;;  %v5355_v58 = vld [vmem:[#allocation36_spill] sm:$0xff] }
 0x351   :  { %v1154_v53 = vpop.permute.xlu0 %1153  ;;  %v4450_v21 = vadd.f32 %v1188_v42, %v1030_v26  ;;  %v4454_v0 = vadd.f32 %v1141_v50, %v1025_v20  ;;  %v4457_v23 = vpop.eup %3602  ;;  %v5353_v26 = vld [vmem:[#allocation18_spill] sm:$0xff]  ;;  %v1076_v24 = vsel %vm257_vm4, %v1072_v49, 0.0  ;;  %v1085_v50 = vsel %vm257_vm4, %v1074_v30, 0.0 }
 0x352   :  { %v822_v35 = vpop.permute.xlu1 %821  ;;  %v1324_v4 = vmul.f32 %v5350_v46, %v1282_v38  ;;  %v1164_v20 = vmul.f32 %v1154_v53, %v4340_v28  ;;  %v1302_v34 = vmul.f32 %v5354_v17, %v1282_v38  ;;  %v1260_v49 = vsel %vm257_vm4, %v1256_v18, 0.0  ;;  %v5359_v17 = vld [vmem:[#allocation20_spill] sm:$0xff] }
 0x353   :  { %v1027_v1 = vmul.f32 %v4269_v51, %v822_v35  ;;  %v1234_v37 = vmul.f32 %v4309_v32, %v4450_v21  ;;  %v4468_v51 = vmul.f32 %v4362_v2, %v5353_v26  ;;  %v4477_v32 = vsel %vm257_vm4, %v1118_v25, 0.0  ;;  %v5357_v26 = vld [vmem:[#allocation21_spill] sm:$0xff] }
 0x354   :  { %v1328_v42 = vadd.f32 %v1324_v4, %v1040_v19  ;;  %v1187_v28 = vmul.f32 %v3599_v44, %v4454_v0  ;;  %v4483_v19 = vsel %vm257_vm4, %v1120_v3, 0.0  ;;  %v1306_v44 = vsel %vm257_vm4, %v1302_v34, 0.0  ;;  %v5356_v4 = vld [vmem:[#allocation28_spill] sm:$0xff] }
 0x355   :  { %v4471_v6 = vadd.f32 %v1185_v47, %v1027_v1  ;;  %v1162_v35 = vpop.permute.xlu0 %1161  ;;  %v1238_v46 = vadd.f32 %v1234_v37, %v1034_v10  ;;  %v4490_v10 = vsel %vm257_vm4, %v1164_v20, 0.0 }
 0x356   :  { %v834_v59 = vpop.permute.xlu1 %833  ;;  %v1370_v52 = vmul.f32 %v5355_v58, %v1328_v42  ;;  %v1166_v25 = vmul.f32 %v1162_v35, %v1146_v12  ;;  %v1348_v47 = vmul.f32 %v5356_v4, %v1328_v42 }
 0x357   :  { %v1029_v2 = vmul.f32 %v4377_v11, %v834_v59  ;;  %v1280_v30 = vmul.f32 %v4322_v33, %v1238_v46  ;;  %v1231_v38 = vmul.f32 %v4366_v39, %v4471_v6  ;;  %v1258_v20 = vmul.f32 %v5357_v26, %v1238_v46 }
 0x358   :  { %v1374_v53 = vadd.f32 %v1370_v52, %v1044_v43  ;;  %v5358_v43 = vld [vmem:[#allocation32_spill] sm:$0xff] }
 0x359   :  { %v4492_v11 = vadd.f32 %v1187_v28, %v1029_v2  ;;  %v1200_v1 = vpop.permute.xlu0 %1199  ;;  %v1284_v37 = vadd.f32 %v1280_v30, %v1038_v14  ;;  %v1235_v18 = vadd.f32 %v1231_v38, %v4391_v56  ;;  %v4507_v14 = vsel %vm257_vm4, %v1166_v25, 0.0  ;;  %v5360_v56 = vld [vmem:[#allocation26_spill] sm:$0xff] }
 0x35a   :  { %v1058_v3 = vpop.permute.xlu1 %1057  ;;  %v1210_v33 = vmul.f32 %v1200_v1, %v4368_v13  ;;  %v1394_v35 = vmul.f32 %v5358_v43, %v1374_v53 }
 0x35b   :  { %v1071_v39 = vmul.f32 %v1058_v3, %v4328_v31  ;;  %v1233_v12 = vmul.f32 %v4404_v16, %v4492_v11  ;;  %v1326_v59 = vmul.f32 %v4337_v62, %v1284_v37  ;;  %v1255_v34 = vmul.f32 %v5359_v17, %v1235_v18  ;;  %v5361_v3 = vld [vmem:[#allocation24_spill] sm:$0xff] }
 0x35c   :  { %v1277_v42 = vmul.f32 %v4372_v29, %v1235_v18  ;;  %v1304_v31 = vmul.f32 %v5360_v56, %v1284_v37  ;;  %v1352_v16 = vsel %vm257_vm4, %v1348_v47, 0.0  ;;  %v4518_v29 = vsel %vm257_vm4, %v1258_v20, 0.0 }
 0x35d   :  { %v1075_v13 = vsel %vm257_vm4, %v1071_v39, 0.0  ;;  %v4512_v46 = vadd.f32 %v1233_v12, %v4397_v7  ;;  %v1330_v62 = vadd.f32 %v1326_v59, %v4429_v27  ;;  %v1259_v52 = vsel %vm257_vm4, %v1255_v34, 0.0  ;;  %v1208_v28 = vpop.permute.xlu0 %1207 }
 0x35e   :  { %v1077_v2 = vadd.f32 %v1076_v24, %v1075_v13  ;;  %v1066_v58 = vpop.permute.xlu1 %1065  ;;  %v1261_v38 = vadd.f32 %v1260_v49, %v1259_v52  ;;  %v1281_v25 = vadd.f32 %v1277_v42, %v4408_v9  ;;  %v4523_v7 = vsel %vm257_vm4, %v1210_v33, 0.0  ;;  %v5364_v52 = vld [vmem:[#allocation29_spill] sm:$0xff] }
 0x35f   :  { %v1073_v30 = vmul.f32 %v1066_v58, %v4344_v55  ;;  %v4526_v53 = vsel %vm257_vm4, %v1394_v35, 0.0  ;;  %v1372_v27 = vmul.f32 %v4347_v61, %v1330_v62  ;;  %v4531_v4 = vsel %vm257_vm4, %v1304_v31, 0.0  ;;  %v5362_v35 = vld [vmem:[#allocation30_spill] sm:$0xff] }
 0x360   :  { %v1078_v24 = vrot.slane %v1077_v2, 4  ;;  %v1262_v47 = vrot.slane %v1261_v38, 4  ;;  %v1301_v55 = vmul.f32 %v5361_v3, %v1281_v25  ;;  %v1212_v9 = vmul.f32 %v1208_v28, %v4450_v21 }
 0x361   :  { %v1084_v1 = vsel %vm257_vm4, %v1073_v30, 0.0  ;;  %v1376_v18 = vadd.f32 %v1372_v27, %v4461_v48  ;;  %v1323_v20 = vmul.f32 %v4380_v57, %v1281_v25  ;;  %v1350_v59 = vmul.f32 %v5362_v35, %v1330_v62  ;;  %v1392_v34 = vpop.permute.xlu0 %1391  ;;  %v5363_v48 = vld [vmem:[#allocation22_spill] sm:$0xff] }
 0x362   :  { %v1079_v49 = vadd.f32 %v1078_v24, %v1077_v2  ;;  %v1086_v37 = vadd.f32 %v1085_v50, %v1084_v1  ;;  %v1104_v33 = vpop.permute.xlu1 %1103  ;;  %v1263_v26 = vadd.f32 %v1262_v47, %v1261_v38  ;;  %v1305_v61 = vsel %vm257_vm4, %v1301_v55, 0.0 }
 0x363   :  { %v1117_v39 = vmul.f32 %v1104_v33, %v4370_v45  ;;  %v1307_v17 = vadd.f32 %v1306_v44, %v1305_v61  ;;  %v1327_v50 = vadd.f32 %v1323_v20, %v4422_v36  ;;  %v1257_v13 = vmul.f32 %v5363_v48, %v4512_v46 }
 0x364   :  { %v1080_v12 = vrot.slane %v1079_v49, 2  ;;  %v1087_v43 = vrot.slane %v1086_v37, 4  ;;  %v1264_v21 = vrot.slane %v1263_v26, 2  ;;  %v4545_v56 = vsel %vm257_vm4, %v1212_v9, 0.0 }
 0x365   :  { %v1121_v42 = vsel %vm257_vm4, %v1117_v39, 0.0  ;;  %v1308_v62 = vrot.slane %v1307_v17, 4  ;;  %v1347_v28 = vmul.f32 %v5364_v52, %v1327_v50  ;;  %v1396_v38 = vmul.f32 %v1392_v34, %v1376_v18 }
 0x366   :  { %v1081_v45 = vadd.f32 %v1080_v12, %v1079_v49  ;;  %v1088_v31 = vadd.f32 %v1087_v43, %v1086_v37  ;;  %v1123_v57 = vadd.f32 %v4477_v32, %v1121_v42  ;;  %v1112_v2 = vpop.permute.xlu1 %1111  ;;  %v1265_v44 = vadd.f32 %v1264_v21, %v1263_v26  ;;  %v5365_v21 = vld [vmem:[#allocation33_spill] sm:$0xff] }
 0x367   :  { %v1119_v58 = vmul.f32 %v1112_v2, %v4401_v63  ;;  %v1369_v25 = vmul.f32 %v4387_v8, %v1327_v50  ;;  %v1309_v27 = vadd.f32 %v1308_v62, %v1307_v17  ;;  %v1351_v1 = vsel %vm257_vm4, %v1347_v28, 0.0 }
 0x368   :  { %v1089_v30 = vrot.slane %v1088_v31, 2  ;;  %v1124_v36 = vrot.slane %v1123_v57, 4  ;;  %v1268_v47 = vsel %vm257_vm4, %v1257_v13, 0.0  ;;  %v1082_v32 = vrot.slane %v1081_v45, 1 }
 0x369   :  { %v1130_v24 = vsel %vm257_vm4, %v1119_v58, 0.0  ;;  %v1266_v37 = vrot.slane %v1265_v44, 1  ;;  %v1310_v18 = vrot.slane %v1309_v27, 2  ;;  %v1353_v33 = vadd.f32 %v1352_v16, %v1351_v1 }
 0x36a   :  { %v1090_v3 = vadd.f32 %v1089_v30, %v1088_v31  ;;  %v1125_v55 = vadd.f32 %v1124_v36, %v1123_v57  ;;  %v1132_v63 = vadd.f32 %v4483_v19, %v1130_v24  ;;  %v1150_v49 = vpop.permute.xlu1 %1149  ;;  %v4557_v8 = vsel %vm257_vm4, %v1350_v59, 0.0 }
 0x36b   :  { %v1163_v9 = vmul.f32 %v1150_v49, %v4425_v60  ;;  %v1373_v61 = vadd.f32 %v1369_v25, %v4440_v40  ;;  %v4561_v12 = vsel %vm257_vm4, %v1396_v38, 0.0  ;;  %v1270_v19 = vadd.f32 %v4518_v29, %v1268_v47  ;;  %v5366_v47 = vld [vmem:[#allocation27_spill] sm:$0xff] }
 0x36c   :  { %v1126_v39 = vrot.slane %v1125_v55, 2  ;;  %v1133_v26 = vrot.slane %v1132_v63, 4  ;;  %v1091_v20 = vrot.slane %v1090_v3, 1  ;;  %v4565_v35 = vadd.f32 %v1082_v32, %v1081_v45 }
 0x36d   :  { %v1167_v43 = vsel %vm257_vm4, %v1163_v9, 0.0  ;;  %v4569_v42 = vadd.f32 %v1266_v37, %v1265_v44  ;;  %v4571_v40 = vadd.f32 %v1310_v18, %v1309_v27  ;;  %v1393_v50 = vmul.f32 %v5365_v21, %v1373_v61 }
 0x36e   :  { %v1127_v60 = vadd.f32 %v1126_v39, %v1125_v55  ;;  %v1134_v17 = vadd.f32 %v1133_v26, %v1132_v63  ;;  %v1169_v16 = vadd.f32 %v4490_v10, %v1167_v43  ;;  %v1158_v59 = vpop.permute.xlu1 %1157  ;;  %v1354_v31 = vrot.slane %v1353_v33, 4 }
 0x36f   :  { %v1165_v34 = vmul.f32 %v1158_v59, %v4454_v0  ;;  %v1271_v57 = vrot.slane %v1270_v19, 4  ;;  %v4574_v29 = vadd.f32 %v1091_v20, %v1090_v3  ;;  %v1397_v2 = vsel %vm257_vm4, %v1393_v50, 0.0  ;;  %v5367_v20 = vld [vmem:[#allocation31_spill] sm:$0xff] }
 0x370   :  { %v1135_v48 = vrot.slane %v1134_v17, 2  ;;  %v1170_v13 = vrot.slane %v1169_v16, 4  ;;  %v1279_v10 = vmul.f32 %v4418_v5, %v4512_v46  ;;  %v1128_v0 = vrot.slane %v1127_v60, 1 }
 0x371   :  { %v1176_v45 = vsel %vm257_vm4, %v1165_v34, 0.0  ;;  %v1312_v30 = vrot.slane %v4571_v40, 1  ;;  %v1272_v38 = vadd.f32 %v1271_v57, %v1270_v19  ;;  %v1355_v27 = vadd.f32 %v1354_v31, %v1353_v33 }
 0x372   :  { %v1136_v58 = vadd.f32 %v1135_v48, %v1134_v17  ;;  %v1171_v44 = vadd.f32 %v1170_v13, %v1169_v16  ;;  %v1178_v62 = vadd.f32 %v4507_v14, %v1176_v45  ;;  %v1196_v52 = vpop.permute.xlu1 %1195  ;;  %v1283_v36 = vadd.f32 %v1279_v10, %v4414_v15 }
 0x373   :  { %v1209_v28 = vmul.f32 %v1196_v52, %v4471_v6  ;;  %v1399_v1 = vadd.f32 %v4526_v53, %v1397_v2  ;;  %v1273_v46 = vrot.slane %v1272_v38, 2  ;;  %v1129_v3 = vadd.f32 %v1128_v0, %v1127_v60 }
 0x374   :  { %v1172_v25 = vrot.slane %v1171_v44, 2  ;;  %v1179_v24 = vrot.slane %v1178_v62, 4  ;;  %v1303_v32 = vmul.f32 %v5366_v47, %v1283_v36  ;;  %v1325_v14 = vmul.f32 %v4443_v54, %v1283_v36 }
 0x375   :  { %v1213_v5 = vsel %vm257_vm4, %v1209_v28, 0.0  ;;  %v1137_v55 = vrot.slane %v1136_v58, 1  ;;  %v1274_v9 = vadd.f32 %v1273_v46, %v1272_v38  ;;  %v1356_v26 = vrot.slane %v1355_v27, 2 }
 0x376   :  { %v1180_v6 = vadd.f32 %v1179_v24, %v1178_v62  ;;  %v1215_v63 = vadd.f32 %v4523_v7, %v1213_v5  ;;  %v1204_v49 = vpop.permute.xlu1 %1203  ;;  %v1314_v37 = vsel %vm257_vm4, %v1303_v32, 0.0  ;;  %v1329_v53 = vadd.f32 %v1325_v14, %v4433_v22 }
 0x377   :  { %v1211_v15 = vmul.f32 %v1204_v49, %v4492_v11  ;;  %v1316_v39 = vadd.f32 %v4531_v4, %v1314_v37  ;;  %v1173_v61 = vadd.f32 %v1172_v25, %v1171_v44  ;;  %v1138_v19 = vadd.f32 %v1137_v55, %v1136_v58 }
 0x378   :  { %v1181_v18 = vrot.slane %v1180_v6, 2  ;;  %v1216_v33 = vrot.slane %v1215_v63, 4  ;;  %v1349_v43 = vmul.f32 %v5367_v20, %v1329_v53  ;;  %v1371_v7 = vmul.f32 %v4457_v23, %v1329_v53 }
 0x379   :  { %v1222_v54 = vsel %vm257_vm4, %v1211_v15, 0.0  ;;  %v1275_v22 = vrot.slane %v1274_v9, 1  ;;  %v1317_v59 = vrot.slane %v1316_v39, 4  ;;  %v1174_v13 = vrot.slane %v1173_v61, 1 }
 0x37a   :  { %v1182_v11 = vadd.f32 %v1181_v18, %v1180_v6  ;;  %v1217_v60 = vadd.f32 %v1216_v33, %v1215_v63  ;;  %v1224_v17 = vadd.f32 %v4545_v56, %v1222_v54  ;;  %v1388_v16 = vpop.permute.xlu1 %1387  ;;  %v1360_v4 = vsel %vm257_vm4, %v1349_v43, 0.0 }
 0x37b   :  { %v1375_v34 = vadd.f32 %v1371_v7, %v4468_v51  ;;  %v1362_v23 = vadd.f32 %v4557_v8, %v1360_v4  ;;  %v1318_v31 = vadd.f32 %v1317_v59, %v1316_v39  ;;  %v1400_v45 = vrot.slane %v1399_v1, 4 }
 0x37c   :  { %v1183_v21 = vrot.slane %v1182_v11, 1  ;;  %v1218_v50 = vrot.slane %v1217_v60, 2  ;;  %v1225_v48 = vrot.slane %v1224_v17, 4  ;;  %v1357_v0 = vadd.f32 %v1356_v26, %v1355_v27 }
 0x37d   :  { %v1395_v57 = vmul.f32 %v1388_v16, %v1375_v34  ;;  %v1363_v10 = vrot.slane %v1362_v23, 4  ;;  %v1319_v44 = vrot.slane %v1318_v31, 2  ;;  %v1401_v52 = vadd.f32 %v1400_v45, %v1399_v1  ;;  %v3698_v34 = vld [vmem:[%s5282_s8] ss:$0 sm:$0xff] }
 0x37e   :  { %v1219_v56 = vadd.f32 %v1218_v50, %v1217_v60  ;;  %v1226_v2 = vadd.f32 %v1225_v48, %v1224_v17  ;;  %v1184_v58 = vadd.f32 %v1183_v21, %v1182_v11  ;;  %v1276_v28 = vadd.f32 %v1275_v22, %v1274_v9  ;;  %v5368_v11 = vld [vmem:[#allocation25_spill] sm:$0xff]  ;;  %v1484_v17 = vpop.permute.xlu1 %1483  ;;  %v5369_v21 = vld [vmem:[#allocation6_spill] sm:$0xff] }
 0x37f   :  { %v1406_v62 = vsel %vm257_vm4, %v1395_v57, 0.0  ;;  %v1364_v38 = vadd.f32 %v1363_v10, %v1362_v23  ;;  %v1175_v8 = vadd.f32 %v1174_v13, %v1173_v61  ;;  %v1320_v24 = vadd.f32 %v1319_v44, %v1318_v31  ;;  %v1486_v31 = vpop.permute.xlu0 %1485 }
 0x380   :  { %v1227_v51 = vrot.slane %v1226_v2, 2  ;;  %v1408_v36 = vadd.f32 %v4561_v12, %v1406_v62  ;;  %v1220_v25 = vrot.slane %v1219_v56, 1  ;;  %v1402_v5 = vrot.slane %v1401_v52, 2 }
 0x381   :  { %v1365_v47 = vrot.slane %v1364_v38, 2  ;;  %v1358_v14 = vrot.slane %v1357_v0, 1  ;;  %v1321_v55 = vrot.slane %v1320_v24, 1  ;;  %v1423_v6 = vsel %vm1422_vm6, %v1138_v19, %v1129_v3 }
 0x382   :  { %v1228_v46 = vadd.f32 %v1227_v51, %v1226_v2  ;;  %v1409_v32 = vrot.slane %v1408_v36, 4  ;;  %v1403_v27 = vadd.f32 %v1402_v5, %v1401_v52  ;;  %v1428_v63 = vsel %vm1427_vm7, %v1184_v58, %v1175_v8 }
 0x383   :  { %v1366_v49 = vadd.f32 %v1365_v47, %v1364_v38  ;;  %v1437_v12 = vsel %vm1417_vm5, %v1276_v28, %v4569_v42  ;;  %v1221_v9 = vadd.f32 %v1220_v25, %v1219_v56  ;;  %v1313_v37 = vadd.f32 %v1312_v30, %v4571_v40  ;;  %v3699_v56 = vld [vmem:[%s5274_s0 + $0x8] sm:$0xff]  ;;  %v3216_v28 = vld [vmem:[%s5275_s2 + $0x20] sm:$0xff]  ;;  %v3219_v25 = vld [vmem:[%s5275_s2 + $0x38] sm:$0xff] }
 0x384   :  { %v1229_v1 = vrot.slane %v1228_v46, 1  ;;  %v1410_v15 = vadd.f32 %v1409_v32, %v1408_v36  ;;  %v1322_v53 = vadd.f32 %v1321_v55, %v1320_v24  ;;  %v1418_v18 = vsel %vm1417_vm5, %v4574_v29, %v4565_v35  ;;  %v3217_v38 = vld [vmem:[%s5275_s2 + $0x28] sm:$0xff]  ;;  %v3218_v36 = vld [vmem:[%s5275_s2 + $0x30] sm:$0xff] }
 0x385   :  { %v1367_v3 = vrot.slane %v1366_v49, 1  ;;  %v1451_v26 = vsel %vm228_vm3, %v1418_v18, %v1423_v6  ;;  %v1359_v61 = vadd.f32 %v1358_v14, %v1357_v0  ;;  %v1404_v54 = vrot.slane %v1403_v27, 1  ;;  %v3700_v0 = vld [vmem:[%s5274_s0] sm:$0xff] }
 0x386   :  { %v1230_v33 = vadd.f32 %v1229_v1, %v1228_v46  ;;  %v1411_v39 = vrot.slane %v1410_v15, 2  ;;  %v1441_v20 = vsel %vm1422_vm6, %v1322_v53, %v1313_v37  ;;  %v1452_v42 = vsel %vm213_vm2, %v1451_v26, %v1428_v63  ;;  %v3242_v63 = vld [vmem:[%s5276_s1 + $0x1] ss:$0 sm:$0xff]  ;;  %v3223_v37 = vld [vmem:[%s5277_s5 + $0x48] sm:$0xff]  ;;  %v3224_v53 = vld [vmem:[%s5277_s5 + $0x50] sm:$0xff] }
 0x387   :  { %v1368_v43 = vadd.f32 %v1367_v3, %v1366_v49  ;;  %v1454_v30 = vsel %vm228_vm3, %v1437_v12, %v1441_v20  ;;  %v1405_v59 = vadd.f32 %v1404_v54, %v1403_v27  ;;  %v1464_v50 = vmul.f32 %v3698_v34, %v5369_v21  ;;  %v3227_v26 = vld [vmem:[%s5277_s5 + $0x68] sm:$0xff]  ;;  %v3228_v54 = vld [vmem:[%s5277_s5 + $0x70] sm:$0xff]  ;;  %v3229_v20 = vld [vmem:[%s5277_s5 + $0x78] sm:$0xff] }
 0x388   :  { %v1412_v7 = vadd.f32 %v1411_v39, %v1410_v15  ;;  %v1433_v40 = vsel %vm1432_vm8, %v1230_v33, %v1221_v9  ;;  %v3461_v8 = vpack.c.bf16 %v3217_v38, %v3216_v28  ;;  %v3465_v24 = vpack.c.bf16 %v3219_v25, %v3218_v36  ;;  %v3222_v9 = vld [vmem:[%s5277_s5 + $0x40] sm:$0xff]  ;;  %v3225_v33 = vld [vmem:[%s5277_s5 + $0x58] sm:$0xff]  ;;  %v5372_v21 = vld [vmem:[#allocation4_spill] sm:$0xff] }
 0x389   :  { %v1453_v19 = vsel %vm198_vm1, %v1452_v42, %v1433_v40  ;;  %v1445_v29 = vsel %vm1427_vm7, %v1368_v43, %v1359_v61  ;;  %v3469_v18 = vpack.c.bf16 %v3223_v37, %v3222_v9  ;;  %v3473_v3 = vpack.c.bf16 %v3225_v33, %v3224_v53  ;;  %v3226_v39 = vld [vmem:[%s5277_s5 + $0x60] sm:$0xff] }
 0x38a   :  { %v1413_v35 = vrot.slane %v1412_v7, 1  ;;  %v1465_v60 = vadd.f32 %v5368_v11, %v1453_v19  ;;  %v1455_v16 = vsel %vm213_vm2, %v1454_v30, %v1445_v29  ;;  %3462 = vmatprep.subr.bf16.mxu1 %v3461_v8  ;;  %v3477_v61 = vpack.c.bf16 %v3227_v26, %v3226_v39  ;;  %v3220_v43 = vld [vmem:[%s5278_s3 + $0x4] sm:$0xf]  ;;  %v3245_v19 = vld [vmem:[%s5279_s4 + $0x1] ss:$0 sm:$0xff] }
 0x38b   :  { %3464 = vmatpush3.bf16.msra.mxu1 %v3461_v8  ;;  %3470 = vmatprep.subr.bf16.mxu0 %v3469_v18  ;;  %v3481_v42 = vpack.c.bf16 %v3229_v20, %v3228_v54  ;;  %v5375_v26 = vld [vmem:[#allocation7_spill] sm:$0xff]  ;;  %v5376_v54 = vld [vmem:[#allocation8_spill] sm:$0xff] }
 0x38c   :  { %v1414_v22 = vadd.f32 %v1413_v35, %v1412_v7  ;;  %v1489_v4 = vmul.f32 %v1484_v17, %v1465_v60  ;;  %3466 = vmatprep.subr.bf16.mxu1 %v3465_v24  ;;  %v5371_v7 = vld [vmem:[#allocation3_spill] sm:$0xff]  ;;  %v1740_v17 = vrot.slane %v3220_v43, %v3834_v41 }
 0x38d   :  { %v1718_v40 = vrot.slane %v3220_v43, %v5371_v7 }
 0x38e   :  { %v1449_v48 = vsel %vm1432_vm8, %v1414_v22, %v1405_v59  ;;  %3358 = vmatprep.mubr.msk.f32.mxu0 %vm257_vm4, %v1489_v4 }
 0x38f   :  { %v1456_v23 = vsel %vm198_vm1, %v1455_v16, %v1449_v48  ;;  %3468 = vmatpush3.bf16.msra.mxu1 %v3465_v24 }
 0x390   :  { %v1466_v13 = vadd.f32 %v1464_v50, %v1456_v23  ;;  %v1754_v50 = vrot.slane %v3220_v43, %v5372_v21 }
 0x392   :  { %v1490_v57 = vmul.f32 %v1486_v31, %v1466_v13  ;;  %v5373_v31 = vld [vmem:[#allocation5_spill] sm:$0xff] }
 0x394   :  { %3359 = vmatmul.mubr.msk.f32.vlgmr.msra.gmra.mrb[2].mxu0 %vm257_vm4, %v1490_v57  ;;  %v1768_v57 = vrot.slane %v3220_v43, %v5373_v31 }
 0x395   :  { %3472 = vmatpush3.bf16.msra.mxu0 %v3469_v18 }
 0x396   :  { %3474 = vmatprep.subr.bf16.mxu0 %v3473_v3 }
 0x399   :  { %3476 = vmatpush3.bf16.msra.mxu0 %v3473_v3 }
 0x39a   :  { %3478 = vmatprep.subr.bf16.mxu0 %v3477_v61 }
 0x39d   :  { %3480 = vmatpush3.bf16.msra.mxu0 %v3477_v61 }
 0x39e   :  { %3482 = vmatprep.subr.bf16.mxu0 %v3481_v42 }
 0x3a1   :  { %3484 = vmatpush3.bf16.msra.mxu0 %v3481_v42  ;;  %v5377_v42 = vld [vmem:[#allocation9_spill] sm:$0xff] }
 0x467   :  { %v3360_v45 = vpop.f32.mrb[2].mxu0 }
 0x468   :  { %v4632_v2 = vadd.f32 %v3699_v56, %v3360_v45  ;;  %v1563_v10 = vpop.f32.mrb[3].mxu0 }
 0x469   :  { %v1572_v58 = vadd.f32 %v3700_v0, %v1563_v10 }
 0x46a   :  { %5370 = vst [vmem:[#allocation11_spill] sm:$0xff] %v4632_v2  ;;  %v1611_v44 = vmul.f32 %v4632_v2, %v4632_v2 }
 0x46b   :  { %v1610_v62 = vmul.f32 %v1572_v58, %v1572_v58 }
 0x46c   :  { %v1615_v52 = vsel %vm77_vm0, %v1611_v44, 0.0 }
 0x46d   :  { %1616 = vadd.xlane.f32.xlu0 %v1615_v52  ;;  %v1612_v51 = vsel %vm77_vm0, %v1610_v62, 0.0 }
 0x46e   :  { %1613 = vadd.xlane.f32.xlu1 %v1612_v51 }
 0x4fa   :  { %v1617_v5 = vpop.xlane.xlu0 %1616 }
 0x4fb   :  { %v1619_v46 = vmul.f32 0.03125, %v1617_v5  ;;  %v1614_v47 = vpop.xlane.xlu1 %1613 }
 0x4fc   :  { %v1618_v32 = vmul.f32 0.03125, %v1614_v47 }
 0x4fd   :  { %v1621_v14 = vadd.f32 1e-05, %v1619_v46 }
 0x4fe   :  { %v1620_v55 = vadd.f32 1e-05, %v1618_v32 }
 0x4ff   :  { %3604 = vrsqrt.f32 %v1621_v14 }
 0x500   :  { %3606 = vrsqrt.f32 %v1620_v55 }
 0x509   :  { %v3605_v27 = vpop.eup %3604 }
 0x50a   :  { %v3607_v6 = vpop.eup %3606  ;;  %v1625_v1 = vmul.f32 %v3605_v27, %v4632_v2 }
 0x50b   :  { %v1624_v49 = vmul.f32 %v3607_v6, %v1572_v58 }
 0x50c   :  { %v1633_v12 = vmul.f32 %v3242_v63, %v1625_v1 }
 0x50d   :  { %v1632_v15 = vmul.f32 %v3242_v63, %v1624_v49 }
 0x50f   :  { %3369 = vmatprep.mubr.msk.f32.mxu1 %vm77_vm0, %v1632_v15 }
 0x510   :  { %3370 = vmatmul.mubr.msk.f32.vlgmr.msra.gmra.mrb[2].mxu1 %vm77_vm0, %v1633_v12 }
 0x5e3   :  { %v4687_v30 = vpop.f32.mrb[2].mxu1 }
 0x5e4   :  { %v1720_v35 = vmul.f32 %v4687_v30, %v1718_v40  ;;  %v1732_v29 = vrot.slane %v4687_v30, 2  ;;  %v1746_v11 = vrot.slane %v4687_v30, 4  ;;  %v4695_v60 = vpop.f32.mrb[3].mxu1  ;;  %v1760_v16 = vrot.slane %v4687_v30, 6 }
 0x5e5   :  { %v1719_v22 = vmul.f32 %v1718_v40, %v4695_v60  ;;  %v1731_v59 = vrot.slane %v4695_v60, 2  ;;  %v1745_v4 = vrot.slane %v4695_v60, 4  ;;  %v1759_v34 = vrot.slane %v4695_v60, 6  ;;  %v5378_v40 = vld [vmem:[#allocation10_spill] sm:$0xff] }
 0x5e6   :  { %v1728_v58 = vadd.f32 %v3245_v19, %v1720_v35  ;;  %v3248_v35 = vld [vmem:[%s5280_s6 + $0x1] ss:$0 sm:$0xff] }
 0x5e7   :  { %v1727_v48 = vadd.f32 %v3245_v19, %v1719_v22  ;;  %v1733_v23 = vsel %vm198_vm1, %v1731_v59, %v1732_v29  ;;  %v1736_v13 = vsel %vm198_vm1, 0.0, %v1731_v59  ;;  %v1747_v10 = vsel %vm213_vm2, %v1745_v4, %v1746_v11 }
 0x5e8   :  { %v1741_v45 = vmul.f32 %v1740_v17, %v1736_v13  ;;  %v1742_v56 = vmul.f32 %v1740_v17, %v1733_v23  ;;  %v1750_v0 = vsel %vm213_vm2, 0.0, %v1745_v4  ;;  %v1761_v44 = vsel %vm228_vm3, %v1759_v34, %v1760_v16 }
 0x5e9   :  { %v1755_v52 = vmul.f32 %v1754_v50, %v1750_v0  ;;  %v1764_v51 = vsel %vm228_vm3, 0.0, %v1759_v34  ;;  %v1756_v28 = vmul.f32 %v1754_v50, %v1747_v10  ;;  %v1770_v25 = vmul.f32 %v1768_v57, %v1761_v44 }
 0x5ea   :  { %v1743_v62 = vadd.f32 %v1741_v45, %v1727_v48  ;;  %v1744_v38 = vadd.f32 %v1742_v56, %v1728_v58  ;;  %v1769_v8 = vmul.f32 %v1768_v57, %v1764_v51  ;;  %v2992_v57 = vsub.f32 0.0, %v4695_v60 }
 0x5ec   :  { %v1757_v36 = vadd.f32 %v1755_v52, %v1743_v62  ;;  %v1758_v24 = vadd.f32 %v1756_v28, %v1744_v38  ;;  %v2994_v0 = vmul.f32 1.442695, %v2992_v57 }
 0x5ee   :  { %v1771_v5 = vadd.f32 %v1769_v8, %v1757_v36  ;;  %v1772_v46 = vadd.f32 %v1770_v25, %v1758_v24  ;;  %v5379_v8 = vld [vmem:[#allocation16_spill] sm:$0xff] }
 0x5f0   :  { %v1773_v47 = vsub.f32 0.0, %v1771_v5  ;;  %v1774_v32 = vsub.f32 0.0, %v1772_v46 }
 0x5f2   :  { %v1775_v14 = vmul.f32 1.442695, %v1773_v47  ;;  %v1777_v55 = vmul.f32 1.442695, %v1774_v32 }
 0x5f4   :  { %3608 = vpow2.f32 %v1775_v14 }
 0x5f5   :  { %3610 = vpow2.f32 %v1777_v55 }
 0x5fe   :  { %v3609_v27 = vpop.eup %3608 }
 0x5ff   :  { %v3611_v6 = vpop.eup %3610  ;;  %v1779_v63 = vadd.f32 1.0, %v3609_v27 }
 0x600   :  { %v1780_v1 = vadd.f32 1.0, %v3611_v6 }
 0x601   :  { %3612 = vrcp.f32 %v1779_v63 }
 0x602   :  { %3614 = vrcp.f32 %v1780_v1 }
 0x60b   :  { %v3613_v49 = vpop.eup %3612 }
 0x60c   :  { %v3615_v15 = vpop.eup %3614  ;;  %v4711_v12 = vmul.f32 %v3613_v49, %v1771_v5 }
 0x60d   :  { %v4713_v9 = vmul.f32 %v3615_v15, %v1772_v46 }
 0x60e   :  { %3388 = vmatprep.mubr.msk.f32.mxu0 %vm257_vm4, %v4711_v12 }
 0x60f   :  { %5374 = vst [vmem:[#allocation12_spill] sm:$0xff] %v4713_v9  ;;  %3389 = vmatmul.mubr.msk.f32.vlgmr.msra.gmra.mrb[4].mxu0 %vm257_vm4, %v4713_v9 }
 0x6e2   :  { %v3390_v37 = vpop.f32.mrb[4].mxu0 }
 0x6e3   :  { %v4719_v53 = vpop.f32.mrb[5].mxu0  ;;  %v2371_v18 = vrot.slane %v3390_v37, %v3834_v41  ;;  %v2383_v33 = vrot.slane %v3390_v37, %v5372_v21  ;;  %v2395_v3 = vrot.slane %v3390_v37, %v5373_v31  ;;  %v2407_v39 = vrot.slane %v3390_v37, %v5371_v7 }
 0x6e4   :  { %v2419_v61 = vrot.slane %v3390_v37, %v5375_v26  ;;  %v2431_v20 = vrot.slane %v3390_v37, %v5376_v54  ;;  %v2443_v43 = vrot.slane %v3390_v37, %v5377_v42  ;;  %v4729_v19 = vrot.slane %v3390_v37, %v5378_v40 }
 0x6e5   :  { %2378 = vbcast.lane.b32.xlu0 %v2371_v18, 328  ;;  %2374 = vbcast.lane.b32.xlu1 %v2371_v18, 320  ;;  %v1875_v29 = vadd.f32 %v3390_v37, %v3248_v35  ;;  %v2275_v16 = vrot.slane %v4719_v53, %v3834_v41  ;;  %v2287_v59 = vrot.slane %v4719_v53, %v5372_v21 }
 0x6e6   :  { %v2299_v4 = vrot.slane %v4719_v53, %v5373_v31  ;;  %v2311_v34 = vrot.slane %v4719_v53, %v5371_v7  ;;  %v2323_v48 = vrot.slane %v4719_v53, %v5375_v26  ;;  %v2335_v23 = vrot.slane %v4719_v53, %v5376_v54 }
 0x6e7   :  { %v1879_v11 = vand.u32 2147483647, %v1875_v29  ;;  %v2347_v13 = vrot.slane %v4719_v53, %v5377_v42  ;;  %v2359_v7 = vrot.slane %v4719_v53, %v5378_v40  ;;  %v2993_v31 = vsub.f32 0.0, %v4687_v30 }
 0x6e8   :  { %v4755_v45 = vadd.f32 %v3248_v35, %v4719_v53  ;;  %v1877_v62 = vmax.f32 %v1875_v29, 0.0 }
 0x6e9   :  { %2390 = vbcast.lane.b32.xlu0 %v2383_v33, 328  ;;  %2386 = vbcast.lane.b32.xlu1 %v2383_v33, 320  ;;  %v1881_v17 = vsub.f32 0.0, %v1879_v11  ;;  %v2996_v10 = vmul.f32 1.442695, %v2993_v31 }
 0x6ea   :  { %v1878_v58 = vand.u32 2147483647, %v4755_v45 }
 0x6eb   :  { %v1884_v22 = vmul.f32 1.442695, %v1881_v17 }
 0x6ec   :  { %v1880_v52 = vsub.f32 0.0, %v1878_v58 }
 0x6ed   :  { %2402 = vbcast.lane.b32.xlu0 %v2395_v3, 328  ;;  %2398 = vbcast.lane.b32.xlu1 %v2395_v3, 320  ;;  %3616 = vpow2.f32 %v1884_v22 }
 0x6ee   :  { %v1882_v28 = vmul.f32 1.442695, %v1880_v52  ;;  %v1876_v52 = vmax.f32 %v4755_v45, 0.0 }
 0x6f1   :  { %2414 = vbcast.lane.b32.xlu0 %v2407_v39, 328  ;;  %2410 = vbcast.lane.b32.xlu1 %v2407_v39, 320 }
 0x6f5   :  { %2426 = vbcast.lane.b32.xlu0 %v2419_v61, 328  ;;  %2422 = vbcast.lane.b32.xlu1 %v2419_v61, 320 }
 0x6f7   :  { %v3617_v50 = vpop.eup %3616 }
 0x6f8   :  { %v1887_v21 = vadd.f32 1.0, %v3617_v50 }
 0x6f9   :  { %2438 = vbcast.lane.b32.xlu0 %v2431_v20, 328  ;;  %2434 = vbcast.lane.b32.xlu1 %v2431_v20, 320 }
 0x6fa   :  { %3618 = vlog2.f32 %v1887_v21 }
 0x6fb   :  { %3620 = vpow2.f32 %v2996_v10 }
 0x6fc   :  { %3622 = vpow2.f32 %v2994_v0 }
 0x6fd   :  { %2450 = vbcast.lane.b32.xlu0 %v2443_v43, 328  ;;  %2446 = vbcast.lane.b32.xlu1 %v2443_v43, 320  ;;  %3624 = vpow2.f32 %v1882_v28 }
 0x701   :  { %2462 = vbcast.lane.b32.xlu0 %v4729_v19, 328  ;;  %2458 = vbcast.lane.b32.xlu1 %v4729_v19, 320 }
 0x704   :  { %v3619_v56 = vpop.eup %3618 }
 0x705   :  { %2774 = vbcast.lane.b32.xlu0 %v2371_v18, 344  ;;  %2770 = vbcast.lane.b32.xlu1 %v2371_v18, 336  ;;  %v1891_v44 = vmul.f32 0.6931472, %v3619_v56  ;;  %v3621_v36 = vpop.eup %3620 }
 0x706   :  { %v3623_v24 = vpop.eup %3622  ;;  %v2999_v5 = vadd.f32 1.0, %v3621_v36 }
 0x707   :  { %v4758_v51 = vadd.f32 %v1891_v44, %v1877_v62  ;;  %v2998_v46 = vadd.f32 1.0, %v3623_v24  ;;  %v3625_v63 = vpop.eup %3624 }
 0x708   :  { %3626 = vrcp.f32 %v2999_v5  ;;  %v1886_v18 = vadd.f32 1.0, %v3625_v63 }
 0x709   :  { %2782 = vbcast.lane.b32.xlu0 %v2383_v33, 344  ;;  %2778 = vbcast.lane.b32.xlu1 %v2383_v33, 336  ;;  %v2171_v38 = vmul.f32 %v4758_v51, %v4713_v9  ;;  %3628 = vrcp.f32 %v2998_v46  ;;  %v1945_v36 = vcombine.high %v4758_v51, %v4758_v51 }
 0x70a   :  { %3630 = vlog2.f32 %v1886_v18 }
 0x70b   :  { %v2230_v25 = vrot.slane %v2171_v38, %v5379_v8  ;;  %v2223_v53 = vcombine.high %v2171_v38, %v2171_v38 }
 0x70d   :  { %2820 = vbcast.lane.b32.xlu0 %v2395_v3, 344  ;;  %2816 = vbcast.lane.b32.xlu1 %v2395_v3, 336  ;;  %v2246_v47 = vrot.slane %v2230_v25, %v5379_v8  ;;  %v2238_v32 = vcombine.high %v2230_v25, %v2230_v25 }
 0x70f   :  { %v2499_v14 = vrot.slane %v2246_v47, %v3834_v41  ;;  %v2260_v55 = vrot.slane %v2238_v32, %v5379_v8  ;;  %v2268_v37 = vcombine.high %v2246_v47, %v2246_v47 }
 0x711   :  { %2828 = vbcast.lane.b32.xlu0 %v2407_v39, 344  ;;  %2824 = vbcast.lane.b32.xlu1 %v2407_v39, 336  ;;  %v2503_v15 = vrot.slane %v2260_v55, %v3834_v41  ;;  %v2270_v54 = vcombine.high %v2260_v55, %v2260_v55 }
 0x712   :  { %v3627_v42 = vpop.eup %3626 }
 0x713   :  { %v3629_v35 = vpop.eup %3628  ;;  %v2511_v17 = vrot.slane %v2270_v54, %v3834_v41  ;;  %v3005_v50 = vmul.f32 %v3627_v42, %v4687_v30  ;;  %v3237_v54 = vld [vmem:[%s5281_s9 + $0x58] sm:$0xff] }
 0x715   :  { %2866 = vbcast.lane.b32.xlu0 %v2419_v61, 344  ;;  %2862 = vbcast.lane.b32.xlu1 %v2419_v61, 336  ;;  %v2507_v61 = vrot.slane %v2268_v37, %v3834_v41  ;;  %v3235_v37 = vld [vmem:[%s5281_s9 + $0x48] sm:$0xff] }
 0x719   :  { %2874 = vbcast.lane.b32.xlu0 %v2431_v20, 344  ;;  %2870 = vbcast.lane.b32.xlu1 %v2431_v20, 336  ;;  %v2237_v20 = vrot.slane %v2223_v53, %v5379_v8  ;;  %v3236_v53 = vld [vmem:[%s5281_s9 + $0x50] sm:$0xff] }
 0x71a   :  { %v3489_v42 = vpack.c.bf16 %v3237_v54, %v3236_v53 }
 0x71b   :  { %v2239_v22 = vcombine.high %v2237_v20, %v2237_v20 }
 0x71d   :  { %2912 = vbcast.lane.b32.xlu0 %v2443_v43, 344  ;;  %2908 = vbcast.lane.b32.xlu1 %v2443_v43, 336 }
 0x721   :  { %2282 = vbcast.lane.b32.xlu1 %v2275_v16, 328  ;;  %2278 = vbcast.lane.b32.xlu0 %v2275_v16, 320 }
 0x725   :  { %2290 = vbcast.lane.b32.xlu1 %v2287_v59, 320  ;;  %2294 = vbcast.lane.b32.xlu0 %v2287_v59, 328 }
 0x729   :  { %2302 = vbcast.lane.b32.xlu1 %v2299_v4, 320  ;;  %2306 = vbcast.lane.b32.xlu0 %v2299_v4, 328 }
 0x72d   :  { %2314 = vbcast.lane.b32.xlu1 %v2311_v34, 320  ;;  %2318 = vbcast.lane.b32.xlu0 %v2311_v34, 328 }
 0x731   :  { %2326 = vbcast.lane.b32.xlu1 %v2323_v48, 320  ;;  %2330 = vbcast.lane.b32.xlu0 %v2323_v48, 328 }
 0x735   :  { %2338 = vbcast.lane.b32.xlu1 %v2335_v23, 320  ;;  %2342 = vbcast.lane.b32.xlu0 %v2335_v23, 328 }
 0x739   :  { %2350 = vbcast.lane.b32.xlu1 %v2347_v13, 320  ;;  %2354 = vbcast.lane.b32.xlu0 %v2347_v13, 328 }
 0x73d   :  { %2362 = vbcast.lane.b32.xlu1 %v2359_v7, 320  ;;  %2366 = vbcast.lane.b32.xlu0 %v2359_v7, 328 }
 0x741   :  { %2586 = vbcast.lane.b32.xlu1 %v2275_v16, 336  ;;  %2590 = vbcast.lane.b32.xlu0 %v2275_v16, 344  ;;  %v2253_v16 = vrot.slane %v2237_v20, %v5379_v8 }
 0x743   :  { %v2269_v56 = vcombine.high %v2253_v16, %v2253_v16 }
 0x745   :  { %2594 = vbcast.lane.b32.xlu1 %v2287_v59, 336  ;;  %2598 = vbcast.lane.b32.xlu0 %v2287_v59, 344  ;;  %v2523_v28 = vrot.slane %v2269_v56, %v3834_v41 }
 0x749   :  { %2632 = vbcast.lane.b32.xlu1 %v2299_v4, 336  ;;  %2636 = vbcast.lane.b32.xlu0 %v2299_v4, 344 }
 0x74d   :  { %2640 = vbcast.lane.b32.xlu1 %v2311_v34, 336  ;;  %2644 = vbcast.lane.b32.xlu0 %v2311_v34, 344  ;;  %v3004_v34 = vmul.f32 %v3629_v35, %v4695_v60  ;;  %v3631_v60 = vpop.eup %3630 }
 0x74e   :  { %v1889_v62 = vmul.f32 0.6931472, %v3631_v60 }
 0x750   :  { %v1892_v47 = vadd.f32 %v1889_v62, %v1876_v52 }
 0x751   :  { %2678 = vbcast.lane.b32.xlu1 %v2323_v48, 336  ;;  %2682 = vbcast.lane.b32.xlu0 %v2323_v48, 344 }
 0x752   :  { %v1903_v63 = vrot.slane %v1892_v47, %v5379_v8  ;;  %v2170_v35 = vmul.f32 %v1892_v47, %v4711_v12 }
 0x754   :  { %v1919_v20 = vrot.slane %v1903_v63, %v5379_v8  ;;  %v2181_v60 = vrot.slane %v2170_v35, %v5379_v8  ;;  %v2174_v62 = vcombine.high %v2170_v35, %v2170_v35 }
 0x755   :  { %2686 = vbcast.lane.b32.xlu1 %v2335_v23, 336  ;;  %2690 = vbcast.lane.b32.xlu0 %v2335_v23, 344  ;;  %v2267_v23 = vrot.slane %v2239_v22, %v5379_v8 }
 0x756   :  { %v1941_v52 = vcombine.high %v1919_v20, %v1919_v20  ;;  %v4896_v54 = vrot.slane %v2174_v62, %v5379_v8 }
 0x757   :  { %v2379_v27 = vpop.permute.xlu0 %2378  ;;  %v2375_v6 = vpop.permute.xlu1 %2374  ;;  %v2519_v30 = vrot.slane %v2267_v23, %v3834_v41  ;;  %v2271_v38 = vcombine.high %v2267_v23, %v2267_v23  ;;  %v3240_v23 = vld [vmem:[%s5281_s9 + $0x70] sm:$0xff] }
 0x758   :  { %v4766_v1 = vmul.f32 %v2499_v14, %v2379_v27  ;;  %v4768_v49 = vmul.f32 %v2499_v14, %v2375_v6  ;;  %v4814_v14 = vrot.slane %v1945_v36, %v5379_v8 }
 0x759   :  { %2724 = vbcast.lane.b32.xlu1 %v2347_v13, 336  ;;  %2728 = vbcast.lane.b32.xlu0 %v2347_v13, 344  ;;  %v2527_v32 = vrot.slane %v2271_v38, %v3834_v41 }
 0x75a   :  { %v1975_v18 = vrot.slane %v4814_v14, %v5379_v8 }
 0x75b   :  { %v2391_v33 = vpop.permute.xlu0 %2390  ;;  %v2387_v3 = vpop.permute.xlu1 %2386 }
 0x75c   :  { %v4771_v39 = vmul.f32 %v2503_v15, %v2391_v33  ;;  %v4773_v26 = vmul.f32 %v2503_v15, %v2387_v3  ;;  %v3234_v15 = vld [vmem:[%s5281_s9 + $0x40] sm:$0xff] }
 0x75d   :  { %2732 = vbcast.lane.b32.xlu1 %v2359_v7, 336  ;;  %2736 = vbcast.lane.b32.xlu0 %v2359_v7, 344 }
 0x75e   :  { %5380 = vst [vmem:[#allocation34_spill] sm:$0xff] %v4771_v39 }
 0x75f   :  { %v2403_v43 = vpop.permute.xlu0 %2402  ;;  %v2399_v40 = vpop.permute.xlu1 %2398 }
 0x760   :  { %v4777_v29 = vmul.f32 %v2507_v61, %v2403_v43  ;;  %v4779_v11 = vmul.f32 %v2507_v61, %v2399_v40  ;;  %v3485_v61 = vpack.c.bf16 %v3235_v37, %v3234_v15  ;;  %v3238_v43 = vld [vmem:[%s5281_s9 + $0x60] sm:$0xff]  ;;  %v3239_v40 = vld [vmem:[%s5281_s9 + $0x68] sm:$0xff] }
 0x761   :  { %2916 = vbcast.lane.b32.xlu1 %v4729_v19, 336  ;;  %2920 = vbcast.lane.b32.xlu0 %v4729_v19, 344  ;;  %v2515_v19 = vrot.slane %v2253_v16, %v3834_v41  ;;  %v1991_v16 = vcombine.high %v1975_v18, %v1975_v18 }
 0x762   :  { %3486 = vmatprep.subr.bf16.mxu1 %v3485_v61 }
 0x763   :  { %v2415_v59 = vpop.permute.xlu0 %2414  ;;  %v2411_v4 = vpop.permute.xlu1 %2410  ;;  %3488 = vmatpush3.bf16.msra.mxu1 %v3485_v61  ;;  %v2053_v56 = vrot.slane %v1991_v16, %v3834_v41 }
 0x764   :  { %v4787_v48 = vmul.f32 %v2511_v17, %v2415_v59  ;;  %v4789_v21 = vmul.f32 %v2511_v17, %v2411_v4  ;;  %v1911_v17 = vcombine.high %v1903_v63, %v1903_v63  ;;  %3490 = vmatprep.subr.bf16.mxu1 %v3489_v42  ;;  %v3493_v4 = vpack.c.bf16 %v3239_v40, %v3238_v43 }
 0x765   :  { %3008 = vrot.lane.b32.xlu1 %v3004_v34, %s3701_s27  ;;  %3010 = vrot.lane.b32.xlu0 %v3005_v50, %s3701_s27  ;;  %v4853_v34 = vrot.slane %v4758_v51, %v5379_v8  ;;  %v1997_v50 = vrot.slane %v1919_v20, %v3834_v41  ;;  %v2197_v63 = vrot.slane %v2181_v60, %v5379_v8 }
 0x766   :  { %5381 = vst [vmem:[#allocation13_spill] sm:$0xff] %v4787_v48  ;;  %5382 = vst [vmem:[#allocation14_spill] sm:$0xff] %v4789_v21  ;;  %v1933_v51 = vrot.slane %v1911_v17, %v5379_v8  ;;  %v2005_v20 = vrot.slane %v1941_v52, %v3834_v41 }
 0x767   :  { %v2427_v13 = vpop.permute.xlu0 %2426  ;;  %v2423_v7 = vpop.permute.xlu1 %2422  ;;  %3492 = vmatpush3.bf16.msra.mxu1 %v3489_v42  ;;  %v1968_v38 = vrot.slane %v4853_v34, %v5379_v8 }
 0x768   :  { %v4795_v31 = vmul.f32 %v2515_v19, %v2427_v13  ;;  %v4797_v57 = vmul.f32 %v2515_v19, %v2423_v7  ;;  %v1896_v19 = vcombine.high %v1892_v47, %v1892_v47  ;;  %v3241_v13 = vld [vmem:[%s5281_s9 + $0x78] sm:$0xff]  ;;  %v4865_v7 = vld [vmem:[%s5283_s7 + $0x10] sm:$0xff]  ;;  %3494 = vmatprep.subr.bf16.mxu1 %v3493_v4 }
 0x769   :  { %v2074_v36 = vmul.f32 %v4865_v7, %v1997_v50  ;;  %v2102_v37 = vmul.f32 %v4865_v7, %v2053_v56  ;;  %v1990_v42 = vcombine.high %v1968_v38, %v1968_v38 }
 0x76b   :  { %v2439_v10 = vpop.permute.xlu0 %2438  ;;  %v2435_v0 = vpop.permute.xlu1 %2434  ;;  %3496 = vmatpush3.bf16.msra.mxu1 %v3493_v4  ;;  %v2106_v43 = vmul.f32 1.442695, %v2074_v36  ;;  %v4919_v36 = vrot.slane %v4896_v54, %v5379_v8  ;;  %v2037_v9 = vrot.slane %v1990_v42, %v3834_v41 }
 0x76c   :  { %v4800_v58 = vmul.f32 %v2519_v30, %v2439_v10  ;;  %v4802_v44 = vmul.f32 %v2519_v30, %v2435_v0  ;;  %v4872_v30 = vld [vmem:[%s5283_s7 + $0x18] sm:$0xff] }
 0x76d   :  { %v2075_v47 = vmul.f32 %v4872_v30, %v1997_v50  ;;  %3632 = vpow2.f32 %v2106_v43 }
 0x76e   :  { %5383 = vst [vmem:[#allocation15_spill] sm:$0xff] %v4800_v58  ;;  %5384 = vst [vmem:[#allocation35_spill] sm:$0xff] %v4802_v44 }
 0x76f   :  { %v2451_v25 = vpop.permute.xlu0 %2450  ;;  %v2447_v24 = vpop.permute.xlu1 %2446  ;;  %v2108_v16 = vmul.f32 1.442695, %v2075_v47 }
 0x770   :  { %v4808_v5 = vmul.f32 %v2523_v28, %v2451_v25  ;;  %v4810_v46 = vmul.f32 %v2523_v28, %v2447_v24  ;;  %v3497_v28 = vpack.c.bf16 %v3241_v13, %v3240_v23  ;;  %v1910_v25 = vrot.slane %v1896_v19, %v5379_v8 }
 0x771   :  { %v2189_v24 = vcombine.high %v2181_v60, %v2181_v60  ;;  %v4904_v19 = vrot.slane %v1975_v18, %v3834_v41  ;;  %v4907_v23 = vrot.slane %v2197_v63, %v3834_v41  ;;  %v2219_v13 = vcombine.high %v2197_v63, %v2197_v63 }
 0x772   :  { %3498 = vmatprep.subr.bf16.mxu1 %v3497_v28  ;;  %v1926_v40 = vrot.slane %v1910_v25, %v5379_v8  ;;  %v1912_v35 = vcombine.high %v1910_v25, %v1910_v25  ;;  %v2078_v18 = vmul.f32 %v4865_v7, %v2005_v20  ;;  %v2162_v25 = vmul.f32 1.442695, %v2102_v37 }
 0x773   :  { %v2463_v55 = vpop.permute.xlu0 %2462  ;;  %v2459_v45 = vpop.permute.xlu1 %2458  ;;  %v2211_v17 = vrot.slane %v2189_v24, %v5379_v8  ;;  %3500 = vmatpush3.bf16.msra.mxu1 %v3497_v28  ;;  %v2079_v24 = vmul.f32 %v4872_v30, %v2005_v20  ;;  %3634 = vpow2.f32 %v2108_v16  ;;  %v4932_v63 = vrot.slane %v2219_v13, %v3834_v41 }
 0x774   :  { %v4816_v27 = vmul.f32 %v2527_v32, %v2463_v55  ;;  %v4818_v6 = vmul.f32 %v2527_v32, %v2459_v45  ;;  %v1943_v32 = vcombine.high %v1933_v51, %v1933_v51  ;;  %v2001_v55 = vrot.slane %v1933_v51, %v3834_v41 }
 0x775   :  { %v4911_v51 = vmul.f32 %v4872_v30, %v2053_v56  ;;  %v2013_v47 = vrot.slane %v1926_v40, %v3834_v41  ;;  %v4925_v28 = vrot.slane %v1912_v35, %v5379_v8  ;;  %v4928_v56 = vrot.slane %v2211_v17, %v3834_v41 }
 0x776   :  { %5385 = vst [vmem:[#allocation17_spill] sm:$0xff] %v4816_v27  ;;  %5386 = vst [vmem:[#allocation19_spill] sm:$0xff] %v4818_v6  ;;  %v2009_v4 = vrot.slane %v1943_v32, %v3834_v41  ;;  %v2076_v50 = vmul.f32 %v4865_v7, %v2001_v55  ;;  %v2077_v60 = vmul.f32 %v4872_v30, %v2001_v55  ;;  %v2114_v2 = vmul.f32 1.442695, %v2078_v18 }
 0x777   :  { %v4832_v33 = vpop.permute.xlu0 %2774  ;;  %v4834_v3 = vpop.permute.xlu1 %2770  ;;  %v2029_v20 = vrot.slane %v1968_v38, %v3834_v41  ;;  %v2221_v35 = vcombine.high %v2211_v17, %v2211_v17  ;;  %v1942_v16 = vcombine.high %v1926_v40, %v1926_v40  ;;  %v2082_v27 = vmul.f32 %v4865_v7, %v2013_v47 }
 0x778   :  { %v2110_v32 = vmul.f32 1.442695, %v2076_v50  ;;  %v2080_v55 = vmul.f32 %v4865_v7, %v2009_v4  ;;  %v2112_v15 = vmul.f32 1.442695, %v2077_v60  ;;  %v2081_v37 = vmul.f32 %v4872_v30, %v2009_v4 }
 0x779   :  { %v2116_v50 = vmul.f32 1.442695, %v2079_v24  ;;  %v2017_v13 = vrot.slane %v4925_v28, %v3834_v41  ;;  %3636 = vpow2.f32 %v2162_v25  ;;  %v4946_v4 = vrot.slane %v4919_v36, %v3834_v41 }
 0x77a   :  { %3638 = vpow2.f32 %v2110_v32  ;;  %v2118_v38 = vmul.f32 1.442695, %v2080_v55  ;;  %v2083_v60 = vmul.f32 %v4872_v30, %v2013_v47  ;;  %v2190_v17 = vcombine.high %v4896_v54, %v4896_v54 }
 0x77b   :  { %v4847_v22 = vpop.permute.xlu0 %2782  ;;  %v4849_v59 = vpop.permute.xlu1 %2778  ;;  %3640 = vpow2.f32 %v2112_v15  ;;  %v2120_v42 = vmul.f32 1.442695, %v2081_v37  ;;  %v2090_v40 = vmul.f32 %v4865_v7, %v2029_v20  ;;  %v4957_v25 = vrot.slane %v2221_v35, %v3834_v41 }
 0x77c   :  { %5387 = vst [vmem:[#allocation18_spill] sm:$0xff] %v4847_v22  ;;  %3642 = vpow2.f32 %v2114_v2  ;;  %v2094_v32 = vmul.f32 %v4865_v7, %v2037_v9  ;;  %v2021_v55 = vrot.slane %v1942_v16, %v3834_v41  ;;  %v2122_v47 = vmul.f32 1.442695, %v2082_v27  ;;  %v3633_v35 = vpop.eup %3632 }
 0x77d   :  { %3644 = vpow2.f32 %v2116_v50  ;;  %v2084_v54 = vmul.f32 %v4865_v7, %v2017_v13  ;;  %v2098_v15 = vmul.f32 %v4865_v7, %v4904_v19  ;;  %v2124_v37 = vmul.f32 1.442695, %v2083_v60  ;;  %v3635_v50 = vpop.eup %3634 }
 0x77e   :  { %3646 = vpow2.f32 %v2118_v38  ;;  %v4967_v2 = vrot.slane %v2190_v17, %v5379_v8  ;;  %v2138_v27 = vmul.f32 1.442695, %v2090_v40  ;;  %v2146_v6 = vmul.f32 1.442695, %v2094_v32 }
 0x77f   :  { %v4875_v10 = vpop.permute.xlu0 %2820  ;;  %v4877_v0 = vpop.permute.xlu1 %2816  ;;  %3648 = vpow2.f32 %v2120_v42  ;;  %v2086_v38 = vmul.f32 %v4865_v7, %v2021_v55  ;;  %v2095_v60 = vmul.f32 %v4872_v30, %v2037_v9  ;;  %v2154_v17 = vmul.f32 1.442695, %v2098_v15 }
 0x780   :  { %3650 = vpow2.f32 %v2122_v47  ;;  %v5394_v32 = vcombine.high %v4853_v34, %v4853_v34  ;;  %v2576_v9 = vmul.f32 0.0, %v3633_v35  ;;  %v2577_v48 = vmul.f32 0.0, %v3635_v50 }
 0x781   :  { %3652 = vpow2.f32 %v2124_v37  ;;  %v2148_v37 = vmul.f32 1.442695, %v2095_v60 }
 0x782   :  { %v1982_v16 = vrot.slane %v5394_v32, %v5379_v8  ;;  %3654 = vpow2.f32 %v2138_v27  ;;  %v4988_v27 = vmul.f32 1.442695, %v4911_v51 }
 0x783   :  { %v4891_v53 = vpop.permute.xlu0 %2828  ;;  %v4893_v61 = vpop.permute.xlu1 %2824  ;;  %3656 = vpow2.f32 %v2146_v6  ;;  %v5395_v6 = vcombine.high %v4814_v14, %v4814_v14 }
 0x784   :  { %5388 = vst [vmem:[#allocation23_spill] sm:$0xff] %v4891_v53  ;;  %5389 = vst [vmem:[#allocation36_spill] sm:$0xff] %v4893_v61  ;;  %v2099_v53 = vmul.f32 %v4872_v30, %v4904_v19  ;;  %v2130_v19 = vmul.f32 1.442695, %v2086_v38 }
 0x785   :  { %v1989_v50 = vrot.slane %v5395_v6, %v5379_v8 }
 0x786   :  { %v2156_v32 = vmul.f32 1.442695, %v2099_v53 }
 0x787   :  { %v4913_v62 = vpop.permute.xlu0 %2866  ;;  %v4915_v52 = vpop.permute.xlu1 %2862 }
 0x78b   :  { %v4936_v43 = vpop.permute.xlu0 %2874  ;;  %v4938_v45 = vpop.permute.xlu1 %2870 }
 0x78c   :  { %5390 = vst [vmem:[#allocation28_spill] sm:$0xff] %v4936_v43  ;;  %5391 = vst [vmem:[#allocation21_spill] sm:$0xff] %v4938_v45  ;;  %v4981_v45 = vpop.eup %3636 }
 0x78d   :  { %v3639_v47 = vpop.eup %3638 }
 0x78e   :  { %v2578_v60 = vmul.f32 0.0, %v3639_v47 }
 0x78f   :  { %v4952_v18 = vpop.permute.xlu0 %2912  ;;  %v4954_v24 = vpop.permute.xlu1 %2908 }
 0x790   :  { %5392 = vst [vmem:[#allocation32_spill] sm:$0xff] %v4952_v18  ;;  %5393 = vst [vmem:[#allocation20_spill] sm:$0xff] %v4954_v24  ;;  %v2085_v18 = vmul.f32 %v4872_v30, %v2017_v13  ;;  %v2091_v24 = vmul.f32 %v4872_v30, %v2029_v20  ;;  %v1944_v20 = vcombine.high %v4925_v28, %v4925_v28  ;;  %v2126_v13 = vmul.f32 1.442695, %v2084_v54 }
 0x791   :  { %v2087_v28 = vmul.f32 %v4872_v30, %v2021_v55  ;;  %v1992_v55 = vcombine.high %v1982_v16, %v1982_v16 }
 0x792   :  { %v2128_v42 = vmul.f32 1.442695, %v2085_v18  ;;  %v2140_v40 = vmul.f32 1.442695, %v2091_v24  ;;  %v2025_v18 = vrot.slane %v1944_v20, %v3834_v41  ;;  %v3641_v24 = vpop.eup %3640  ;;  %3658 = vpow2.f32 %v2126_v13 }
 0x793   :  { %v2283_v43 = vpop.permute.xlu1 %2282  ;;  %v2279_v58 = vpop.permute.xlu0 %2278  ;;  %v2132_v20 = vmul.f32 1.442695, %v2087_v28  ;;  %v5005_v28 = vrot.slane %v1989_v50, %v3834_v41 }
 0x794   :  { %v2545_v44 = vmul.f32 %v4907_v23, %v2283_v43  ;;  %v2544_v34 = vmul.f32 %v4907_v23, %v2279_v58  ;;  %v3643_v35 = vpop.eup %3642  ;;  %3660 = vpow2.f32 %v2128_v42  ;;  %v2033_v43 = vrot.slane %v1982_v16, %v3834_v41 }
 0x795   :  { %v3645_v38 = vpop.eup %3644  ;;  %3662 = vpow2.f32 %v2154_v17  ;;  %v2579_v42 = vmul.f32 0.0, %v3641_v24  ;;  %v2088_v61 = vmul.f32 %v4865_v7, %v2025_v18  ;;  %v2089_v14 = vmul.f32 %v4872_v30, %v2025_v18 }
 0x796   :  { %v3647_v58 = vpop.eup %3646  ;;  %v4998_v21 = vadd.f32 %v2576_v9, %v2544_v34  ;;  %v5000_v8 = vadd.f32 %v2577_v48, %v2545_v44  ;;  %3664 = vpow2.f32 %v2130_v19  ;;  %v2041_v16 = vrot.slane %v1992_v55, %v3834_v41 }
 0x797   :  { %v2291_v54 = vpop.permute.xlu1 %2290  ;;  %v2295_v15 = vpop.permute.xlu0 %2294  ;;  %3666 = vpow2.f32 %v2140_v40  ;;  %v1993_v17 = vcombine.high %v1989_v50, %v1989_v50  ;;  %v2092_v9 = vmul.f32 %v4865_v7, %v2033_v43  ;;  %v2134_v18 = vmul.f32 1.442695, %v2088_v61 }
 0x798   :  { %v2546_v53 = vmul.f32 %v4928_v56, %v2291_v54  ;;  %v2547_v23 = vmul.f32 %v4928_v56, %v2295_v15  ;;  %v3649_v22 = vpop.eup %3648  ;;  %3668 = vpow2.f32 %v2148_v37  ;;  %v2093_v24 = vmul.f32 %v4872_v30, %v2033_v43 }
 0x799   :  { %v3651_v56 = vpop.eup %3650  ;;  %v2622_v55 = vmul.f32 %v3643_v35, %v4998_v21  ;;  %v2623_v6 = vmul.f32 %v3645_v38, %v5000_v8  ;;  %3670 = vpow2.f32 %v2156_v32  ;;  %v2057_v35 = vrot.slane %v1993_v17, %v3834_v41 }
 0x79a   :  { %v3653_v48 = vpop.eup %3652  ;;  %v5010_v19 = vadd.f32 %v2578_v60, %v2546_v53  ;;  %v5012_v40 = vadd.f32 %v2579_v42, %v2547_v23  ;;  %3672 = vpow2.f32 %v2132_v20  ;;  %v2096_v53 = vmul.f32 %v4865_v7, %v2041_v16 }
 0x79b   :  { %v2303_v13 = vpop.permute.xlu1 %2302  ;;  %v2307_v51 = vpop.permute.xlu0 %2306  ;;  %3674 = vpow2.f32 %v2134_v18  ;;  %v2144_v18 = vmul.f32 1.442695, %v2093_v24  ;;  %v2101_v24 = vmul.f32 %v4872_v30, %v5005_v28 }
 0x79c   :  { %v2548_v47 = vmul.f32 %v4932_v63, %v2303_v13  ;;  %v2549_v54 = vmul.f32 %v4932_v63, %v2307_v51  ;;  %v5015_v34 = vpop.eup %3654  ;;  %v2136_v63 = vmul.f32 1.442695, %v2089_v14  ;;  %v2142_v13 = vmul.f32 1.442695, %v2092_v9 }
 0x79d   :  { %v5019_v37 = vpop.eup %3656  ;;  %v2624_v42 = vmul.f32 %v3647_v58, %v5010_v19  ;;  %v2625_v14 = vmul.f32 %v3649_v22, %v5012_v40  ;;  %v2487_v9 = vrot.slane %v4967_v2, %v3834_v41  ;;  %v2150_v22 = vmul.f32 1.442695, %v2096_v53 }
 0x79e   :  { %v3659_v61 = vpop.eup %3658  ;;  %v5024_v23 = vadd.f32 %v2622_v55, %v2548_v47  ;;  %v5026_v43 = vadd.f32 %v2623_v6, %v2549_v54  ;;  %3676 = vpow2.f32 %v2136_v63 }
 0x79f   :  { %v2315_v44 = vpop.permute.xlu1 %2314  ;;  %v2319_v15 = vpop.permute.xlu0 %2318  ;;  %3678 = vpow2.f32 %v4988_v27 }
 0x7a0   :  { %v2550_v50 = vmul.f32 %v4957_v25, %v2315_v44  ;;  %v2551_v60 = vmul.f32 %v4957_v25, %v2319_v15  ;;  %v3661_v38 = vpop.eup %3660  ;;  %v2097_v25 = vmul.f32 %v4872_v30, %v2041_v16  ;;  %v2668_v16 = vmul.f32 %v3651_v56, %v5024_v23 }
 0x7a1   :  { %v5032_v20 = vpop.eup %3662  ;;  %v2669_v15 = vmul.f32 %v3653_v48, %v5026_v43  ;;  %3680 = vpow2.f32 %v2142_v13 }
 0x7a2   :  { %v5038_v17 = vadd.f32 %v2624_v42, %v2550_v50  ;;  %v5040_v44 = vadd.f32 %v2625_v14, %v2551_v60  ;;  %v3665_v58 = vpop.eup %3664  ;;  %v2152_v63 = vmul.f32 1.442695, %v2097_v25  ;;  %v2104_v50 = vmul.f32 %v4865_v7, %v2057_v35 }
 0x7a3   :  { %v2327_v32 = vpop.permute.xlu1 %2326  ;;  %v2331_v51 = vpop.permute.xlu0 %2330  ;;  %3682 = vpow2.f32 %v2150_v22  ;;  %v2222_v25 = vcombine.high %v4967_v2, %v4967_v2  ;;  %v2160_v2 = vmul.f32 1.442695, %v2101_v24 }
 0x7a4   :  { %v2552_v47 = vmul.f32 %v4946_v4, %v2327_v32  ;;  %v2553_v54 = vmul.f32 %v4946_v4, %v2331_v51  ;;  %v2100_v4 = vmul.f32 %v4865_v7, %v5005_v28  ;;  %v3667_v55 = vpop.eup %3666  ;;  %v2670_v56 = vmul.f32 %v3659_v61, %v5038_v17 }
 0x7a5   :  { %v3669_v60 = vpop.eup %3668  ;;  %v2671_v48 = vmul.f32 %v3661_v38, %v5040_v44  ;;  %v5396_v7 = vcombine.high %v4919_v36, %v4919_v36  ;;  %3684 = vpow2.f32 %v2144_v18  ;;  %v2166_v28 = vmul.f32 1.442695, %v2104_v50 }
 0x7a6   :  { %v5048_v53 = vadd.f32 %v2668_v16, %v2552_v47  ;;  %v5050_v42 = vadd.f32 %v2669_v15, %v2553_v54  ;;  %v5056_v14 = vpop.eup %3670  ;;  %v2158_v47 = vmul.f32 1.442695, %v2100_v4  ;;  %v2105_v16 = vmul.f32 %v4872_v30, %v2057_v35 }
 0x7a7   :  { %v2339_v6 = vpop.permute.xlu1 %2338  ;;  %v2343_v32 = vpop.permute.xlu0 %2342  ;;  %v2491_v13 = vrot.slane %v5396_v7, %v3834_v41  ;;  %3686 = vpow2.f32 %v2152_v63  ;;  %v2495_v4 = vrot.slane %v2222_v25, %v3834_v41 }
 0x7a8   :  { %v2554_v51 = vmul.f32 %v2487_v9, %v2339_v6  ;;  %v2555_v27 = vmul.f32 %v2487_v9, %v2343_v32  ;;  %v3673_v54 = vpop.eup %3672  ;;  %v2714_v36 = vmul.f32 %v3665_v58, %v5048_v53  ;;  %3688 = vpow2.f32 %v2158_v47 }
 0x7a9   :  { %v2715_v32 = vmul.f32 %v3673_v54, %v5050_v42  ;;  %v3675_v7 = vpop.eup %3674  ;;  %3690 = vpow2.f32 %v2166_v28 }
 0x7aa   :  { %v5064_v38 = vadd.f32 %v2670_v56, %v2554_v51  ;;  %v5066_v22 = vadd.f32 %v2671_v48, %v2555_v27  ;;  %v3677_v18 = vpop.eup %3676  ;;  %v2168_v56 = vmul.f32 1.442695, %v2105_v16  ;;  %3692 = vpow2.f32 %v2160_v2 }
 0x7ab   :  { %v2351_v61 = vpop.permute.xlu1 %2350  ;;  %v2355_v9 = vpop.permute.xlu0 %2354 }
 0x7ac   :  { %v2556_v15 = vmul.f32 %v2491_v13, %v2351_v61  ;;  %v2557_v6 = vmul.f32 %v2491_v13, %v2355_v9  ;;  %v5076_v50 = vpop.eup %3678  ;;  %v2716_v27 = vmul.f32 %v3675_v7, %v5064_v38  ;;  %v2717_v58 = vmul.f32 %v3677_v18, %v5066_v22  ;;  %v5086_v13 = vld [vmem:[%s5282_s8 + $0x1] ss:$0 sm:$0xff] }
 0x7ad   :  { %v3681_v25 = vpop.eup %3680  ;;  %3694 = vpow2.f32 %v2168_v56 }
 0x7ae   :  { %v5072_v39 = vadd.f32 %v2714_v36, %v2556_v15  ;;  %v5074_v51 = vadd.f32 %v2715_v32, %v2557_v6  ;;  %v5094_v28 = vpop.eup %3682 }
 0x7af   :  { %v2363_v30 = vpop.permute.xlu1 %2362  ;;  %v2367_v35 = vpop.permute.xlu0 %2366 }
 0x7b0   :  { %v2558_v63 = vmul.f32 %v2495_v4, %v2363_v30  ;;  %v2559_v48 = vmul.f32 %v2495_v4, %v2367_v35  ;;  %v2760_v41 = vmul.f32 %v5015_v34, %v5072_v39  ;;  %v2761_v24 = vmul.f32 %v3667_v55, %v5074_v51  ;;  %v3685_v15 = vpop.eup %3684 }
 0x7b1   :  { %v5098_v55 = vmul.f32 %v5086_v13, %v4711_v12  ;;  %v5113_v30 = vpop.eup %3686 }
 0x7b2   :  { %v2764_v47 = vadd.f32 %v2760_v41, %v4768_v49  ;;  %v2765_v54 = vadd.f32 %v2761_v24, %v4766_v1  ;;  %v5090_v61 = vadd.f32 %v2716_v27, %v2558_v63  ;;  %v5092_v9 = vadd.f32 %v2717_v58, %v2559_v48  ;;  %v5120_v58 = vpop.eup %3688 }
 0x7b3   :  { %v2587_v34 = vpop.permute.xlu1 %2586  ;;  %v2591_v16 = vpop.permute.xlu0 %2590 }
 0x7b4   :  { %v2600_v6 = vmul.f32 %v2587_v34, %v4998_v21  ;;  %v2601_v49 = vmul.f32 %v2591_v16, %v5000_v8  ;;  %v2784_v1 = vmul.f32 %v4834_v3, %v2764_v47  ;;  %v2806_v36 = vmul.f32 %v5019_v37, %v2764_v47  ;;  %v5126_v41 = vpop.eup %3690 }
 0x7b5   :  { %v2785_v32 = vmul.f32 %v4832_v33, %v2765_v54  ;;  %v2807_v7 = vmul.f32 %v3669_v60, %v2765_v54  ;;  %v2762_v2 = vmul.f32 %v3681_v25, %v5090_v61  ;;  %v5107_v18 = vmul.f32 %v3685_v15, %v5092_v9  ;;  %v5134_v34 = vpop.eup %3692 }
 0x7b6   :  { %v2604_v12 = vsel %vm257_vm4, %v2600_v6, 0.0  ;;  %v2605_v4 = vsel %vm257_vm4, %v2601_v49, 0.0  ;;  %v2788_v21 = vsel %vm257_vm4, %v2784_v1, 0.0  ;;  %v2810_v8 = vadd.f32 %v2806_v36, %v4779_v11 }
 0x7b7   :  { %v2606_v3 = vadd.f32 %v2605_v4, %v2604_v12  ;;  %v2595_v37 = vpop.permute.xlu1 %2594  ;;  %v2599_v35 = vpop.permute.xlu0 %2598  ;;  %v2789_v33 = vsel %vm257_vm4, %v2785_v32, 0.0  ;;  %v2811_v60 = vadd.f32 %v2807_v7, %v4777_v29  ;;  %v5118_v27 = vadd.f32 %v2762_v2, %v4773_v26 }
 0x7b8   :  { %v2602_v56 = vmul.f32 %v2595_v37, %v5010_v19  ;;  %v2603_v63 = vmul.f32 %v2599_v35, %v5012_v40  ;;  %v2830_v11 = vmul.f32 %v4877_v0, %v2810_v8  ;;  %v2852_v48 = vmul.f32 %v5032_v20, %v2810_v8  ;;  %v5141_v32 = vpop.eup %3694 }
 0x7b9   :  { %v2607_v24 = vrot.slane %v2606_v3, 4  ;;  %v2790_v25 = vadd.f32 %v2789_v33, %v2788_v21  ;;  %v2831_v47 = vmul.f32 %v4875_v10, %v2811_v60  ;;  %v2853_v29 = vmul.f32 %v5056_v14, %v2811_v60 }
 0x7ba   :  { %v2613_v26 = vsel %vm257_vm4, %v2602_v56, 0.0  ;;  %v2614_v54 = vsel %vm257_vm4, %v2603_v63, 0.0  ;;  %v2834_v19 = vsel %vm257_vm4, %v2830_v11, 0.0  ;;  %v2856_v40 = vadd.f32 %v2852_v48, %v4797_v57 }
 0x7bb   :  { %v2608_v0 = vadd.f32 %v2607_v24, %v2606_v3  ;;  %v2615_v20 = vadd.f32 %v2614_v54, %v2613_v26  ;;  %v2633_v16 = vpop.permute.xlu1 %2632  ;;  %v2637_v15 = vpop.permute.xlu0 %2636  ;;  %v2791_v6 = vrot.slane %v2790_v25, 4  ;;  %v2835_v49 = vsel %vm257_vm4, %v2831_v47, 0.0 }
 0x7bc   :  { %v2646_v10 = vmul.f32 %v2633_v16, %v5024_v23  ;;  %v2647_v14 = vmul.f32 %v2637_v15, %v5026_v43  ;;  %v2876_v1 = vmul.f32 %v4915_v52, %v2856_v40  ;;  %v2898_v36 = vmul.f32 %v4981_v45, %v2856_v40 }
 0x7bd   :  { %v2609_v57 = vrot.slane %v2608_v0, 2  ;;  %v2616_v7 = vrot.slane %v2615_v20, 4  ;;  %v2792_v2 = vadd.f32 %v2791_v6, %v2790_v25  ;;  %v2836_v12 = vadd.f32 %v2835_v49, %v2834_v19 }
 0x7be   :  { %v2650_v4 = vsel %vm257_vm4, %v2646_v10, 0.0  ;;  %v2651_v21 = vsel %vm257_vm4, %v2647_v14, 0.0  ;;  %v5146_v8 = vsel %vm257_vm4, %v2876_v1, 0.0  ;;  %v5149_v23 = vadd.f32 %v2898_v36, %v4810_v46 }
 0x7bf   :  { %v2610_v43 = vadd.f32 %v2609_v57, %v2608_v0  ;;  %v2617_v52 = vadd.f32 %v2616_v7, %v2615_v20  ;;  %v2652_v3 = vadd.f32 %v2651_v21, %v2650_v4  ;;  %v2641_v45 = vpop.permute.xlu1 %2640  ;;  %v2645_v37 = vpop.permute.xlu0 %2644  ;;  %v2793_v35 = vrot.slane %v2792_v2, 2 }
 0x7c0   :  { %v2648_v33 = vmul.f32 %v2641_v45, %v5038_v17  ;;  %v2649_v60 = vmul.f32 %v2645_v37, %v5040_v44  ;;  %v2837_v56 = vrot.slane %v2836_v12, 4  ;;  %v2857_v63 = vadd.f32 %v2853_v29, %v4795_v31 }
 0x7c1   :  { %v2611_v11 = vrot.slane %v2610_v43, 1  ;;  %v2618_v48 = vrot.slane %v2617_v52, 2  ;;  %v2653_v24 = vrot.slane %v2652_v3, 4  ;;  %v5154_v25 = vadd.f32 %v2793_v35, %v2792_v2 }
 0x7c2   :  { %v2659_v46 = vsel %vm257_vm4, %v2648_v33, 0.0  ;;  %v2660_v47 = vsel %vm257_vm4, %v2649_v60, 0.0  ;;  %v5158_v26 = vadd.f32 %v2837_v56, %v2836_v12  ;;  %v2877_v54 = vmul.f32 %v4913_v62, %v2857_v63  ;;  %v5399_v33 = vld [vmem:[#allocation18_spill] sm:$0xff] }
 0x7c3   :  { %v5161_v19 = vadd.f32 %v2611_v11, %v2610_v43  ;;  %v2619_v17 = vadd.f32 %v2618_v48, %v2617_v52  ;;  %v2654_v44 = vadd.f32 %v2653_v24, %v2652_v3  ;;  %v2661_v40 = vadd.f32 %v2660_v47, %v2659_v46  ;;  %v2679_v0 = vpop.permute.xlu1 %2678  ;;  %v2683_v31 = vpop.permute.xlu0 %2682  ;;  %v5397_v43 = vld [vmem:[#allocation34_spill] sm:$0xff] }
 0x7c4   :  { %v2692_v29 = vmul.f32 %v2679_v0, %v5048_v53  ;;  %v2693_v20 = vmul.f32 %v2683_v31, %v5050_v42  ;;  %v5166_v16 = vsel %vm257_vm4, %v2877_v54, 0.0  ;;  %v2899_v15 = vmul.f32 %v5076_v50, %v2857_v63  ;;  %v5400_v54 = vld [vmem:[#allocation36_spill] sm:$0xff] }
 0x7c5   :  { %v2620_v6 = vrot.slane %v2619_v17, 1  ;;  %v2655_v49 = vrot.slane %v2654_v44, 2  ;;  %v2662_v10 = vrot.slane %v2661_v40, 4  ;;  %v2786_v62 = vmul.f32 %v4849_v59, %v5118_v27 }
 0x7c6   :  { %v2696_v14 = vsel %vm257_vm4, %v2692_v29, 0.0  ;;  %v2697_v1 = vsel %vm257_vm4, %v2693_v20, 0.0  ;;  %v5174_v36 = vadd.f32 %v2899_v15, %v4808_v5  ;;  %v2808_v53 = vmul.f32 %v5094_v28, %v5118_v27  ;;  %v5398_v28 = vld [vmem:[#allocation14_spill] sm:$0xff] }
 0x7c7   :  { %v5178_v42 = vadd.f32 %v2620_v6, %v2619_v17  ;;  %v2656_v57 = vadd.f32 %v2655_v49, %v2654_v44  ;;  %v2663_v50 = vadd.f32 %v2662_v10, %v2661_v40  ;;  %v2698_v7 = vadd.f32 %v2697_v1, %v2696_v14  ;;  %v2687_v2 = vpop.permute.xlu1 %2686  ;;  %v2691_v12 = vpop.permute.xlu0 %2690 }
 0x7c8   :  { %v2694_v4 = vmul.f32 %v2687_v2, %v5064_v38  ;;  %v2695_v59 = vmul.f32 %v2691_v12, %v5066_v22  ;;  %v2797_v21 = vsel %vm257_vm4, %v2786_v62, 0.0  ;;  %v2767_v5 = vadd.f32 %v5107_v18, %v5397_v43 }
 0x7c9   :  { %v2657_v52 = vrot.slane %v2656_v57, 1  ;;  %v2664_v3 = vrot.slane %v2663_v50, 2  ;;  %v2699_v45 = vrot.slane %v2698_v7, 4  ;;  %v2812_v27 = vadd.f32 %v2808_v53, %v5398_v28 }
 0x7ca   :  { %v2705_v37 = vsel %vm257_vm4, %v2694_v4, 0.0  ;;  %v2706_v35 = vsel %vm257_vm4, %v2695_v59, 0.0  ;;  %v2787_v60 = vmul.f32 %v5399_v33, %v2767_v5  ;;  %v2809_v38 = vmul.f32 %v5113_v30, %v2767_v5  ;;  %v5402_v4 = vld [vmem:[#allocation13_spill] sm:$0xff] }
 0x7cb   :  { %v2658_v56 = vadd.f32 %v2657_v52, %v2656_v57  ;;  %v2665_v22 = vadd.f32 %v2664_v3, %v2663_v50  ;;  %v2700_v63 = vadd.f32 %v2699_v45, %v2698_v7  ;;  %v2707_v11 = vadd.f32 %v2706_v35, %v2705_v37  ;;  %v2725_v48 = vpop.permute.xlu1 %2724  ;;  %v2729_v24 = vpop.permute.xlu0 %2728  ;;  %v5401_v57 = vld [vmem:[#allocation35_spill] sm:$0xff]  ;;  %v5403_v5 = vld [vmem:[#allocation21_spill] sm:$0xff] }
 0x7cc   :  { %v2738_v18 = vmul.f32 %v2725_v48, %v5072_v39  ;;  %v2739_v46 = vmul.f32 %v2729_v24, %v5074_v51  ;;  %v2798_v47 = vsel %vm257_vm4, %v2787_v60, 0.0  ;;  %v2832_v17 = vmul.f32 %v5400_v54, %v2812_v27  ;;  %v5404_v35 = vld [vmem:[#allocation23_spill] sm:$0xff] }
 0x7cd   :  { %v2666_v44 = vrot.slane %v2665_v22, 1  ;;  %v2701_v40 = vrot.slane %v2700_v63, 2  ;;  %v2708_v0 = vrot.slane %v2707_v11, 4  ;;  %v2799_v31 = vadd.f32 %v2798_v47, %v2797_v21  ;;  %v5405_v24 = vld [vmem:[#allocation19_spill] sm:$0xff] }
 0x7ce   :  { %v2742_v30 = vsel %vm257_vm4, %v2738_v18, 0.0  ;;  %v2743_v29 = vsel %vm257_vm4, %v2739_v46, 0.0  ;;  %v2843_v20 = vsel %vm257_vm4, %v2832_v17, 0.0  ;;  %v2854_v15 = vmul.f32 %v5120_v58, %v2812_v27 }
 0x7cf   :  { %v2667_v6 = vadd.f32 %v2666_v44, %v2665_v22  ;;  %v2702_v39 = vadd.f32 %v2701_v40, %v2700_v63  ;;  %v2709_v49 = vadd.f32 %v2708_v0, %v2707_v11  ;;  %v2744_v51 = vadd.f32 %v2743_v29, %v2742_v30  ;;  %v2733_v10 = vpop.permute.xlu1 %2732  ;;  %v2737_v62 = vpop.permute.xlu0 %2736  ;;  %v5406_v0 = vld [vmem:[#allocation15_spill] sm:$0xff] }
 0x7d0   :  { %v2740_v14 = vmul.f32 %v2733_v10, %v5090_v61  ;;  %v2741_v1 = vmul.f32 %v2737_v62, %v5092_v9  ;;  %v2800_v53 = vrot.slane %v2799_v31, 4  ;;  %v2858_v50 = vadd.f32 %v2854_v15, %v5401_v57  ;;  %v5407_v10 = vld [vmem:[#allocation28_spill] sm:$0xff]  ;;  %v5408_v57 = vld [vmem:[#allocation17_spill] sm:$0xff] }
 0x7d1   :  { %v2703_v7 = vrot.slane %v2702_v39, 1  ;;  %v2710_v2 = vrot.slane %v2709_v49, 2  ;;  %v2745_v12 = vrot.slane %v2744_v51, 4  ;;  %v2813_v59 = vadd.f32 %v2809_v38, %v5402_v4 }
 0x7d2   :  { %v2751_v58 = vsel %vm257_vm4, %v2740_v14, 0.0  ;;  %v2752_v21 = vsel %vm257_vm4, %v2741_v1, 0.0  ;;  %v2801_v43 = vadd.f32 %v2800_v53, %v2799_v31  ;;  %v2878_v52 = vmul.f32 %v5403_v5, %v2858_v50  ;;  %v5409_v5 = vld [vmem:[#allocation20_spill] sm:$0xff] }
 0x7d3   :  { %v2704_v3 = vadd.f32 %v2703_v7, %v2702_v39  ;;  %v2711_v45 = vadd.f32 %v2710_v2, %v2709_v49  ;;  %v2746_v61 = vadd.f32 %v2745_v12, %v2744_v51  ;;  %v2753_v28 = vadd.f32 %v2752_v21, %v2751_v58  ;;  %v2917_v63 = vpop.permute.xlu1 %2916  ;;  %v2921_v1 = vpop.permute.xlu0 %2920 }
 0x7d4   :  { %v2802_v9 = vrot.slane %v2801_v43, 2  ;;  %v2889_v27 = vsel %vm257_vm4, %v2878_v52, 0.0  ;;  %v2900_v37 = vmul.f32 %v5126_v41, %v2858_v50  ;;  %v2833_v33 = vmul.f32 %v5404_v35, %v2813_v59 }
 0x7d5   :  { %v2712_v60 = vrot.slane %v2711_v45, 1  ;;  %v2747_v38 = vrot.slane %v2746_v61, 2  ;;  %v2754_v22 = vrot.slane %v2753_v28, 4  ;;  %v2855_v11 = vmul.f32 %v5134_v34, %v2813_v59 }
 0x7d6   :  { %v2803_v48 = vadd.f32 %v2802_v9, %v2801_v43  ;;  %v2904_v18 = vadd.f32 %v2900_v37, %v5405_v24  ;;  %v2844_v46 = vsel %vm257_vm4, %v2833_v33, 0.0  ;;  %v2946_v47 = vsel %vm1417_vm5, %v5178_v42, %v5161_v19 }
 0x7d7   :  { %v2713_v54 = vadd.f32 %v2712_v60, %v2711_v45  ;;  %v2748_v17 = vadd.f32 %v2747_v38, %v2746_v61  ;;  %v2755_v41 = vadd.f32 %v2754_v22, %v2753_v28  ;;  %v2845_v44 = vadd.f32 %v2844_v46, %v2843_v20 }
 0x7d8   :  { %v2924_v40 = vmul.f32 %v2917_v63, %v2904_v18  ;;  %v2859_v31 = vadd.f32 %v2855_v11, %v5406_v0  ;;  %v2950_v30 = vsel %vm1422_vm6, %v2667_v6, %v2658_v56  ;;  %v2795_v34 = vrot.slane %v5154_v25, 1  ;;  %v3009_v18 = vpop.permute.xlu1 %3008 }
 0x7d9   :  { %v2749_v29 = vrot.slane %v2748_v17, 1  ;;  %v2756_v15 = vrot.slane %v2755_v41, 2  ;;  %v2846_v39 = vrot.slane %v2845_v44, 4  ;;  %v2954_v49 = vsel %vm1427_vm7, %v2713_v54, %v2704_v3 }
 0x7da   :  { %v2935_v51 = vsel %vm257_vm4, %v2924_v40, 0.0  ;;  %v2879_v19 = vmul.f32 %v5407_v10, %v2859_v31  ;;  %v2901_v42 = vmul.f32 %v5141_v32, %v2859_v31  ;;  %v2976_v20 = vsel %vm228_vm3, %v2946_v47, %v2950_v30 }
 0x7db   :  { %v2750_v62 = vadd.f32 %v2749_v29, %v2748_v17  ;;  %v2757_v14 = vadd.f32 %v2756_v15, %v2755_v41  ;;  %v2847_v53 = vadd.f32 %v2846_v39, %v2845_v44  ;;  %v2977_v56 = vsel %vm213_vm2, %v2976_v20, %v2954_v49 }
 0x7dc   :  { %v2890_v6 = vsel %vm257_vm4, %v2879_v19, 0.0  ;;  %v2905_v50 = vadd.f32 %v2901_v42, %v5408_v57  ;;  %v2796_v7 = vadd.f32 %v2795_v34, %v5154_v25  ;;  %v2804_v2 = vrot.slane %v2803_v48, 1 }
 0x7dd   :  { %v2758_v12 = vrot.slane %v2757_v14, 1  ;;  %v2891_v4 = vadd.f32 %v2890_v6, %v2889_v27  ;;  %v2839_v59 = vrot.slane %v5158_v26, 2  ;;  %v2848_v32 = vrot.slane %v2847_v53, 2  ;;  %v5410_v27 = vld [vmem:[#allocation32_spill] sm:$0xff] }
 0x7de   :  { %v2925_v58 = vmul.f32 %v2921_v1, %v2905_v50  ;;  %v2805_v21 = vadd.f32 %v2804_v2, %v2803_v48  ;;  %v2882_v43 = vadd.f32 %v5166_v16, %v5146_v8  ;;  %v2922_v52 = vmul.f32 %v5409_v5, %v5149_v23  ;;  %v3011_v2 = vpop.permute.xlu0 %3010 }
 0x7df   :  { %v2759_v3 = vadd.f32 %v2758_v12, %v2757_v14  ;;  %v2892_v45 = vrot.slane %v2891_v4, 4  ;;  %v2840_v61 = vadd.f32 %v2839_v59, %v5158_v26  ;;  %v2849_v28 = vadd.f32 %v2848_v32, %v2847_v53  ;;  %v5412_v59 = vld [vmem:[#allocation11_spill] sm:$0xff] }
 0x7e0   :  { %v2936_v25 = vsel %vm257_vm4, %v2925_v58, 0.0  ;;  %v2883_v9 = vrot.slane %v2882_v43, 4  ;;  %v2923_v37 = vmul.f32 %v5410_v27, %v5174_v36  ;;  %v2926_v35 = vsel %vm257_vm4, %v2922_v52, 0.0  ;;  %v3115_v52 = vld [vmem:[%s5284_s11 + $0x8] sm:$0xff] }
 0x7e1   :  { %v2893_v33 = vadd.f32 %v2892_v45, %v2891_v4  ;;  %v2937_v60 = vadd.f32 %v2936_v25, %v2935_v51  ;;  %v2958_v8 = vsel %vm1432_vm8, %v2759_v3, %v2750_v62  ;;  %v2841_v16 = vrot.slane %v2840_v61, 1  ;;  %v3116_v3 = vld [vmem:[%s5284_s11 + $0x10] sm:$0xff] }
 0x7e2   :  { %v2978_v23 = vsel %vm198_vm1, %v2977_v56, %v2958_v8  ;;  %v2850_v38 = vrot.slane %v2849_v28, 1  ;;  %v2884_v22 = vadd.f32 %v2883_v9, %v2882_v43  ;;  %v2927_v26 = vsel %vm257_vm4, %v2923_v37, 0.0  ;;  %v5411_v56 = vld [vmem:[#allocation12_spill] sm:$0xff] }
 0x7e3   :  { %v2894_v63 = vrot.slane %v2893_v33, 2  ;;  %v2938_v11 = vrot.slane %v2937_v60, 4  ;;  %v2990_v48 = vadd.f32 %v5098_v55, %v2978_v23  ;;  %v2842_v24 = vadd.f32 %v2841_v16, %v2840_v61 }
 0x7e4   :  { %v2851_v36 = vadd.f32 %v2850_v38, %v2849_v28  ;;  %v2885_v46 = vrot.slane %v2884_v22, 2  ;;  %v2928_v47 = vadd.f32 %v2927_v26, %v2926_v35  ;;  %v2962_v54 = vsel %vm1417_vm5, %v2805_v21, %v2796_v7  ;;  %v3117_v28 = vld [vmem:[%s5284_s11 + $0x18] sm:$0xff] }
 0x7e5   :  { %v2939_v17 = vadd.f32 %v2938_v11, %v2937_v60  ;;  %v3014_v41 = vmul.f32 %v3009_v18, %v2990_v48  ;;  %v2895_v44 = vadd.f32 %v2894_v63, %v2893_v33  ;;  %v2989_v6 = vmul.f32 %v5086_v13, %v5411_v56  ;;  %v3114_v13 = vld [vmem:[%s5284_s11] sm:$0xff] }
 0x7e6   :  { %v2886_v40 = vadd.f32 %v2885_v46, %v2884_v22  ;;  %v2929_v0 = vrot.slane %v2928_v47, 4  ;;  %v2966_v31 = vsel %vm1422_vm6, %v2851_v36, %v2842_v24  ;;  %v3703_v5 = vmov 0.0|0.0   ;;  %v3252_v60 = vld [vmem:[%s5286_s10] ss:$0 sm:$0xff] }
 0x7e7   :  { %v2940_v30 = vrot.slane %v2939_v17, 2  ;;  %v2896_v34 = vrot.slane %v2895_v44, 1  ;;  %v2979_v29 = vsel %vm228_vm3, %v2962_v54, %v2966_v31  ;;  %3407 = vmatprep.mubr.msk.f32.mxu1 %vm257_vm4, %v3014_v41  ;;  %3501 = vmatprep.subr.bf16.mxu0 %v3703_v5  ;;  %v3705_v45 = vmov 0.0  }
 0x7e8   :  { %v2887_v55 = vrot.slane %v2886_v40, 1  ;;  %v2930_v15 = vadd.f32 %v2929_v0, %v2928_v47  ;;  %3418 = vmatprep.mubr.msk.f32.mxu0 %vm3704_vm10, %v3705_v45  ;;  %v3502_v61 = vpack.c.bf16 %v3115_v52, %v3114_v13  ;;  %v3505_v25 = vpack.c.bf16 %v3117_v28, %v3116_v3 }
 0x7e9   :  { %v2941_v39 = vadd.f32 %v2940_v30, %v2939_v17  ;;  %v2897_v49 = vadd.f32 %v2896_v34, %v2895_v44  ;;  %v18_v9 = vstv %s5285_s12 }
 0x7ea   :  { %v2888_v51 = vadd.f32 %v2887_v55, %v2886_v40  ;;  %v2931_v10 = vrot.slane %v2930_v15, 2  ;;  %3503 = vmatpush3.bf16.msra.mxu0 %v3502_v61  ;;  %19 = vst [vmem:[#allocation2] sm:$0x1] %v18_v9 }
 0x7eb   :  { %v2942_v19 = vrot.slane %v2941_v39, 1  ;;  %3504 = vmatprep.subr.bf16.mxu0 %v3703_v5 }
 0x7ec   :  { %v2932_v42 = vadd.f32 %v2931_v10, %v2930_v15  ;;  %v2970_v20 = vsel %vm1427_vm7, %v2897_v49, %v2888_v51 }
 0x7ed   :  { %v2980_v62 = vsel %vm213_vm2, %v2979_v29, %v2970_v20  ;;  %v2943_v14 = vadd.f32 %v2942_v19, %v2941_v39 }
 0x7ee   :  { %v2933_v1 = vrot.slane %v2932_v42, 1  ;;  %3506 = vmatpush3.bf16.msra.mxu0 %v3505_v25 }
 0x7f0   :  { %v2934_v53 = vadd.f32 %v2933_v1, %v2932_v42 }
 0x7f1   :  { %v3253_v38 = vld [vmem:[#allocation2] ss:$0 sm:$0xff] }
 0x7f2   :  { %v2974_v57 = vsel %vm1432_vm8, %v2943_v14, %v2934_v53 }
 0x7f3   :  { %v2981_v50 = vsel %vm198_vm1, %v2980_v62, %v2974_v57 }
 0x7f4   :  { %v2991_v7 = vadd.f32 %v2989_v6, %v2981_v50 }
 0x7f6   :  { %v3015_v12 = vmul.f32 %v3011_v2, %v2991_v7 }
 0x7f8   :  { %3408 = vmatmul.mubr.msk.f32.vlgmr.msra.gmra.mrb[4].mxu1 %vm257_vm4, %v3015_v12 }
 0x8cb   :  { %v3409_v4 = vpop.f32.mrb[4].mxu1 }
 0x8cc   :  { %v3096_v32 = vadd.f32 %v3409_v4, %v5412_v59  ;;  %v3088_v58 = vpop.f32.mrb[5].mxu1 }
 0x8ce   :  { %v3097_v21 = vmul.f32 %v3096_v32, %v3096_v32 }
 0x8d0   :  { %v3099_v43 = vsel %vm3098_vm9, %v3097_v21, 0.0 }
 0x8d1   :  { %3100 = vadd.xlane.f32.xlu1 %v3099_v43 }
 0x95e   :  { %v3101_v27 = vpop.xlane.xlu1 %3100 }
 0x95f   :  { %v3102_v37 = vmul.f32 0.03125, %v3101_v27 }
 0x961   :  { %v3103_v35 = vadd.f32 1e-05, %v3102_v37 }
 0x963   :  { %3696 = vrsqrt.f32 %v3103_v35 }
 0x96d   :  { %v3697_v33 = vpop.eup %3696 }
 0x96e   :  { %v3105_v8 = vmul.f32 %v3697_v33, %v3096_v32 }
 0x970   :  { %v3113_v16 = vmul.f32 %v3252_v60, %v3105_v8 }
 0x972   :  { %v3126_v23 = vrot.slane %v3113_v16, 6 }
 0x974   :  { %3419 = vmatmul.mubr.msk.f32.vlgmr.msra.gmra.mrb[6].mxu0 %vm77_vm0, %v3126_v23 }
 0xa47   :  { %v3195_v22 = vpop.f32.mrb[6].mxu0 }
 0xa48   :  { %v3196_v26 = vadd.f32 %v3253_v38, %v3195_v22  ;;  %v3420_v63 = vpop.f32.mrb[7].mxu0 }
 0xa4a   :  { %3200 = vst.msk [vmem:[%s5287_s13] sm:$0x3] %vm3199_vm11, %v3196_v26 }

</bundles_post_ra>
